<compile_context>
chip_gen: v5e
topology: v5e:2x2
jax: 0.10.0
libtpu: 0.0.40
codegen_flags: <defaults>
</compile_context>

<pallas_src>
import jax
import jax.numpy as jnp
from jax.experimental import pallas as pl
from jax.experimental.pallas import tpu as pltpu


def _round_up(n: int, m: int) -> int:
    return ((n + m - 1) // m) * m


def _make_kernel(n_layers: int, num_groups: int, group_size: int,
                 eps: float, matmul_dtype):
    mid = n_layers // 2
    inv_gs = 1.0 / float(group_size)

    def kernel(x_ref, t_ref, g_ref, *rest):
        layer_refs = rest[:4 * n_layers]
        wt_ref, bt_ref, wo_ref, bo_ref, o_ref = rest[4 * n_layers:]

        x = x_ref[...]                       # (TB, dim_p)  f32
        G = g_ref[...]                       # (hid_p, ng)  f32, zero rows for pad

        h = x
        for i in range(n_layers):
            w = layer_refs[4 * i][...]       # (in_p, hid_p)  matmul_dtype
            b = layer_refs[4 * i + 1][...]   # (1, hid_p)     f32
            ggt = layer_refs[4 * i + 2][...]  # (ng, hid_p)   f32, gamma folded
            beta = layer_refs[4 * i + 3][...]  # (1, hid_p)   f32

            # ---- Linear: bf16 (or f32) operands on the MXU, f32 accumulate ----
            h = jnp.dot(h.astype(matmul_dtype), w,
                        preferred_element_type=jnp.float32) + b

            # ---- GroupNorm statistics: single stacked f32 MXU push ----
            tb = h.shape[0]
            stacked = jnp.concatenate([h, h * h], axis=0)       # (2*TB, hid_p)
            stats = jnp.dot(stacked, G, preferred_element_type=jnp.float32)
            mean_g = stats[:tb] * inv_gs                         # (TB, ng)
            var_g = jnp.maximum(stats[tb:] * inv_gs - mean_g * mean_g, 0.0)
            invstd_g = jax.lax.rsqrt(var_g + eps)                # EUP on (TB, ng)

            # ---- broadcast scale/shift back to channels (gamma folded in ggt) ----
            scale = jnp.dot(invstd_g, ggt, preferred_element_type=jnp.float32)
            shift = jnp.dot(-mean_g * invstd_g, ggt,
                            preferred_element_type=jnp.float32) + beta
            h = h * scale + shift

            # ---- SiLU ----
            h = h * jax.nn.sigmoid(h)

            # ---- time-embedding injection after the middle layer ----
            if i == mid:
                h = h + jnp.dot(t_ref[...].astype(matmul_dtype), wt_ref[...],
                                preferred_element_type=jnp.float32) + bt_ref[...]

        out = x + jnp.dot(h.astype(matmul_dtype), wo_ref[...],
                          preferred_element_type=jnp.float32) + bo_ref[...]
        o_ref[...] = out.astype(o_ref.dtype)

    return kernel


def residual_block_pallas(x, t_emb, params, *, n_layers, num_groups,
                          eps=1e-5, batch_tile=128,
                          matmul_dtype=jnp.bfloat16):
    B, dim = x.shape
    te_dim = t_emb.shape[1]
    dim_hidden = params["layers"][0]["w"].shape[1]
    if dim_hidden % num_groups != 0:
        raise ValueError("dim_hidden must be divisible by num_groups")
    group_size = dim_hidden // num_groups

    LANE, SUB = 128, 8
    dim_p = _round_up(dim, LANE)
    hid_p = _round_up(dim_hidden, LANE)
    te_p = _round_up(te_dim, LANE)

    batch_tile = _round_up(batch_tile, SUB)
    TB = min(batch_tile, _round_up(B, SUB))
    B_p = _round_up(B, TB)
    n_tiles = B_p // TB

    f32 = jnp.float32

    def pad2(a, rows, cols, dtype=f32):
        a = a.astype(f32)
        return jnp.pad(a, ((0, rows - a.shape[0]),
                           (0, cols - a.shape[1]))).astype(dtype)

    def pad_row(v, cols):
        v = v.astype(f32).reshape(1, -1)
        return jnp.pad(v, ((0, 0), (0, cols - v.shape[1])))

    # Group one-hot matrix: padded channels map to no group (zero row), so
    # they neither contribute to the statistics nor receive scale/shift.
    grp_idx = jnp.arange(hid_p) // group_size
    G = jax.nn.one_hot(grp_idx, num_groups, dtype=f32)           # (hid_p, ng)

    x_p = pad2(x, B_p, dim_p)
    t_p = pad2(t_emb, B_p, te_p)

    inputs = [x_p, t_p, G]
    in_dims = [dim_p] + [hid_p] * (n_layers - 1)
    for lp, in_p in zip(params["layers"], in_dims):
        gamma_p = jnp.pad(lp["gamma"].astype(f32),
                          (0, hid_p - lp["gamma"].shape[0]))
        ggt = (G * gamma_p[:, None]).T                           # (ng, hid_p)
        inputs += [
            pad2(lp["w"], in_p, hid_p, dtype=matmul_dtype),
            pad_row(lp["b"], hid_p),
            ggt,
            pad_row(lp["beta"], hid_p),
        ]
    inputs += [
        pad2(params["wt"], te_p, hid_p, dtype=matmul_dtype),
        pad_row(params["bt"], hid_p),
        pad2(params["wo"], hid_p, dim_p, dtype=matmul_dtype),
        pad_row(params["bo"], dim_p),
    ]

    # x / t_emb / out are batch-tiled; all weights/constants use a full block
    # with a constant index_map so they stay VMEM-resident across grid steps.
    def tiled(cols):
        return pl.BlockSpec((TB, cols), lambda i: (i, 0))

    def resident(a):
        return pl.BlockSpec(a.shape, lambda i: (0, 0))

    in_specs = [tiled(dim_p), tiled(te_p)] + [resident(a) for a in inputs[2:]]

    # Advisory cost estimate for XLA's scheduler.
    flops = 0
    for in_p in in_dims:
        flops += 2 * B_p * in_p * hid_p                  # Linear
        flops += 2 * (2 * B_p) * hid_p * num_groups      # stacked stats
        flops += 2 * 2 * B_p * num_groups * hid_p        # scale/shift broadcast
        flops += 8 * B_p * hid_p                         # norm affine + SiLU
    flops += 2 * B_p * te_p * hid_p                      # time projection
    flops += 2 * B_p * hid_p * dim_p + 2 * B_p * dim_p   # output proj + skip
    transcendentals = n_layers * B_p * (hid_p + num_groups)
    bytes_accessed = sum(int(a.size) * a.dtype.itemsize for a in inputs)
    bytes_accessed += B_p * dim_p * 4

    kernel = _make_kernel(n_layers, num_groups, group_size, eps, matmul_dtype)

    out_p = pl.pallas_call(
        kernel,
        out_shape=jax.ShapeDtypeStruct((B_p, dim_p), x.dtype),
        grid=(n_tiles,),
        in_specs=in_specs,
        out_specs=tiled(dim_p),
        compiler_params=pltpu.CompilerParams(
            dimension_semantics=("parallel",)),
        cost_estimate=pl.CostEstimate(
            flops=int(flops),
            transcendentals=int(transcendentals),
            bytes_accessed=int(bytes_accessed)),
    )(*inputs)

    return out_p[:B, :dim]


def residual_block_ref(x, t_emb, params, *, n_layers, num_groups, eps=1e-5):
    """Pure-JAX reference matching PyTorch semantics."""
    h = x
    for i, lp in enumerate(params["layers"]):
        h = h @ lp["w"] + lp["b"]
        B, C = h.shape
        hg = h.reshape(B, num_groups, C // num_groups)
        mean = hg.mean(axis=-1, keepdims=True)
        var = hg.var(axis=-1, keepdims=True)       # biased, matches GroupNorm
        hg = (hg - mean) / jnp.sqrt(var + eps)
        h = hg.reshape(B, C) * lp["gamma"] + lp["beta"]
        h = h * jax.nn.sigmoid(h)
        if i == n_layers // 2:
            h = h + t_emb @ params["wt"] + params["bt"]
    return x + h @ params["wo"] + params["bo"]


def init_params(key, *, dim, n_layers, dim_hidden, time_emb_dim):
    keys = jax.random.split(key, 4 * n_layers + 8)
    ki = iter(range(len(keys)))
    layers = []
    for i in range(n_layers):
        in_dim = dim if i == 0 else dim_hidden
        scale = 1.0 / jnp.sqrt(in_dim)
        layers.append({
            "w": jax.random.normal(keys[next(ki)], (in_dim, dim_hidden), jnp.float32) * scale,
            "b": jax.random.normal(keys[next(ki)], (dim_hidden,), jnp.float32) * 0.02,
            "gamma": 1.0 + 0.1 * jax.random.normal(keys[next(ki)], (dim_hidden,), jnp.float32),
            "beta": 0.1 * jax.random.normal(keys[next(ki)], (dim_hidden,), jnp.float32),
        })
    return {
        "layers": layers,
        "wt": jax.random.normal(keys[next(ki)], (time_emb_dim, dim_hidden), jnp.float32)
              / jnp.sqrt(time_emb_dim),
        "bt": jax.random.normal(keys[next(ki)], (dim_hidden,), jnp.float32) * 0.02,
        "wo": jax.random.normal(keys[next(ki)], (dim_hidden, dim), jnp.float32)
              / jnp.sqrt(dim_hidden),
        "bo": jax.random.normal(keys[next(ki)], (dim,), jnp.float32) * 0.02,
    }


if __name__ == "__main__":
    B = 256            # large enough for 2 grid steps of TB=128 (MXU-sized M)
    dim = 32
    n_layers = 3
    dim_hidden = 64
    time_emb_dim = 16
    num_groups = 8

    key = jax.random.PRNGKey(0)
    kx, kt, kp = jax.random.split(key, 3)
    x = jax.random.normal(kx, (B, dim), jnp.float32)
    t_emb = jax.random.normal(kt, (B, time_emb_dim), jnp.float32)
    params = init_params(kp, dim=dim, n_layers=n_layers,
                         dim_hidden=dim_hidden, time_emb_dim=time_emb_dim)

    with jax.default_matmul_precision("highest"):
        ref = jax.block_until_ready(
            residual_block_ref(x, t_emb, params,
                               n_layers=n_layers, num_groups=num_groups))

    # 1) f32-operand path: tight structural-correctness check.
    out_f32 = jax.block_until_ready(
        residual_block_pallas(x, t_emb, params, n_layers=n_layers,
                              num_groups=num_groups,
                              matmul_dtype=jnp.float32))
    assert out_f32.shape == (B, dim) and out_f32.dtype == jnp.float32
    err32 = jnp.max(jnp.abs(out_f32 - ref))
    assert jnp.allclose(out_f32, ref, rtol=3e-3, atol=3e-3), \
        f"f32 path max abs diff = {err32}"

    # 2) bf16-MXU fast path (f32 accumulation): mixed-precision tolerance.
    out_bf16 = jax.block_until_ready(
        residual_block_pallas(x, t_emb, params, n_layers=n_layers,
                              num_groups=num_groups,
                              matmul_dtype=jnp.bfloat16))
    errbf = jnp.max(jnp.abs(out_bf16 - ref))
    assert jnp.allclose(out_bf16, ref, rtol=5e-2, atol=5e-2), \
        f"bf16 path max abs diff = {errbf}"

    print("KERNEL_OK")
</pallas_src>

<mosaic_0001>
module attributes {stable_mosaic.version = 11 : i64} {
  func.func @kernel(%arg0: i32, %arg1: memref<128x128xf32, #tpu.memory_space<vmem>>, %arg2: memref<128x128xf32, #tpu.memory_space<vmem>>, %arg3: memref<128x8xf32, #tpu.memory_space<vmem>>, %arg4: memref<128x128xf32, #tpu.memory_space<vmem>>, %arg5: memref<1x128xf32, #tpu.memory_space<vmem>>, %arg6: memref<8x128xf32, #tpu.memory_space<vmem>>, %arg7: memref<1x128xf32, #tpu.memory_space<vmem>>, %arg8: memref<128x128xf32, #tpu.memory_space<vmem>>, %arg9: memref<1x128xf32, #tpu.memory_space<vmem>>, %arg10: memref<8x128xf32, #tpu.memory_space<vmem>>, %arg11: memref<1x128xf32, #tpu.memory_space<vmem>>, %arg12: memref<128x128xf32, #tpu.memory_space<vmem>>, %arg13: memref<1x128xf32, #tpu.memory_space<vmem>>, %arg14: memref<8x128xf32, #tpu.memory_space<vmem>>, %arg15: memref<1x128xf32, #tpu.memory_space<vmem>>, %arg16: memref<128x128xf32, #tpu.memory_space<vmem>>, %arg17: memref<1x128xf32, #tpu.memory_space<vmem>>, %arg18: memref<128x128xf32, #tpu.memory_space<vmem>>, %arg19: memref<1x128xf32, #tpu.memory_space<vmem>>, %arg20: memref<128x128xf32, #tpu.memory_space<vmem>>) attributes {dimension_semantics = [#tpu.dimension_semantics<parallel>], iteration_bounds = array<i64: 2>, scalar_prefetch = 0 : i64, scratch_operands = 0 : i64, tpu.core_type = #tpu.core_type<tc>, window_params = [{transform_indices = @transform_0, window_bounds = array<i64: 128, 128>}, {transform_indices = @transform_1, window_bounds = array<i64: 128, 128>}, {pipeline_mode = #tpu.pipeline_mode<synchronous>, transform_indices = @transform_2, window_bounds = array<i64: 128, 8>}, {pipeline_mode = #tpu.pipeline_mode<synchronous>, transform_indices = @transform_3, window_bounds = array<i64: 128, 128>}, {pipeline_mode = #tpu.pipeline_mode<synchronous>, transform_indices = @transform_4, window_bounds = array<i64: 1, 128>}, {pipeline_mode = #tpu.pipeline_mode<synchronous>, transform_indices = @transform_5, window_bounds = array<i64: 8, 128>}, {pipeline_mode = #tpu.pipeline_mode<synchronous>, transform_indices = @transform_6, window_bounds = array<i64: 1, 128>}, {pipeline_mode = #tpu.pipeline_mode<synchronous>, transform_indices = @transform_7, window_bounds = array<i64: 128, 128>}, {pipeline_mode = #tpu.pipeline_mode<synchronous>, transform_indices = @transform_8, window_bounds = array<i64: 1, 128>}, {pipeline_mode = #tpu.pipeline_mode<synchronous>, transform_indices = @transform_9, window_bounds = array<i64: 8, 128>}, {pipeline_mode = #tpu.pipeline_mode<synchronous>, transform_indices = @transform_10, window_bounds = array<i64: 1, 128>}, {pipeline_mode = #tpu.pipeline_mode<synchronous>, transform_indices = @transform_11, window_bounds = array<i64: 128, 128>}, {pipeline_mode = #tpu.pipeline_mode<synchronous>, transform_indices = @transform_12, window_bounds = array<i64: 1, 128>}, {pipeline_mode = #tpu.pipeline_mode<synchronous>, transform_indices = @transform_13, window_bounds = array<i64: 8, 128>}, {pipeline_mode = #tpu.pipeline_mode<synchronous>, transform_indices = @transform_14, window_bounds = array<i64: 1, 128>}, {pipeline_mode = #tpu.pipeline_mode<synchronous>, transform_indices = @transform_15, window_bounds = array<i64: 128, 128>}, {pipeline_mode = #tpu.pipeline_mode<synchronous>, transform_indices = @transform_16, window_bounds = array<i64: 1, 128>}, {pipeline_mode = #tpu.pipeline_mode<synchronous>, transform_indices = @transform_17, window_bounds = array<i64: 128, 128>}, {pipeline_mode = #tpu.pipeline_mode<synchronous>, transform_indices = @transform_18, window_bounds = array<i64: 1, 128>}, {transform_indices = @transform_19, window_bounds = array<i64: 128, 128>}]} {
    %c0 = arith.constant 0 : index
    %c0_0 = arith.constant 0 : index
    %0 = vector.load %arg1[%c0, %c0_0] : memref<128x128xf32, #tpu.memory_space<vmem>>, vector<128x128xf32>
    %c0_1 = arith.constant 0 : index
    %c0_2 = arith.constant 0 : index
    %1 = vector.load %arg3[%c0_1, %c0_2] : memref<128x8xf32, #tpu.memory_space<vmem>>, vector<128x8xf32>
    %c0_3 = arith.constant 0 : index
    %c0_4 = arith.constant 0 : index
    %2 = vector.load %arg4[%c0_3, %c0_4] : memref<128x128xf32, #tpu.memory_space<vmem>>, vector<128x128xf32>
    %c0_5 = arith.constant 0 : index
    %c0_6 = arith.constant 0 : index
    %3 = vector.load %arg5[%c0_5, %c0_6] : memref<1x128xf32, #tpu.memory_space<vmem>>, vector<1x128xf32>
    %c0_7 = arith.constant 0 : index
    %c0_8 = arith.constant 0 : index
    %4 = vector.load %arg6[%c0_7, %c0_8] : memref<8x128xf32, #tpu.memory_space<vmem>>, vector<8x128xf32>
    %c0_9 = arith.constant 0 : index
    %c0_10 = arith.constant 0 : index
    %5 = vector.load %arg7[%c0_9, %c0_10] : memref<1x128xf32, #tpu.memory_space<vmem>>, vector<1x128xf32>
    %cst = arith.constant dense<0.000000e+00> : vector<128x128xf32>
    %6 = tpu.matmul %0, %2, %cst {dimension_numbers = #tpu.dot_dimension_numbers<[1], [0], [0], [1], [0, 0, 1, 1], [], []>} : vector<128x128xf32>, vector<128x128xf32>, vector<128x128xf32> -> vector<128x128xf32>
    %7 = vector.broadcast %3 : vector<1x128xf32> to vector<128x128xf32>
    %8 = arith.addf %6, %7 : vector<128x128xf32>
    %9 = arith.mulf %8, %8 : vector<128x128xf32>
    %10 = tpu.concatenate %8, %9 in 0 : vector<128x128xf32>, vector<128x128xf32> -> vector<256x128xf32>
    %cst_11 = arith.constant dense<0.000000e+00> : vector<256x8xf32>
    %11 = tpu.matmul %10, %1, %cst_11 {dimension_numbers = #tpu.dot_dimension_numbers<[1], [0], [0], [1], [0, 0, 1, 1], [], []>} : vector<256x128xf32>, vector<128x8xf32>, vector<256x8xf32> -> vector<256x8xf32>
    %12 = vector.extract_strided_slice %11 {offsets = [0, 0], sizes = [128, 8], strides = [1, 1]} : vector<256x8xf32> to vector<128x8xf32>
    %cst_12 = arith.constant 1.250000e-01 : f32
    %13 = vector.broadcast %cst_12 : f32 to vector<128x8xf32>
    %14 = arith.mulf %12, %13 : vector<128x8xf32>
    %15 = vector.extract_strided_slice %11 {offsets = [128, 0], sizes = [128, 8], strides = [1, 1]} : vector<256x8xf32> to vector<128x8xf32>
    %cst_13 = arith.constant 1.250000e-01 : f32
    %16 = vector.broadcast %cst_13 : f32 to vector<128x8xf32>
    %17 = arith.mulf %15, %16 : vector<128x8xf32>
    %18 = arith.mulf %14, %14 : vector<128x8xf32>
    %19 = arith.subf %17, %18 : vector<128x8xf32>
    %cst_14 = arith.constant 0.000000e+00 : f32
    %20 = vector.broadcast %cst_14 : f32 to vector<128x8xf32>
    %21 = arith.maximumf %19, %20 : vector<128x8xf32>
    %cst_15 = arith.constant 9.99999974E-6 : f32
    %22 = vector.broadcast %cst_15 : f32 to vector<128x8xf32>
    %23 = arith.addf %21, %22 : vector<128x8xf32>
    %24 = math.rsqrt %23 : vector<128x8xf32>
    %cst_16 = arith.constant dense<0.000000e+00> : vector<128x128xf32>
    %25 = tpu.matmul %24, %4, %cst_16 {dimension_numbers = #tpu.dot_dimension_numbers<[1], [0], [0], [1], [0, 0, 1, 1], [], []>} : vector<128x8xf32>, vector<8x128xf32>, vector<128x128xf32> -> vector<128x128xf32>
    %cst_17 = arith.constant 0.000000e+00 : f32
    %26 = vector.broadcast %cst_17 : f32 to vector<128x8xf32>
    %27 = arith.subf %26, %14 : vector<128x8xf32>
    %28 = arith.mulf %27, %24 : vector<128x8xf32>
    %cst_18 = arith.constant dense<0.000000e+00> : vector<128x128xf32>
    %29 = tpu.matmul %28, %4, %cst_18 {dimension_numbers = #tpu.dot_dimension_numbers<[1], [0], [0], [1], [0, 0, 1, 1], [], []>} : vector<128x8xf32>, vector<8x128xf32>, vector<128x128xf32> -> vector<128x128xf32>
    %30 = vector.broadcast %5 : vector<1x128xf32> to vector<128x128xf32>
    %31 = arith.addf %29, %30 : vector<128x128xf32>
    %32 = arith.mulf %8, %25 : vector<128x128xf32>
    %33 = arith.addf %32, %31 : vector<128x128xf32>
    %34 = arith.negf %33 : vector<128x128xf32>
    %35 = math.exp %34 : vector<128x128xf32>
    %cst_19 = arith.constant 1.000000e+00 : f32
    %36 = vector.broadcast %cst_19 : f32 to vector<128x128xf32>
    %37 = arith.addf %36, %35 : vector<128x128xf32>
    %38 = arith.divf %36, %37 : vector<128x128xf32>
    %39 = arith.mulf %33, %38 : vector<128x128xf32>
    %c0_20 = arith.constant 0 : index
    %c0_21 = arith.constant 0 : index
    %40 = vector.load %arg8[%c0_20, %c0_21] : memref<128x128xf32, #tpu.memory_space<vmem>>, vector<128x128xf32>
    %c0_22 = arith.constant 0 : index
    %c0_23 = arith.constant 0 : index
    %41 = vector.load %arg9[%c0_22, %c0_23] : memref<1x128xf32, #tpu.memory_space<vmem>>, vector<1x128xf32>
    %c0_24 = arith.constant 0 : index
    %c0_25 = arith.constant 0 : index
    %42 = vector.load %arg10[%c0_24, %c0_25] : memref<8x128xf32, #tpu.memory_space<vmem>>, vector<8x128xf32>
    %c0_26 = arith.constant 0 : index
    %c0_27 = arith.constant 0 : index
    %43 = vector.load %arg11[%c0_26, %c0_27] : memref<1x128xf32, #tpu.memory_space<vmem>>, vector<1x128xf32>
    %cst_28 = arith.constant dense<0.000000e+00> : vector<128x128xf32>
    %44 = tpu.matmul %39, %40, %cst_28 {dimension_numbers = #tpu.dot_dimension_numbers<[1], [0], [0], [1], [0, 0, 1, 1], [], []>} : vector<128x128xf32>, vector<128x128xf32>, vector<128x128xf32> -> vector<128x128xf32>
    %45 = vector.broadcast %41 : vector<1x128xf32> to vector<128x128xf32>
    %46 = arith.addf %44, %45 : vector<128x128xf32>
    %47 = arith.mulf %46, %46 : vector<128x128xf32>
    %48 = tpu.concatenate %46, %47 in 0 : vector<128x128xf32>, vector<128x128xf32> -> vector<256x128xf32>
    %cst_29 = arith.constant dense<0.000000e+00> : vector<256x8xf32>
    %49 = tpu.matmul %48, %1, %cst_29 {dimension_numbers = #tpu.dot_dimension_numbers<[1], [0], [0], [1], [0, 0, 1, 1], [], []>} : vector<256x128xf32>, vector<128x8xf32>, vector<256x8xf32> -> vector<256x8xf32>
    %50 = vector.extract_strided_slice %49 {offsets = [0, 0], sizes = [128, 8], strides = [1, 1]} : vector<256x8xf32> to vector<128x8xf32>
    %cst_30 = arith.constant 1.250000e-01 : f32
    %51 = vector.broadcast %cst_30 : f32 to vector<128x8xf32>
    %52 = arith.mulf %50, %51 : vector<128x8xf32>
    %53 = vector.extract_strided_slice %49 {offsets = [128, 0], sizes = [128, 8], strides = [1, 1]} : vector<256x8xf32> to vector<128x8xf32>
    %cst_31 = arith.constant 1.250000e-01 : f32
    %54 = vector.broadcast %cst_31 : f32 to vector<128x8xf32>
    %55 = arith.mulf %53, %54 : vector<128x8xf32>
    %56 = arith.mulf %52, %52 : vector<128x8xf32>
    %57 = arith.subf %55, %56 : vector<128x8xf32>
    %cst_32 = arith.constant 0.000000e+00 : f32
    %58 = vector.broadcast %cst_32 : f32 to vector<128x8xf32>
    %59 = arith.maximumf %57, %58 : vector<128x8xf32>
    %cst_33 = arith.constant 9.99999974E-6 : f32
    %60 = vector.broadcast %cst_33 : f32 to vector<128x8xf32>
    %61 = arith.addf %59, %60 : vector<128x8xf32>
    %62 = math.rsqrt %61 : vector<128x8xf32>
    %cst_34 = arith.constant dense<0.000000e+00> : vector<128x128xf32>
    %63 = tpu.matmul %62, %42, %cst_34 {dimension_numbers = #tpu.dot_dimension_numbers<[1], [0], [0], [1], [0, 0, 1, 1], [], []>} : vector<128x8xf32>, vector<8x128xf32>, vector<128x128xf32> -> vector<128x128xf32>
    %cst_35 = arith.constant 0.000000e+00 : f32
    %64 = vector.broadcast %cst_35 : f32 to vector<128x8xf32>
    %65 = arith.subf %64, %52 : vector<128x8xf32>
    %66 = arith.mulf %65, %62 : vector<128x8xf32>
    %cst_36 = arith.constant dense<0.000000e+00> : vector<128x128xf32>
    %67 = tpu.matmul %66, %42, %cst_36 {dimension_numbers = #tpu.dot_dimension_numbers<[1], [0], [0], [1], [0, 0, 1, 1], [], []>} : vector<128x8xf32>, vector<8x128xf32>, vector<128x128xf32> -> vector<128x128xf32>
    %68 = vector.broadcast %43 : vector<1x128xf32> to vector<128x128xf32>
    %69 = arith.addf %67, %68 : vector<128x128xf32>
    %70 = arith.mulf %46, %63 : vector<128x128xf32>
    %71 = arith.addf %70, %69 : vector<128x128xf32>
    %72 = arith.negf %71 : vector<128x128xf32>
    %73 = math.exp %72 : vector<128x128xf32>
    %cst_37 = arith.constant 1.000000e+00 : f32
    %74 = vector.broadcast %cst_37 : f32 to vector<128x128xf32>
    %75 = arith.addf %74, %73 : vector<128x128xf32>
    %76 = arith.divf %74, %75 : vector<128x128xf32>
    %77 = arith.mulf %71, %76 : vector<128x128xf32>
    %c0_38 = arith.constant 0 : index
    %c0_39 = arith.constant 0 : index
    %78 = vector.load %arg2[%c0_38, %c0_39] : memref<128x128xf32, #tpu.memory_space<vmem>>, vector<128x128xf32>
    %c0_40 = arith.constant 0 : index
    %c0_41 = arith.constant 0 : index
    %79 = vector.load %arg16[%c0_40, %c0_41] : memref<128x128xf32, #tpu.memory_space<vmem>>, vector<128x128xf32>
    %cst_42 = arith.constant dense<0.000000e+00> : vector<128x128xf32>
    %80 = tpu.matmul %78, %79, %cst_42 {dimension_numbers = #tpu.dot_dimension_numbers<[1], [0], [0], [1], [0, 0, 1, 1], [], []>} : vector<128x128xf32>, vector<128x128xf32>, vector<128x128xf32> -> vector<128x128xf32>
    %81 = arith.addf %77, %80 : vector<128x128xf32>
    %c0_43 = arith.constant 0 : index
    %c0_44 = arith.constant 0 : index
    %82 = vector.load %arg17[%c0_43, %c0_44] : memref<1x128xf32, #tpu.memory_space<vmem>>, vector<1x128xf32>
    %83 = vector.broadcast %82 : vector<1x128xf32> to vector<128x128xf32>
    %84 = arith.addf %81, %83 : vector<128x128xf32>
    %c0_45 = arith.constant 0 : index
    %c0_46 = arith.constant 0 : index
    %85 = vector.load %arg12[%c0_45, %c0_46] : memref<128x128xf32, #tpu.memory_space<vmem>>, vector<128x128xf32>
    %c0_47 = arith.constant 0 : index
    %c0_48 = arith.constant 0 : index
    %86 = vector.load %arg13[%c0_47, %c0_48] : memref<1x128xf32, #tpu.memory_space<vmem>>, vector<1x128xf32>
    %c0_49 = arith.constant 0 : index
    %c0_50 = arith.constant 0 : index
    %87 = vector.load %arg14[%c0_49, %c0_50] : memref<8x128xf32, #tpu.memory_space<vmem>>, vector<8x128xf32>
    %c0_51 = arith.constant 0 : index
    %c0_52 = arith.constant 0 : index
    %88 = vector.load %arg15[%c0_51, %c0_52] : memref<1x128xf32, #tpu.memory_space<vmem>>, vector<1x128xf32>
    %cst_53 = arith.constant dense<0.000000e+00> : vector<128x128xf32>
    %89 = tpu.matmul %84, %85, %cst_53 {dimension_numbers = #tpu.dot_dimension_numbers<[1], [0], [0], [1], [0, 0, 1, 1], [], []>} : vector<128x128xf32>, vector<128x128xf32>, vector<128x128xf32> -> vector<128x128xf32>
    %90 = vector.broadcast %86 : vector<1x128xf32> to vector<128x128xf32>
    %91 = arith.addf %89, %90 : vector<128x128xf32>
    %92 = arith.mulf %91, %91 : vector<128x128xf32>
    %93 = tpu.concatenate %91, %92 in 0 : vector<128x128xf32>, vector<128x128xf32> -> vector<256x128xf32>
    %cst_54 = arith.constant dense<0.000000e+00> : vector<256x8xf32>
    %94 = tpu.matmul %93, %1, %cst_54 {dimension_numbers = #tpu.dot_dimension_numbers<[1], [0], [0], [1], [0, 0, 1, 1], [], []>} : vector<256x128xf32>, vector<128x8xf32>, vector<256x8xf32> -> vector<256x8xf32>
    %95 = vector.extract_strided_slice %94 {offsets = [0, 0], sizes = [128, 8], strides = [1, 1]} : vector<256x8xf32> to vector<128x8xf32>
    %cst_55 = arith.constant 1.250000e-01 : f32
    %96 = vector.broadcast %cst_55 : f32 to vector<128x8xf32>
    %97 = arith.mulf %95, %96 : vector<128x8xf32>
    %98 = vector.extract_strided_slice %94 {offsets = [128, 0], sizes = [128, 8], strides = [1, 1]} : vector<256x8xf32> to vector<128x8xf32>
    %cst_56 = arith.constant 1.250000e-01 : f32
    %99 = vector.broadcast %cst_56 : f32 to vector<128x8xf32>
    %100 = arith.mulf %98, %99 : vector<128x8xf32>
    %101 = arith.mulf %97, %97 : vector<128x8xf32>
    %102 = arith.subf %100, %101 : vector<128x8xf32>
    %cst_57 = arith.constant 0.000000e+00 : f32
    %103 = vector.broadcast %cst_57 : f32 to vector<128x8xf32>
    %104 = arith.maximumf %102, %103 : vector<128x8xf32>
    %cst_58 = arith.constant 9.99999974E-6 : f32
    %105 = vector.broadcast %cst_58 : f32 to vector<128x8xf32>
    %106 = arith.addf %104, %105 : vector<128x8xf32>
    %107 = math.rsqrt %106 : vector<128x8xf32>
    %cst_59 = arith.constant dense<0.000000e+00> : vector<128x128xf32>
    %108 = tpu.matmul %107, %87, %cst_59 {dimension_numbers = #tpu.dot_dimension_numbers<[1], [0], [0], [1], [0, 0, 1, 1], [], []>} : vector<128x8xf32>, vector<8x128xf32>, vector<128x128xf32> -> vector<128x128xf32>
    %cst_60 = arith.constant 0.000000e+00 : f32
    %109 = vector.broadcast %cst_60 : f32 to vector<128x8xf32>
    %110 = arith.subf %109, %97 : vector<128x8xf32>
    %111 = arith.mulf %110, %107 : vector<128x8xf32>
    %cst_61 = arith.constant dense<0.000000e+00> : vector<128x128xf32>
    %112 = tpu.matmul %111, %87, %cst_61 {dimension_numbers = #tpu.dot_dimension_numbers<[1], [0], [0], [1], [0, 0, 1, 1], [], []>} : vector<128x8xf32>, vector<8x128xf32>, vector<128x128xf32> -> vector<128x128xf32>
    %113 = vector.broadcast %88 : vector<1x128xf32> to vector<128x128xf32>
    %114 = arith.addf %112, %113 : vector<128x128xf32>
    %115 = arith.mulf %91, %108 : vector<128x128xf32>
    %116 = arith.addf %115, %114 : vector<128x128xf32>
    %117 = arith.negf %116 : vector<128x128xf32>
    %118 = math.exp %117 : vector<128x128xf32>
    %cst_62 = arith.constant 1.000000e+00 : f32
    %119 = vector.broadcast %cst_62 : f32 to vector<128x128xf32>
    %120 = arith.addf %119, %118 : vector<128x128xf32>
    %121 = arith.divf %119, %120 : vector<128x128xf32>
    %122 = arith.mulf %116, %121 : vector<128x128xf32>
    %c0_63 = arith.constant 0 : index
    %c0_64 = arith.constant 0 : index
    %123 = vector.load %arg18[%c0_63, %c0_64] : memref<128x128xf32, #tpu.memory_space<vmem>>, vector<128x128xf32>
    %cst_65 = arith.constant dense<0.000000e+00> : vector<128x128xf32>
    %124 = tpu.matmul %122, %123, %cst_65 {dimension_numbers = #tpu.dot_dimension_numbers<[1], [0], [0], [1], [0, 0, 1, 1], [], []>} : vector<128x128xf32>, vector<128x128xf32>, vector<128x128xf32> -> vector<128x128xf32>
    %125 = arith.addf %0, %124 : vector<128x128xf32>
    %c0_66 = arith.constant 0 : index
    %c0_67 = arith.constant 0 : index
    %126 = vector.load %arg19[%c0_66, %c0_67] : memref<1x128xf32, #tpu.memory_space<vmem>>, vector<1x128xf32>
    %127 = vector.broadcast %126 : vector<1x128xf32> to vector<128x128xf32>
    %128 = arith.addf %125, %127 : vector<128x128xf32>
    %c0_68 = arith.constant 0 : index
    %c0_69 = arith.constant 0 : index
    %129 = vector.load %arg20[%c0_68, %c0_69] : memref<128x128xf32, #tpu.memory_space<vmem>>, vector<128x128xf32>
    tpu.vector_store %arg20[%c0_68, %c0_69], %128 {strides = array<i32>} : memref<128x128xf32, #tpu.memory_space<vmem>>, vector<128x128xf32>,
    return
  }
  func.func @transform_0(%arg0: i32) -> (i32, i32) {
    %c0_i32 = arith.constant 0 : i32
    %c0_i32_0 = arith.constant 0 : i32
    return %arg0, %c0_i32 : i32, i32
  }
  func.func @transform_1(%arg0: i32) -> (i32, i32) {
    %c0_i32 = arith.constant 0 : i32
    %c0_i32_0 = arith.constant 0 : i32
    return %arg0, %c0_i32 : i32, i32
  }
  func.func @transform_2(%arg0: i32) -> (i32, i32) {
    %c0_i32 = arith.constant 0 : i32
    %c0_i32_0 = arith.constant 0 : i32
    %c0_i32_1 = arith.constant 0 : i32
    return %c0_i32, %c0_i32_0 : i32, i32
  }
  func.func @transform_3(%arg0: i32) -> (i32, i32) {
    %c0_i32 = arith.constant 0 : i32
    %c0_i32_0 = arith.constant 0 : i32
    %c0_i32_1 = arith.constant 0 : i32
    return %c0_i32, %c0_i32_0 : i32, i32
  }
  func.func @transform_4(%arg0: i32) -> (i32, i32) {
    %c0_i32 = arith.constant 0 : i32
    %c0_i32_0 = arith.constant 0 : i32
    %c0_i32_1 = arith.constant 0 : i32
    return %c0_i32, %c0_i32_0 : i32, i32
  }
  func.func @transform_5(%arg0: i32) -> (i32, i32) {
    %c0_i32 = arith.constant 0 : i32
    %c0_i32_0 = arith.constant 0 : i32
    %c0_i32_1 = arith.constant 0 : i32
    return %c0_i32, %c0_i32_0 : i32, i32
  }
  func.func @transform_6(%arg0: i32) -> (i32, i32) {
    %c0_i32 = arith.constant 0 : i32
    %c0_i32_0 = arith.constant 0 : i32
    %c0_i32_1 = arith.constant 0 : i32
    return %c0_i32, %c0_i32_0 : i32, i32
  }
  func.func @transform_7(%arg0: i32) -> (i32, i32) {
    %c0_i32 = arith.constant 0 : i32
    %c0_i32_0 = arith.constant 0 : i32
    %c0_i32_1 = arith.constant 0 : i32
    return %c0_i32, %c0_i32_0 : i32, i32
  }
  func.func @transform_8(%arg0: i32) -> (i32, i32) {
    %c0_i32 = arith.constant 0 : i32
    %c0_i32_0 = arith.constant 0 : i32
    %c0_i32_1 = arith.constant 0 : i32
    return %c0_i32, %c0_i32_0 : i32, i32
  }
  func.func @transform_9(%arg0: i32) -> (i32, i32) {
    %c0_i32 = arith.constant 0 : i32
    %c0_i32_0 = arith.constant 0 : i32
    %c0_i32_1 = arith.constant 0 : i32
    return %c0_i32, %c0_i32_0 : i32, i32
  }
  func.func @transform_10(%arg0: i32) -> (i32, i32) {
    %c0_i32 = arith.constant 0 : i32
    %c0_i32_0 = arith.constant 0 : i32
    %c0_i32_1 = arith.constant 0 : i32
    return %c0_i32, %c0_i32_0 : i32, i32
  }
  func.func @transform_11(%arg0: i32) -> (i32, i32) {
    %c0_i32 = arith.constant 0 : i32
    %c0_i32_0 = arith.constant 0 : i32
    %c0_i32_1 = arith.constant 0 : i32
    return %c0_i32, %c0_i32_0 : i32, i32
  }
  func.func @transform_12(%arg0: i32) -> (i32, i32) {
    %c0_i32 = arith.constant 0 : i32
    %c0_i32_0 = arith.constant 0 : i32
    %c0_i32_1 = arith.constant 0 : i32
    return %c0_i32, %c0_i32_0 : i32, i32
  }
  func.func @transform_13(%arg0: i32) -> (i32, i32) {
    %c0_i32 = arith.constant 0 : i32
    %c0_i32_0 = arith.constant 0 : i32
    %c0_i32_1 = arith.constant 0 : i32
    return %c0_i32, %c0_i32_0 : i32, i32
  }
  func.func @transform_14(%arg0: i32) -> (i32, i32) {
    %c0_i32 = arith.constant 0 : i32
    %c0_i32_0 = arith.constant 0 : i32
    %c0_i32_1 = arith.constant 0 : i32
    return %c0_i32, %c0_i32_0 : i32, i32
  }
  func.func @transform_15(%arg0: i32) -> (i32, i32) {
    %c0_i32 = arith.constant 0 : i32
    %c0_i32_0 = arith.constant 0 : i32
    %c0_i32_1 = arith.constant 0 : i32
    return %c0_i32, %c0_i32_0 : i32, i32
  }
  func.func @transform_16(%arg0: i32) -> (i32, i32) {
    %c0_i32 = arith.constant 0 : i32
    %c0_i32_0 = arith.constant 0 : i32
    %c0_i32_1 = arith.constant 0 : i32
    return %c0_i32, %c0_i32_0 : i32, i32
  }
  func.func @transform_17(%arg0: i32) -> (i32, i32) {
    %c0_i32 = arith.constant 0 : i32
    %c0_i32_0 = arith.constant 0 : i32
    %c0_i32_1 = arith.constant 0 : i32
    return %c0_i32, %c0_i32_0 : i32, i32
  }
  func.func @transform_18(%arg0: i32) -> (i32, i32) {
    %c0_i32 = arith.constant 0 : i32
    %c0_i32_0 = arith.constant 0 : i32
    %c0_i32_1 = arith.constant 0 : i32
    return %c0_i32, %c0_i32_0 : i32, i32
  }
  func.func @transform_19(%arg0: i32) -> (i32, i32) {
    %c0_i32 = arith.constant 0 : i32
    %c0_i32_0 = arith.constant 0 : i32
    return %arg0, %c0_i32 : i32, i32
  }
}

</mosaic_0001>

<bundles_post_ra>
// kernel: tpu_custom_call.1
= control target key start
LH: loop header
LB: loop body
LE: loop exit
PB: predicated region body
PF: predicated region fallthrough
CT: control target
= control target key end

     0   :  { %s7555_s0 = inlined_call_operand.hbm [shape: f32[256,128], index: 0, kind: input, shape index: {}]   ;;  %s7556_s1 = inlined_call_operand.hbm [shape: f32[256,128], index: 1, kind: input, shape index: {}]   ;;  %s7557_s2 = inlined_call_operand.vmem [shape: f32[128,8], index: 2, kind: input, shape index: {}]   ;;  %s7558_s3 = inlined_call_operand.vmem [shape: f32[128,128], index: 3, kind: input, shape index: {}]   ;;  %s7559_s4 = inlined_call_operand.vmem [shape: f32[1,128], index: 4, kind: input, shape index: {}]   ;;  %s7560_s5 = inlined_call_operand.vmem [shape: f32[8,128], index: 5, kind: input, shape index: {}]   ;;  %s7561_s6 = inlined_call_operand.hbm [shape: f32[1,128], index: 6, kind: input, shape index: {}]   ;;  %s7562_s7 = inlined_call_operand.hbm [shape: f32[128,128], index: 7, kind: input, shape index: {}]   ;;  %s7563_s8 = inlined_call_operand.hbm [shape: f32[1,128], index: 8, kind: input, shape index: {}]   ;;  %s7564_s9 = inlined_call_operand.hbm [shape: f32[8,128], index: 9, kind: input, shape index: {}]   ;;  %s7565_s10 = inlined_call_operand.hbm [shape: f32[1,128], index: 10, kind: input, shape index: {}]   ;;  %s7566_s11 = inlined_call_operand.hbm [shape: f32[128,128], index: 11, kind: input, shape index: {}]   ;;  %s7567_s12 = inlined_call_operand.vmem [shape: f32[1,128], index: 12, kind: input, shape index: {}]   ;;  %s7568_s13 = inlined_call_operand.vmem [shape: f32[8,128], index: 13, kind: input, shape index: {}]   ;;  %s7569_s14 = inlined_call_operand.vmem [shape: f32[1,128], index: 14, kind: input, shape index: {}]   ;;  %s7570_s15 = inlined_call_operand.hbm [shape: f32[128,128], index: 15, kind: input, shape index: {}]   ;;  %s7571_s16 = inlined_call_operand.vmem [shape: f32[1,128], index: 16, kind: input, shape index: {}]   ;;  %s7572_s17 = inlined_call_operand.hbm [shape: f32[128,128], index: 17, kind: input, shape index: {}]   ;;  %s7573_s18 = inlined_call_operand.vmem [shape: f32[1,128], index: 18, kind: input, shape index: {}]   ;;  %s7574_s19 = inlined_call_operand.hbm [shape: f32[256,128], index: 19, kind: output, shape index: {}]  }
   0x1   :  { %7591 = sst [smem:[#allocation35_spill]] %s7555_s0 }
   0x2   :  { %7592 = sst [smem:[#allocation36_spill]] %s7556_s1 }
   0x3   :  { %7593 = sst [smem:[#allocation37_spill]] %s7557_s2 }
   0x4   :  { %7594 = sst [smem:[#allocation38_spill]] %s7558_s3 }
   0x5   :  { %7595 = sst [smem:[#allocation39_spill]] %s7561_s6 }
   0x6   :  { %7596 = sst [smem:[#allocation40_spill]] %s7562_s7 }
   0x7   :  { %7597 = sst [smem:[#allocation41_spill]] %s7563_s8 }
   0x8   :  { %7598 = sst [smem:[#allocation42_spill]] %s7564_s9 }
   0x9   :  { %7599 = sst [smem:[#allocation43_spill]] %s7565_s10 }
   0xa   :  { %7600 = sst [smem:[#allocation44_spill]] %s7566_s11 }
   0xb   :  { %7601 = sst [smem:[#allocation45_spill]] %s7567_s12 }
   0xc   :  { %7602 = sst [smem:[#allocation46_spill]] %s7568_s13 }
   0xd   :  { %7603 = sst [smem:[#allocation47_spill]] %s7569_s14 }
   0xe   :  { %7604 = sst [smem:[#allocation48_spill]] %s7570_s15 }
   0xf   :  { %7605 = sst [smem:[#allocation49_spill]] %s7572_s17 }
  0x10   :  { %7606 = sst [smem:[#allocation50_spill]] %s7573_s18 }
  0x11   :  { %7607 = sst [smem:[#allocation51_spill]] %s7574_s19 }
  0x12   :  { %24 = vsyncpa [#allocation3], 0 }
  0x13   :  { %26 = vsyncpa [#allocation3 + $0x1], 0 }
  0x14   :  { %27 = vsyncpa [#allocation6], 0 }
  0x15   :  { %29 = vsyncpa [#allocation6 + $0x1], 0 }
  0x16   :  { %30 = vsyncpa [#allocation9], 0 }
  0x17   :  { %31 = vsyncpa [#allocation12], 0 }
  0x18   :  { %32 = vsyncpa [#allocation15], 0 }
  0x19   :  { %33 = vsyncpa [#allocation18], 0 }
  0x1a   :  { %34 = vsyncpa [#allocation4], 0 }
  0x1b   :  { %36 = vsyncpa [#allocation4 + $0x1], 0  ;;  %s5685_s0 = smov 0   ;;  %s5687_s30 = smov 0  }
  0x1c   :  { %s5689_s20 = smov 0   ;;  %s5691_s21 = smov 0  }
  0x1d LB: > { %7608 = sst [smem:[#allocation28_spill]] %s5567_s20  ;;  %s5709_s23 = sadd.s32 4294967295, %s5571_s21   ;;  %s5571_s21 = sphi %s5691_s21, %s7658_s21   ;;  %s5567_s20 = sphi %s5689_s20, %s7657_s20   ;;  %s5563_s30 = sphi %s5687_s30, %s7656_s30   ;;  %s5559_s0 = sphi %s5685_s0, %s7655_s0  }
  0x1e   : > { %s7609_s6 = sld [smem:[#allocation39_spill]]  ;;  %p4535_p0 = scmp.ge.s32.totalorder %s5571_s21, 1 }
  0x1f   : > { %p63_p1 = scmp.eq.s32.totalorder %s5709_s23, 0  ;;  %p482_p2 = scmp.lt.s32.totalorder %s5571_s21, 3 }
  0x20   : > { %s5573_s25 = smov [#allocation7]   ;;  %s7611_s7 = sld [smem:[#allocation40_spill]] }
  0x21   : > { %p5714_p3 = pnand %p4535_p0, %p482_p2  ;;  %s508_s3 = sshll.u32 %s5573_s25, 4  ;;  %s509_s3 = int_to_ptr.vmem [resolvable:$true] %s508_s3 }
  0x22   : > { %s5574_s1 = smov [#allocation8]   ;;  %s7580_s25 = smov 128  }
  0x23   : > { %p4755_p5 = pneg %p5714_p3  ;;  %s519_s22 = sshll.u32 %s5574_s1, 4  ;;  %s520_s22 = int_to_ptr.vmem [resolvable:$true] %s519_s22 }
  0x24   : > { %s506_s2 = sshll.u32 %s7609_s6, 4  ;;  %s7582_s6 = smov 8   ;;  %s507_s2 = int_to_ptr.hbm [resolvable:$true] %s506_s2 }
  0x25   : > { %p5726_p6 = pnand %p4755_p5, %p63_p1  ;;  %s7613_s9 = sld [smem:[#allocation42_spill]] }
  0x26   : > { %s517_s28 = sshll.u32 %s7611_s7, 4  ;;  %s5577_s19 = smov [#allocation11]   ;;  %s518_s28 = int_to_ptr.hbm [resolvable:$true] %s517_s28 }
  0x27   : > { %4758 = dma.hbm_to_vmem [thread:$0]  (!%p5726_p6), %s507_s2, 16, %s509_s3, [#allocation6]  }
  0x28   : > { %4761 = dma.hbm_to_vmem [thread:$0]  (!%p5726_p6), %s518_s28, 2048, %s520_s22, [#allocation9], %s7580_s25, %s7580_s25, %s7582_s6  }
  0x29   : > { %s546_s18 = sshll.u32 %s5577_s19, 4  ;;  %s7614_s11 = sld [smem:[#allocation44_spill]]  ;;  %s547_s18 = int_to_ptr.vmem [resolvable:$true] %s546_s18 }
  0x2a   : > { %s5578_s3 = smov [#allocation14]   ;;  %s7615_s8 = sld [smem:[#allocation41_spill]] }
  0x2b   : > { %s544_s7 = sshll.u32 %s7613_s9, 4  ;;  %s569_s13 = sshll.u32 %s5578_s3, 4  ;;  %s545_s7 = int_to_ptr.hbm [resolvable:$true] %s544_s7  ;;  %s570_s13 = int_to_ptr.vmem [resolvable:$true] %s569_s13 }
  0x2c   : > { %4767 = dma.hbm_to_vmem [thread:$0]  (!%p5726_p6), %s545_s7, 128, %s547_s18, [#allocation12]  }
  0x2d   : > { %s7616_s10 = sld [smem:[#allocation43_spill]]  ;;  %s5579_s7 = smov [#allocation10]  }
  0x2e   : > { %s534_s18 = sshll.u32 %s5579_s7, 4  ;;  %s5580_s12 = smov [#allocation13]   ;;  %s535_s18 = int_to_ptr.vmem [resolvable:$true] %s534_s18 }
  0x2f   : > { %s567_s2 = sshll.u32 %s7614_s11, 4  ;;  %s558_s27 = sshll.u32 %s5580_s12, 4  ;;  %s568_s2 = int_to_ptr.hbm [resolvable:$true] %s567_s2  ;;  %s559_s27 = int_to_ptr.vmem [resolvable:$true] %s558_s27 }
  0x30   : > { %s532_s22 = sshll.u32 %s7615_s8, 4  ;;  %s7617_s15 = sld [smem:[#allocation48_spill]]  ;;  %s533_s22 = int_to_ptr.hbm [resolvable:$true] %s532_s22 }
  0x31   : > { %4773 = dma.hbm_to_vmem [thread:$0]  (!%p5726_p6), %s568_s2, 2048, %s570_s13, [#allocation15], %s7580_s25, %s7580_s25, %s7582_s6  }
  0x32   : > { %4764 = dma.hbm_to_vmem [thread:$0]  (!%p5726_p6), %s533_s22, 16, %s535_s18, [#allocation9]  }
  0x33   : > { %s556_s26 = sshll.u32 %s7616_s10, 4  ;;  %s7618_s17 = sld [smem:[#allocation49_spill]]  ;;  %s557_s26 = int_to_ptr.hbm [resolvable:$true] %s556_s26 }
  0x34   : > { %4770 = dma.hbm_to_vmem [thread:$0]  (!%p5726_p6), %s557_s26, 16, %s559_s27, [#allocation12]  }
  0x35   : > { %s5581_s19 = smov [#allocation16]   ;;  %s5582_s26 = smov [#allocation17]  }
  0x36   : > { %s590_s13 = sshll.u32 %s7617_s15, 4  ;;  %s592_s14 = sshll.u32 %s5581_s19, 4  ;;  %s591_s13 = int_to_ptr.hbm [resolvable:$true] %s590_s13  ;;  %s593_s14 = int_to_ptr.vmem [resolvable:$true] %s592_s14 }
  0x37   : > { %4776 = dma.hbm_to_vmem [thread:$0]  (!%p5726_p6), %s591_s13, 2048, %s593_s14, [#allocation15], %s7580_s25, %s7580_s25, %s7582_s6  }
  0x38   : > { %s609_s7 = sshll.u32 %s5582_s26, 4  ;;  %s4534_s18 = sadd.s32 4294967294, %s5571_s21   ;;  %s610_s7 = int_to_ptr.vmem [resolvable:$true] %s609_s7 }
  0x39   : > { %s607_s22 = sshll.u32 %s7618_s17, 4  ;;  %s5778_s12 = sadd.s32 1, %s5571_s21   ;;  %s608_s22 = int_to_ptr.hbm [resolvable:$true] %s607_s22 }
  0x3a   : > { %4779 = dma.hbm_to_vmem [thread:$0]  (!%p5726_p6), %s608_s22, 2048, %s610_s7, [#allocation18], %s7580_s25, %s7580_s25, %s7582_s6  }
  0x3b   : > { %s46_s27 = ssub.s32 %s5571_s21, %s5778_s12  ;;  %s49_s1 = sadd.s32 1, %s5567_s20 }
  0x3c   : > { %p47_p7 = scmp.eq.s32.totalorder %s46_s27, 0  ;;  %p56_p8 = scmp.ne.s32.totalorder %s5567_s20, %s5563_s30 }
  0x3d   : > { %p57_p9 = scmp.eq.s32.totalorder %s5571_s21, 0  ;;  %p62_p10 = scmp.ne.s32.totalorder %s5563_s30, %s5559_s0 }
  0x3e   : > { %s5789_s3 = scalar_select %p47_p7, %s5567_s20, %s49_s1  }
  0x3f   : > { %p5791_p11 = por %p57_p9, %p56_p8  ;;  %p5797_p12 = por %p63_p1, %p62_p10 }
  0x40   : > { %7619 = sst [smem:[#allocation29_spill]] %s5789_s3  ;;  %p469_p13 = scmp.eq.s32.totalorder %s5709_s23, 1 }
  0x41   : > { %p475_p0 = scmp.eq.s32.totalorder %s4534_s18, 1  ;;  %p4799_p2 = scmp.lt.s32.totalorder %s5571_s21, 2 }
  0x42   : > { %s626_s2 = sand.u32 1, %s5567_s20   ;;  %p5804_p5 = por %p469_p13, %p56_p8 }
  0x43   : > { %p5808_p6 = por %p475_p0, %p62_p10  ;;  %s5812_s19 = sshll.u32 %s626_s2, 7 }
  0x44   : > { %s4712_s14 = sshll.u32 %s5571_s21, 7  ;;  %s7624_s27 = sld [smem:[#allocation35_spill]] }
  0x45   : > { %s630_s25 = scalar_lea.vmem [#allocation2], %s5812_s19  ;;  %p5821_p7 = pnand %p4799_p2, %p5791_p11 }
  0x46   : > { %s638_s18 = sshll.u32 %s630_s25, 4  ;;  %s7626_s11 = sld [smem:[#allocation36_spill]]  ;;  %s639_s18 = int_to_ptr.vmem [resolvable:$true] %s638_s18 }
  0x47   : > { %s627_s3 = scalar_lea.sflag [#allocation3], %s626_s2  ;;  %p5425_p9 = pneg %p5821_p7 }
  0x4a   : > { %s635_s1 = scalar_lea.hbm %s7624_s27, %s4712_s14 }
  0x4b   : > { %s636_s6 = sshll.u32 %s635_s1, 4  ;;  %s5428_s1 = scalar_lea.hbm %s7624_s27, 256  ;;  %s637_s6 = int_to_ptr.hbm [resolvable:$true] %s636_s6 }
  0x4c   : > { %s657_s15 = scalar_lea.hbm %s7626_s11, %s4712_s14  ;;  %s5421_s26 = sshra.s32 %s637_s6, 4  ;;  %s5422_s26 = int_to_ptr.hbm [resolvable:$true] %s5421_s26 }
  0x4d   : > { %s658_s17 = sshll.u32 %s657_s15, 4  ;;  %s5423_s7 = scalar_lea.hbm %s5422_s26, 128  ;;  %s659_s17 = int_to_ptr.hbm [resolvable:$true] %s658_s17 }
  0x4e   : > { %p5424_p8 = scmp.ne.s32.totalorder %s5422_s26, %s5423_s7  ;;  %p5429_p13 = scmp.lt.s32.totalorder %s5422_s26, %s7624_s27 }
  0x4f   : > { %p5430_p0 = scmp.lt.s32.totalorder %s5428_s1, %s5423_s7 }
  0x50   : > { %p5426_p10 = pnand %p5425_p9, %p5424_p8 }
  0x51   : > { %p5431_p2 = por %p5430_p0, %p5429_p13 }
  0x52   : > { %p5427_p11 = pneg %p5426_p10 }
  0x54   : > { %p5432_p4 = pnand %p5431_p2, %p5427_p11 }
  0x56   : > { %5435 = shalt.err (!%p5432_p4)
}
  0x57   : > { %s7627_s15 = smov 8   ;;  %s7628_s2 = smov 128  }
  0x58   : > { %4783 = dma.hbm_to_vmem [thread:$0]  (!%p5821_p7), %s637_s6, 2048, %s639_s18, %s627_s3, %s7628_s2, %s7628_s2, %s7627_s15  }
  0x59   : > { %s652_s14 = scalar_lea.vmem [#allocation5], %s5812_s19  ;;  %s648_s29 = sand.u32 1, %s5571_s21  }
  0x5a   : > { %s660_s25 = sshll.u32 %s652_s14, 4  ;;  %s649_s9 = scalar_lea.sflag [#allocation6], %s648_s29  ;;  %s661_s25 = int_to_ptr.vmem [resolvable:$true] %s660_s25 }
  0x5b   : > { %s5451_s26 = sshra.s32 %s659_s17, 4  ;;  %s5458_s27 = scalar_lea.hbm %s7626_s11, 256  ;;  %s5452_s26 = int_to_ptr.hbm [resolvable:$true] %s5451_s26 }
  0x5c   : > { %s5453_s7 = scalar_lea.hbm %s5452_s26, 128  ;;  %p5459_p11 = scmp.lt.s32.totalorder %s5452_s26, %s7626_s11 }
  0x5d   : > { %p5454_p8 = scmp.ne.s32.totalorder %s5452_s26, %s5453_s7  ;;  %p5460_p13 = scmp.lt.s32.totalorder %s5458_s27, %s5453_s7 }
  0x5f   : > { %p5456_p4 = pnand %p5454_p8, %p5425_p9  ;;  %p5461_p0 = por %p5460_p13, %p5459_p11 }
  0x61   : > { %p5457_p10 = pneg %p5456_p4 }
  0x63   : > { %p5462_p2 = pnand %p5461_p0, %p5457_p10 }
  0x65   : > { %5465 = shalt.err (!%p5462_p2)
}
  0x66   : > { %4786 = dma.hbm_to_vmem [thread:$0]  (!%p5821_p7), %s659_s17, 2048, %s661_s25, %s649_s9, %s7628_s2, %s7628_s2, %s7627_s15  }
  0x67   : > { %672 = sbr.rel (%p5714_p3) target bundleno = 2377 (0x949), region = 96 }
  0x6c   : > { %s5863_s3 = sand.u32 1, %s5563_s30  }
  0x6d   : > { %s5866_s20 = sshll.u32 %s5863_s3, 7  ;;  %s675_s19 = scalar_lea.sflag [#allocation3], %s5863_s3 }
  0x6e   : > { %s5870_s27 = scalar_lea.vmem [#allocation2], %s5866_s20 }
  0x6f   : > { %5526 = dma.done.wait (%p5797_p12), %s675_s19, 2048  }
  0x70   : > { %5528 = vsyncadd (%p5797_p12), %s675_s19, 4294965248  ;;  %s684_s8 = sand.u32 1, %s5709_s23   ;;  %s5878_s24 = scalar_lea.vmem [#allocation5], %s5866_s20 }
  0x71   : > { %s685_s17 = scalar_lea.sflag [#allocation6], %s684_s8 }
  0x72   : > { %5530 = dma.done.wait (%p5797_p12), %s685_s17, 2048  }
  0x73   : > { %5532 = vsyncadd (%p5797_p12), %s685_s17, 4294965248 }
  0x74   : > { %5534 = dma.done.wait (%p63_p1), [#allocation6], 16  }
  0x75   : > { %5536 = vsyncadd (%p63_p1), [#allocation6], 4294967280 }
  0x76   : > { %5538 = dma.done.wait (%p63_p1), [#allocation9], 2064  }
  0x77   : > { %5540 = vsyncadd (%p63_p1), [#allocation9], 4294965232 }
  0x78   : > { %5542 = dma.done.wait (%p63_p1), [#allocation12], 144  }
  0x79   : > { %5544 = vsyncadd (%p63_p1), [#allocation12], 4294967152 }
  0x7a   : > { %5546 = dma.done.wait (%p63_p1), [#allocation15], 4096  }
  0x7b   : > { %5548 = vsyncadd (%p63_p1), [#allocation15], 4294963200 }
  0x7c   : > { %5550 = dma.done.wait (%p63_p1), [#allocation18], 2048  }
  0x7d   : > { %5552 = vsyncadd (%p63_p1), [#allocation18], 4294965248  ;;  %s7629_s15 = sld [smem:[#allocation38_spill]]  ;;  %v792_v16 = vld [vmem:[%s5870_s27] sm:$0xff]  ;;  %v793_v17 = vld [vmem:[%s5870_s27 + $0x8] sm:$0xff]  ;;  %vm1296_vm2 = vcmask 64512  }
  0x7e   : > { %v794_v18 = vld [vmem:[%s5870_s27 + $0x10] sm:$0xff]  ;;  %v795_v19 = vld [vmem:[%s5870_s27 + $0x18] sm:$0xff]  ;;  %v796_v20 = vld [vmem:[%s5870_s27 + $0x20] sm:$0xff]  ;;  %s7630_s25 = sld [smem:[#allocation37_spill]]  ;;  %s7473_s17 = scalar_lea.vmem [#allocation19], %s5866_s20 }
  0x7f   : > { %v797_v21 = vld [vmem:[%s5870_s27 + $0x28] sm:$0xff]  ;;  %v798_v22 = vld [vmem:[%s5870_s27 + $0x30] sm:$0xff]  ;;  %v799_v23 = vld [vmem:[%s5870_s27 + $0x38] sm:$0xff]  ;;  %s7647_s14 = sld [smem:[#allocation45_spill]]  ;;  %s4714_s20 = sshll.u32 %s5709_s23, 7 }
  0x80   : > { %v800_v24 = vld [vmem:[%s5870_s27 + $0x40] sm:$0xff]  ;;  %v801_v29 = vld [vmem:[%s5870_s27 + $0x48] sm:$0xff]  ;;  %v802_v34 = vld [vmem:[%s5870_s27 + $0x50] sm:$0xff]  ;;  %s7648_s26 = sld [smem:[#allocation46_spill]]  ;;  %s4347_s9 = scalar_lea.sflag [#allocation4], %s5863_s3 }
  0x81   : > { %v803_v39 = vld [vmem:[%s5870_s27 + $0x58] sm:$0xff]  ;;  %v804_v43 = vld [vmem:[%s5870_s27 + $0x60] sm:$0xff]  ;;  %v805_v45 = vld [vmem:[%s5870_s27 + $0x68] sm:$0xff]  ;;  %s7649_s10 = sld [smem:[#allocation47_spill]] }
  0x82   : > { %v806_v46 = vld [vmem:[%s5870_s27 + $0x70] sm:$0xff]  ;;  %v807_v47 = vld [vmem:[%s5870_s27 + $0x78] sm:$0xff]  ;;  %v4853_v48 = vld [vmem:[%s7559_s4] ss:$0 sm:$0xff]  ;;  %s7650_s8 = sld [smem:[#allocation50_spill]] }
  0x83   : > { %v839_v0 = vld [vmem:[%s7629_s15 + $0x78] sm:$0xff]  ;;  %v838_v1 = vld [vmem:[%s7629_s15 + $0x70] sm:$0xff]  ;;  %v837_v2 = vld [vmem:[%s7629_s15 + $0x68] sm:$0xff]  ;;  %s7651_s18 = sld [smem:[#allocation51_spill]] }
  0x84   : > { %846 = vmatpush.msra.mxu0 %v839_v0  ;;  %v836_v3 = vld [vmem:[%s7629_s15 + $0x60] sm:$0xff]  ;;  %v835_v4 = vld [vmem:[%s7629_s15 + $0x58] sm:$0xff]  ;;  %v834_v5 = vld [vmem:[%s7629_s15 + $0x50] sm:$0xff] }
  0x85   : > { %v833_v6 = vld [vmem:[%s7629_s15 + $0x48] sm:$0xff]  ;;  %v832_v7 = vld [vmem:[%s7629_s15 + $0x40] sm:$0xff]  ;;  %v831_v8 = vld [vmem:[%s7629_s15 + $0x38] sm:$0xff] }
  0x86   : > { %847 = vmatpush.msra.mxu0 %v838_v1  ;;  %v830_v9 = vld [vmem:[%s7629_s15 + $0x30] sm:$0xff]  ;;  %v829_v10 = vld [vmem:[%s7629_s15 + $0x28] sm:$0xff]  ;;  %v828_v11 = vld [vmem:[%s7629_s15 + $0x20] sm:$0xff] }
  0x87   : > { %v827_v12 = vld [vmem:[%s7629_s15 + $0x18] sm:$0xff]  ;;  %v826_v13 = vld [vmem:[%s7629_s15 + $0x10] sm:$0xff]  ;;  %v825_v14 = vld [vmem:[%s7629_s15 + $0x8] sm:$0xff] }
  0x88   : > { %848 = vmatpush.msra.mxu0 %v837_v2  ;;  %v824_v15 = vld [vmem:[%s7629_s15] sm:$0xff]  ;;  %v5964_v25 = vld [vmem:[%s7630_s25 + $0x78] sm:$0xff]  ;;  %v5969_v26 = vld [vmem:[%s7630_s25 + $0x70] sm:$0xff] }
  0x89   : > { %927 = vmatpush.msra.mxu1 %v5964_v25  ;;  %v5975_v27 = vld [vmem:[%s7630_s25 + $0x68] sm:$0xff]  ;;  %v5981_v28 = vld [vmem:[%s7630_s25 + $0x60] sm:$0xff]  ;;  %v5989_v30 = vld [vmem:[%s7630_s25 + $0x58] sm:$0xff]  ;;  %s4358_s2 = scalar_lea.hbm %s7651_s18, %s4714_s20 }
  0x8a   : > { %849 = vmatpush.msra.mxu0 %v836_v3  ;;  %v5994_v31 = vld [vmem:[%s7630_s25 + $0x50] sm:$0xff]  ;;  %v6000_v32 = vld [vmem:[%s7630_s25 + $0x48] sm:$0xff]  ;;  %v6006_v33 = vld [vmem:[%s7630_s25 + $0x40] sm:$0xff]  ;;  %s4361_s29 = sshll.u32 %s4358_s2, 4  ;;  %s4362_s29 = int_to_ptr.hbm [resolvable:$true] %s4361_s29 }
  0x8b   : > { %928 = vmatpush.msra.mxu1 %v5969_v26  ;;  %v6014_v35 = vld [vmem:[%s7630_s25 + $0x38] sm:$0xff]  ;;  %v6019_v36 = vld [vmem:[%s7630_s25 + $0x30] sm:$0xff]  ;;  %v6025_v37 = vld [vmem:[%s7630_s25 + $0x28] sm:$0xff]  ;;  %s5495_s23 = sshra.s32 %s4362_s29, 4  ;;  %s5496_s23 = int_to_ptr.hbm [resolvable:$true] %s5495_s23 }
  0x8c   : > { %850 = vmatpush.msra.mxu0 %v835_v4  ;;  %v6031_v38 = vld [vmem:[%s7630_s25 + $0x20] sm:$0xff]  ;;  %v6039_v40 = vld [vmem:[%s7630_s25 + $0x18] sm:$0xff]  ;;  %v6044_v41 = vld [vmem:[%s7630_s25 + $0x10] sm:$0xff]  ;;  %p5502_p7 = scmp.lt.s32.totalorder %s5496_s23, %s7651_s18 }
  0x8d   : > { %929 = vmatpush.msra.mxu1 %v5975_v27  ;;  %v6051_v42 = vld [vmem:[%s7630_s25 + $0x8] sm:$0xff]  ;;  %v6058_v44 = vld [vmem:[%s7630_s25] sm:$0xff] }
  0x8e   : > { %851 = vmatpush.msra.mxu0 %v834_v5 }
  0x8f   : > { %930 = vmatpush.msra.mxu1 %v5981_v28 }
  0x90   : > { %852 = vmatpush.msra.mxu0 %v833_v6 }
  0x91   : > { %931 = vmatpush.msra.mxu1 %v5989_v30 }
  0x92   : > { %853 = vmatpush.msra.mxu0 %v832_v7 }
  0x93   : > { %932 = vmatpush.msra.mxu1 %v5994_v31 }
  0x94   : > { %854 = vmatpush.msra.mxu0 %v831_v8 }
  0x95   : > { %933 = vmatpush.msra.mxu1 %v6000_v32 }
  0x96   : > { %855 = vmatpush.msra.mxu0 %v830_v9 }
  0x97   : > { %934 = vmatpush.msra.mxu1 %v6006_v33 }
  0x98   : > { %856 = vmatpush.msra.mxu0 %v829_v10 }
  0x99   : > { %935 = vmatpush.msra.mxu1 %v6014_v35 }
  0x9a   : > { %857 = vmatpush.msra.mxu0 %v828_v11 }
  0x9b   : > { %936 = vmatpush.msra.mxu1 %v6019_v36 }
  0x9c   : > { %858 = vmatpush.msra.mxu0 %v827_v12 }
  0x9d   : > { %937 = vmatpush.msra.mxu1 %v6025_v37 }
  0x9e   : > { %859 = vmatpush.msra.mxu0 %v826_v13 }
  0x9f   : > { %938 = vmatpush.msra.mxu1 %v6031_v38 }
  0xa0   : > { %860 = vmatpush.msra.mxu0 %v825_v14 }
  0xa1   : > { %939 = vmatpush.msra.mxu1 %v6039_v40 }
  0xa2   : > { %861 = vmatpush.msra.mxu0 %v824_v15 }
  0xa3   : > { %862 = vmatmul.f32.vlgmr.msra.gmra.mxu0 %v792_v16  ;;  %940 = vmatpush.msra.mxu1 %v6044_v41 }
  0xa5   : > { %941 = vmatpush.msra.mxu1 %v6051_v42 }
  0xa7   : > { %942 = vmatpush.msra.mxu1 %v6058_v44 }
  0xab   : > { %865 = vmatmul.f32.gmra.mxu0 %v793_v17 }
  0xb3   : > { %868 = vmatmul.f32.gmra.mxu0 %v794_v18 }
  0xbb   : > { %871 = vmatmul.f32.gmra.mxu0 %v795_v19 }
  0xc3   : > { %874 = vmatmul.f32.gmra.mxu0 %v796_v20 }
  0xcb   : > { %877 = vmatmul.f32.gmra.mxu0 %v797_v21 }
  0xd3   : > { %880 = vmatmul.f32.gmra.mxu0 %v798_v22 }
  0xdb   : > { %883 = vmatmul.f32.gmra.mxu0 %v799_v23 }
  0xe3   : > { %886 = vmatmul.f32.gmra.mxu0 %v800_v24 }
  0xeb   : > { %889 = vmatmul.f32.gmra.mxu0 %v801_v29 }
  0xf3   : > { %892 = vmatmul.f32.gmra.mxu0 %v802_v34 }
  0xfb   : > { %895 = vmatmul.f32.gmra.mxu0 %v803_v39 }
 0x103   : > { %898 = vmatmul.f32.gmra.mxu0 %v804_v43 }
 0x10b   : > { %901 = vmatmul.f32.gmra.mxu0 %v805_v45 }
 0x113   : > { %904 = vmatmul.f32.gmra.mxu0 %v806_v46 }
 0x11b   : > { %907 = vmatmul.f32.gmra.mxu0 %v807_v47 }
 0x120   : > { %v863_v49 = vpop.f32.mrf.mxu0 }
 0x121   : > { %v6067_v50 = vadd.f32 %v4853_v48, %v863_v49 }
 0x123   : > { %943 = vmatmul.f32.vlgmr.msra.gmra.mxu1 %v6067_v50  ;;  %v911_v18 = vmul.f32 %v6067_v50, %v6067_v50 }
 0x128   : > { %v866_v51 = vpop.f32.mrf.mxu0 }
 0x129   : > { %v6070_v52 = vadd.f32 %v4853_v48, %v866_v51 }
 0x12b   : > { %946 = vmatmul.f32.gmra.mxu1 %v6070_v52  ;;  %v912_v20 = vmul.f32 %v6070_v52, %v6070_v52 }
 0x130   : > { %v869_v53 = vpop.f32.mrf.mxu0 }
 0x131   : > { %v6073_v54 = vadd.f32 %v4853_v48, %v869_v53 }
 0x133   : > { %949 = vmatmul.f32.gmra.mxu1 %v6073_v54  ;;  %v913_v22 = vmul.f32 %v6073_v54, %v6073_v54 }
 0x138   : > { %v872_v55 = vpop.f32.mrf.mxu0 }
 0x139   : > { %v6076_v56 = vadd.f32 %v4853_v48, %v872_v55 }
 0x13b   : > { %952 = vmatmul.f32.gmra.mxu1 %v6076_v56  ;;  %v914_v24 = vmul.f32 %v6076_v56, %v6076_v56 }
 0x140   : > { %v875_v57 = vpop.f32.mrf.mxu0 }
 0x141   : > { %v6079_v58 = vadd.f32 %v4853_v48, %v875_v57 }
 0x143   : > { %955 = vmatmul.f32.gmra.mxu1 %v6079_v58  ;;  %v915_v34 = vmul.f32 %v6079_v58, %v6079_v58 }
 0x148   : > { %v878_v59 = vpop.f32.mrf.mxu0 }
 0x149   : > { %v6082_v60 = vadd.f32 %v4853_v48, %v878_v59 }
 0x14b   : > { %958 = vmatmul.f32.gmra.mxu1 %v6082_v60  ;;  %v916_v43 = vmul.f32 %v6082_v60, %v6082_v60 }
 0x150   : > { %v881_v61 = vpop.f32.mrf.mxu0 }
 0x151   : > { %v6085_v62 = vadd.f32 %v4853_v48, %v881_v61 }
 0x153   : > { %961 = vmatmul.f32.gmra.mxu1 %v6085_v62  ;;  %v917_v46 = vmul.f32 %v6085_v62, %v6085_v62 }
 0x158   : > { %v884_v63 = vpop.f32.mrf.mxu0 }
 0x159   : > { %v6088_v0 = vadd.f32 %v4853_v48, %v884_v63 }
 0x15b   : > { %964 = vmatmul.f32.gmra.mxu1 %v6088_v0 }
 0x160   : > { %v887_v1 = vpop.f32.mrf.mxu0 }
 0x161   : > { %v6091_v2 = vadd.f32 %v4853_v48, %v887_v1 }
 0x163   : > { %967 = vmatmul.f32.gmra.mxu1 %v6091_v2  ;;  %v919_v51 = vmul.f32 %v6091_v2, %v6091_v2 }
 0x168   : > { %v890_v3 = vpop.f32.mrf.mxu0 }
 0x169   : > { %v6094_v4 = vadd.f32 %v4853_v48, %v890_v3 }
 0x16b   : > { %970 = vmatmul.f32.gmra.mxu1 %v6094_v4  ;;  %v920_v55 = vmul.f32 %v6094_v4, %v6094_v4 }
 0x170   : > { %v893_v5 = vpop.f32.mrf.mxu0 }
 0x171   : > { %v6097_v6 = vadd.f32 %v4853_v48, %v893_v5 }
 0x173   : > { %973 = vmatmul.f32.gmra.mxu1 %v6097_v6  ;;  %v921_v59 = vmul.f32 %v6097_v6, %v6097_v6 }
 0x178   : > { %v896_v7 = vpop.f32.mrf.mxu0 }
 0x179   : > { %v6100_v8 = vadd.f32 %v4853_v48, %v896_v7 }
 0x17b   : > { %7631 = vst [vmem:[#allocation30_spill] sm:$0xff] %v6100_v8  ;;  %976 = vmatmul.f32.gmra.mxu1 %v6100_v8  ;;  %v922_v63 = vmul.f32 %v6100_v8, %v6100_v8 }
 0x180   : > { %v899_v9 = vpop.f32.mrf.mxu0 }
 0x181   : > { %v6103_v10 = vadd.f32 %v4853_v48, %v899_v9 }
 0x183   : > { %7632 = vst [vmem:[#allocation31_spill] sm:$0xff] %v6103_v10  ;;  %979 = vmatmul.f32.gmra.mxu1 %v6103_v10  ;;  %v923_v3 = vmul.f32 %v6103_v10, %v6103_v10 }
 0x188   : > { %v902_v11 = vpop.f32.mrf.mxu0 }
 0x189   : > { %v6106_v12 = vadd.f32 %v4853_v48, %v902_v11 }
 0x18b   : > { %7633 = vst [vmem:[#allocation32_spill] sm:$0xff] %v6106_v12  ;;  %982 = vmatmul.f32.gmra.mxu1 %v6106_v12  ;;  %v924_v7 = vmul.f32 %v6106_v12, %v6106_v12 }
 0x190   : > { %v905_v13 = vpop.f32.mrf.mxu0 }
 0x191   : > { %v6109_v14 = vadd.f32 %v4853_v48, %v905_v13 }
 0x193   : > { %7634 = vst [vmem:[#allocation33_spill] sm:$0xff] %v6109_v14  ;;  %985 = vmatmul.f32.gmra.mxu1 %v6109_v14  ;;  %v925_v11 = vmul.f32 %v6109_v14, %v6109_v14 }
 0x198   : > { %v908_v15 = vpop.f32.mrf.mxu0 }
 0x199   : > { %v6112_v16 = vadd.f32 %v4853_v48, %v908_v15  ;;  %v918_v48 = vmul.f32 %v6088_v0, %v6088_v0 }
 0x19b   : > { %7635 = vst [vmem:[#allocation34_spill] sm:$0xff] %v6112_v16  ;;  %988 = vmatmul.f32.gmra.mxu1 %v6112_v16  ;;  %v926_v15 = vmul.f32 %v6112_v16, %v6112_v16 }
 0x1a0   : > { %v944_v17 = vpop.f32.mrf.mxu1 }
 0x1a3   : > { %991 = vmatmul.f32.gmra.mxu1 %v911_v18  ;;  %v841_v18 = vld [vmem:[%s7560_s5] sm:$0xff] }
 0x1a4   : > { %1360 = vmatpush.msrb.mxu0 %v841_v18  ;;  %4715 = vmatpush.msra.mxu2 %v841_v18 }
 0x1a5   : > { %4716 = vmatpush.msra.mxu3 %v841_v18 }
 0x1a7   : > { %1508 = vmatpush.msrb.mxu3 %v841_v18 }
 0x1a8   : > { %v947_v19 = vpop.f32.mrf.mxu1 }
 0x1ab   : > { %994 = vmatmul.f32.gmra.mxu1 %v912_v20  ;;  %v1040_v20 = vmul.f32 0.125, %v944_v17 }
 0x1ad   : > { %v1410_v12 = vsub.f32 0.0, %v1040_v20 }
 0x1b0   : > { %v950_v21 = vpop.f32.mrf.mxu1 }
 0x1b3   : > { %997 = vmatmul.f32.gmra.mxu1 %v913_v22 }
 0x1b8   : > { %v6121_v23 = vpop.f32.mrf.mxu1 }
 0x1bb   : > { %1000 = vmatmul.f32.gmra.mxu1 %v914_v24  ;;  %v1072_v24 = vmul.f32 %v1040_v20, %v1040_v20 }
 0x1c0   : > { %v6125_v29 = vpop.f32.mrf.mxu1 }
 0x1c3   : > { %1003 = vmatmul.f32.gmra.mxu1 %v915_v34 }
 0x1c8   : > { %v6129_v39 = vpop.f32.mrf.mxu1 }
 0x1cb   : > { %1006 = vmatmul.f32.gmra.mxu1 %v916_v43 }
 0x1d0   : > { %v6133_v45 = vpop.f32.mrf.mxu1 }
 0x1d3   : > { %1009 = vmatmul.f32.gmra.mxu1 %v917_v46  ;;  %v1041_v46 = vmul.f32 0.125, %v947_v19 }
 0x1d8   : > { %v6137_v47 = vpop.f32.mrf.mxu1 }
 0x1db   : > { %1012 = vmatmul.f32.gmra.mxu1 %v918_v48 }
 0x1e0   : > { %v6141_v49 = vpop.f32.mrf.mxu1 }
 0x1e3   : > { %1015 = vmatmul.f32.gmra.mxu1 %v919_v51 }
 0x1e8   : > { %v6145_v53 = vpop.f32.mrf.mxu1 }
 0x1eb   : > { %1018 = vmatmul.f32.gmra.mxu1 %v920_v55 }
 0x1f0   : > { %v6149_v57 = vpop.f32.mrf.mxu1 }
 0x1f3   : > { %1021 = vmatmul.f32.gmra.mxu1 %v921_v59  ;;  %v1073_v59 = vmul.f32 %v1041_v46, %v1041_v46 }
 0x1f8   : > { %v6153_v61 = vpop.f32.mrf.mxu1 }
 0x1fb   : > { %1024 = vmatmul.f32.gmra.mxu1 %v922_v63 }
 0x200   : > { %v6157_v1 = vpop.f32.mrf.mxu1 }
 0x203   : > { %1027 = vmatmul.f32.gmra.mxu1 %v923_v3 }
 0x208   : > { %v6161_v5 = vpop.f32.mrf.mxu1 }
 0x20b   : > { %1030 = vmatmul.f32.gmra.mxu1 %v924_v7  ;;  %v6176_v7 = vmul.f32 0.125, %v950_v21 }
 0x20d   : > { %v1074_v17 = vmul.f32 %v6176_v7, %v6176_v7 }
 0x210   : > { %v6165_v9 = vpop.f32.mrf.mxu1 }
 0x213   : > { %1033 = vmatmul.f32.gmra.mxu1 %v925_v11 }
 0x218   : > { %v6169_v13 = vpop.f32.mrf.mxu1 }
 0x21b   : > { %1036 = vmatmul.f32.gmra.mxu1 %v926_v15 }
 0x220   : > { %v992_v22 = vpop.f32.mrf.mxu1 }
 0x221   : > { %v1056_v34 = vmul.f32 0.125, %v992_v22 }
 0x223   : > { %v1088_v43 = vsub.f32 %v1056_v34, %v1072_v24 }
 0x225   : > { %v1104_v48 = vmax.f32 %v1088_v43, 0.0  ;;  %v6181_v43 = vmul.f32 0.125, %v6121_v23 }
 0x227   : > { %v1120_v51 = vadd.f32 1e-05, %v1104_v48 }
 0x228   : > { %v995_v55 = vpop.f32.mrf.mxu1 }
 0x229   : > { %4861 = vrsqrt.f32 %v1120_v51  ;;  %v1057_v63 = vmul.f32 0.125, %v995_v55  ;;  %vm1142_vm1 = vweird.f32 %v1120_v51 }
 0x22b   : > { %v1089_v3 = vsub.f32 %v1057_v63, %v1073_v59 }
 0x22d   : > { %v1105_v11 = vmax.f32 %v1089_v3, 0.0 }
 0x22f   : > { %v4862_v16 = vpop.eup %4861  ;;  %v1121_v15 = vadd.f32 1e-05, %v1105_v11 }
 0x230   : > { %v1137_v14 = vmul.f32 %v4862_v16, %v1120_v51  ;;  %v998_v18 = vpop.f32.mrf.mxu1  ;;  %vm1143_vm0 = vweird.f32 %v4862_v16 }
 0x231   : > { %4863 = vrsqrt.f32 %v1121_v15  ;;  %v1058_v22 = vmul.f32 0.125, %v998_v18  ;;  %v1075_v18 = vmul.f32 %v6181_v43, %v6181_v43  ;;  %vm1144_vm3 = vmor %vm1142_vm1, %vm1143_vm0  ;;  %vm1152_vm5 = vweird.f32 %v1121_v15 }
 0x232   : > { %v1138_v19 = vmul.f32 %v4862_v16, %v1137_v14 }
 0x233   : > { %v1090_v24 = vsub.f32 %v1058_v22, %v1074_v17 }
 0x234   : > { %v1139_v34 = vmul.f32 0.5, %v1138_v19 }
 0x235   : > { %v1106_v48 = vmax.f32 %v1090_v24, 0.0 }
 0x236   : > { %v1140_v55 = vsub.f32 1.5, %v1139_v34  ;;  %v6189_v34 = vmul.f32 0.125, %v6125_v29 }
 0x237   : > { %v4864_v21 = vpop.eup %4863  ;;  %v1122_v59 = vadd.f32 1e-05, %v1106_v48 }
 0x238   : > { %v1147_v63 = vmul.f32 %v4864_v21, %v1121_v15  ;;  %v1001_v3 = vpop.f32.mrf.mxu1  ;;  %v1141_v11 = vmul.f32 %v4862_v16, %v1140_v55  ;;  %vm1153_vm4 = vweird.f32 %v4864_v21 }
 0x239   : > { %4865 = vrsqrt.f32 %v1122_v59  ;;  %v1059_v14 = vmul.f32 0.125, %v1001_v3  ;;  %vm1154_vm6 = vmor %vm1152_vm5, %vm1153_vm4  ;;  %vm1162_vm8 = vweird.f32 %v1122_v59 }
 0x23a   : > { %v1145_v17 = vsel %vm1144_vm3, %v4862_v16, %v1141_v11  ;;  %v1148_v23 = vmul.f32 %v4864_v21, %v1147_v63  ;;  %v1411_v16 = vsub.f32 0.0, %v1041_v46  ;;  %v1076_v63 = vmul.f32 %v6189_v34, %v6189_v34 }
 0x23b   : > { %v1091_v22 = vsub.f32 %v1059_v14, %v1075_v18  ;;  %4563 = vmatmul.msk.f32.vlgmr.msrb.gmra.mxu0 %vm1296_vm2, %v1145_v17  ;;  %v6186_v19 = vmul.f32 %v1410_v12, %v1145_v17 }
 0x23c   : > { %v1149_v24 = vmul.f32 0.5, %v1148_v23  ;;  %v6197_v23 = vmul.f32 0.125, %v6129_v39 }
 0x23d   : > { %v1107_v51 = vmax.f32 %v1091_v22, 0.0 }
 0x23e   : > { %v1150_v48 = vsub.f32 1.5, %v1149_v24 }
 0x23f   : > { %v4866_v20 = vpop.eup %4865  ;;  %v1123_v55 = vadd.f32 1e-05, %v1107_v51 }
 0x240   : > { %v1157_v10 = vmul.f32 %v4866_v20, %v1122_v59  ;;  %v1004_v8 = vpop.f32.mrf.mxu1  ;;  %v1151_v3 = vmul.f32 %v4864_v21, %v1150_v48  ;;  %vm1163_vm7 = vweird.f32 %v4866_v20 }
 0x241   : > { %4867 = vrsqrt.f32 %v1123_v55  ;;  %v1060_v12 = vmul.f32 0.125, %v1004_v8  ;;  %vm1164_vm9 = vmor %vm1162_vm8, %vm1163_vm7  ;;  %vm1172_vm11 = vweird.f32 %v1123_v55 }
 0x242   : > { %v1155_v11 = vsel %vm1154_vm6, %v4864_v21, %v1151_v3  ;;  %v1158_v18 = vmul.f32 %v4866_v20, %v1157_v10  ;;  %v1412_v10 = vsub.f32 0.0, %v6176_v7  ;;  %v1077_v21 = vmul.f32 %v6197_v23, %v6197_v23 }
 0x243   : > { %v1092_v29 = vsub.f32 %v1060_v12, %v1076_v63  ;;  %4564 = vmatmul.msk.f32.gmra.mxu0 %vm1296_vm2, %v1155_v11  ;;  %v6194_v14 = vmul.f32 %v1411_v16, %v1155_v11 }
 0x244   : > { %v1159_v17 = vmul.f32 0.5, %v1158_v18  ;;  %v6206_v18 = vmul.f32 0.125, %v6133_v45 }
 0x245   : > { %v1108_v22 = vmax.f32 %v1092_v29, 0.0 }
 0x246   : > { %v1160_v15 = vsub.f32 1.5, %v1159_v17 }
 0x247   : > { %v4868_v46 = vpop.eup %4867  ;;  %v1124_v24 = vadd.f32 1e-05, %v1108_v22 }
 0x248   : > { %v1167_v51 = vmul.f32 %v4868_v46, %v1123_v55  ;;  %v1007_v48 = vpop.f32.mrf.mxu1  ;;  %v1161_v8 = vmul.f32 %v4866_v20, %v1160_v15  ;;  %vm1173_vm10 = vweird.f32 %v4868_v46 }
 0x249   : > { %4869 = vrsqrt.f32 %v1124_v24  ;;  %v1061_v3 = vmul.f32 0.125, %v1007_v48  ;;  %vm1174_vm12 = vmor %vm1172_vm11, %vm1173_vm10  ;;  %vm1182_vm14 = vweird.f32 %v1124_v24 }
 0x24a   : > { %v1165_v16 = vsel %vm1164_vm9, %v4866_v20, %v1161_v8  ;;  %v1168_v39 = vmul.f32 %v4868_v46, %v1167_v51  ;;  %v1413_v20 = vsub.f32 0.0, %v6181_v43  ;;  %v1078_v51 = vmul.f32 %v6206_v18, %v6206_v18 }
 0x24b   : > { %v1093_v63 = vsub.f32 %v1061_v3, %v1077_v21  ;;  %4565 = vmatmul.msk.f32.gmra.mxu0 %vm1296_vm2, %v1165_v16  ;;  %v6203_v12 = vmul.f32 %v1412_v10, %v1165_v16 }
 0x24c   : > { %v1169_v11 = vmul.f32 0.5, %v1168_v39  ;;  %v6215_v39 = vmul.f32 0.125, %v6137_v47 }
 0x24d   : > { %v1109_v59 = vmax.f32 %v1093_v63, 0.0 }
 0x24e   : > { %v1170_v29 = vsub.f32 1.5, %v1169_v11 }
 0x24f   : > { %v4870_v7 = vpop.eup %4869  ;;  %v1125_v17 = vadd.f32 1e-05, %v1109_v59 }
 0x250   : > { %v1177_v22 = vmul.f32 %v4870_v7, %v1124_v24  ;;  %v1010_v15 = vpop.f32.mrf.mxu1  ;;  %v1171_v48 = vmul.f32 %v4868_v46, %v1170_v29  ;;  %vm1183_vm13 = vweird.f32 %v4870_v7 }
 0x251   : > { %4871 = vrsqrt.f32 %v1125_v17  ;;  %v1062_v8 = vmul.f32 0.125, %v1010_v15  ;;  %vm1184_vm15 = vmor %vm1182_vm14, %vm1183_vm13  ;;  %vm1192_vm1 = vweird.f32 %v1125_v17 }
 0x252   : > { %v1175_v10 = vsel %vm1174_vm12, %v4868_v46, %v1171_v48  ;;  %v1178_v45 = vmul.f32 %v4870_v7, %v1177_v22  ;;  %v1414_v46 = vsub.f32 0.0, %v6189_v34  ;;  %v1079_v22 = vmul.f32 %v6215_v39, %v6215_v39 }
 0x253   : > { %v1094_v21 = vsub.f32 %v1062_v8, %v1078_v51  ;;  %4566 = vmatmul.msk.f32.gmra.mxu0 %vm1296_vm2, %v1175_v10  ;;  %v6212_v3 = vmul.f32 %v1413_v20, %v1175_v10 }
 0x254   : > { %v1179_v16 = vmul.f32 0.5, %v1178_v45  ;;  %v6224_v45 = vmul.f32 0.125, %v6141_v49 }
 0x255   : > { %v1110_v55 = vmax.f32 %v1094_v21, 0.0 }
 0x256   : > { %v1180_v63 = vsub.f32 1.5, %v1179_v16 }
 0x257   : > { %v4872_v43 = vpop.eup %4871  ;;  %v1126_v11 = vadd.f32 1e-05, %v1110_v55 }
 0x258   : > { %v1187_v59 = vmul.f32 %v4872_v43, %v1125_v17  ;;  %v1013_v29 = vpop.f32.mrf.mxu1  ;;  %v1181_v15 = vmul.f32 %v4870_v7, %v1180_v63  ;;  %vm1193_vm0 = vweird.f32 %v4872_v43 }
 0x259   : > { %4873 = vrsqrt.f32 %v1126_v11  ;;  %v1063_v48 = vmul.f32 0.125, %v1013_v29  ;;  %vm1194_vm3 = vmor %vm1192_vm1, %vm1193_vm0  ;;  %vm1202_vm5 = vweird.f32 %v1126_v11 }
 0x25a   : > { %v1185_v20 = vsel %vm1184_vm15, %v4870_v7, %v1181_v15  ;;  %v1188_v47 = vmul.f32 %v4872_v43, %v1187_v59  ;;  %v1415_v7 = vsub.f32 0.0, %v6197_v23  ;;  %v1080_v59 = vmul.f32 %v6224_v45, %v6224_v45 }
 0x25b   : > { %v1095_v51 = vsub.f32 %v1063_v48, %v1079_v22  ;;  %4567 = vmatmul.msk.f32.vlgmr.msra.gmra.mxu2 %vm1296_vm2, %v1185_v20  ;;  %v6221_v8 = vmul.f32 %v1414_v46, %v1185_v20 }
 0x25c   : > { %v1189_v10 = vmul.f32 0.5, %v1188_v47  ;;  %v6233_v47 = vmul.f32 0.125, %v6145_v53 }
 0x25d   : > { %v1111_v24 = vmax.f32 %v1095_v51, 0.0 }
 0x25e   : > { %v1190_v21 = vsub.f32 1.5, %v1189_v10 }
 0x25f   : > { %v4874_v34 = vpop.eup %4873  ;;  %v1127_v16 = vadd.f32 1e-05, %v1111_v24 }
 0x260   : > { %v1197_v55 = vmul.f32 %v4874_v34, %v1126_v11  ;;  %v1016_v63 = vpop.f32.mrf.mxu1  ;;  %v1191_v29 = vmul.f32 %v4872_v43, %v1190_v21  ;;  %vm1203_vm4 = vweird.f32 %v4874_v34 }
 0x261   : > { %4875 = vrsqrt.f32 %v1127_v16  ;;  %v1064_v15 = vmul.f32 0.125, %v1016_v63  ;;  %vm1204_vm6 = vmor %vm1202_vm5, %vm1203_vm4  ;;  %vm1212_vm8 = vweird.f32 %v1127_v16 }
 0x262   : > { %v1195_v46 = vsel %vm1194_vm3, %v4872_v43, %v1191_v29  ;;  %v1198_v49 = vmul.f32 %v4874_v34, %v1197_v55  ;;  %v1416_v43 = vsub.f32 0.0, %v6206_v18  ;;  %v1081_v55 = vmul.f32 %v6233_v47, %v6233_v47 }
 0x263   : > { %v1096_v22 = vsub.f32 %v1064_v15, %v1080_v59  ;;  %4568 = vmatmul.msk.f32.gmra.mxu2 %vm1296_vm2, %v1195_v46  ;;  %v6230_v48 = vmul.f32 %v1415_v7, %v1195_v46 }
 0x264   : > { %v1199_v20 = vmul.f32 0.5, %v1198_v49  ;;  %v6242_v49 = vmul.f32 0.125, %v6149_v57 }
 0x265   : > { %v1112_v17 = vmax.f32 %v1096_v22, 0.0 }
 0x266   : > { %v1200_v51 = vsub.f32 1.5, %v1199_v20 }
 0x267   : > { %v4876_v23 = vpop.eup %4875  ;;  %v1128_v10 = vadd.f32 1e-05, %v1112_v17 }
 0x268   : > { %v1207_v24 = vmul.f32 %v4876_v23, %v1127_v16  ;;  %v1019_v21 = vpop.f32.mrf.mxu1  ;;  %v1201_v63 = vmul.f32 %v4874_v34, %v1200_v51  ;;  %vm1213_vm7 = vweird.f32 %v4876_v23 }
 0x269   : > { %4877 = vrsqrt.f32 %v1128_v10  ;;  %v1065_v29 = vmul.f32 0.125, %v1019_v21  ;;  %vm1214_vm9 = vmor %vm1212_vm8, %vm1213_vm7  ;;  %vm1222_vm11 = vweird.f32 %v1128_v10 }
 0x26a   : > { %v1205_v7 = vsel %vm1204_vm6, %v4874_v34, %v1201_v63  ;;  %v1208_v53 = vmul.f32 %v4876_v23, %v1207_v24  ;;  %v1417_v34 = vsub.f32 0.0, %v6215_v39  ;;  %v1082_v24 = vmul.f32 %v6242_v49, %v6242_v49 }
 0x26b   : > { %v1097_v59 = vsub.f32 %v1065_v29, %v1081_v55  ;;  %4569 = vmatmul.msk.f32.gmra.mxu2 %vm1296_vm2, %v1205_v7  ;;  %v6239_v15 = vmul.f32 %v1416_v43, %v1205_v7 }
 0x26c   : > { %v1209_v46 = vmul.f32 0.5, %v1208_v53  ;;  %v6251_v53 = vmul.f32 0.125, %v6153_v61 }
 0x26d   : > { %v1113_v11 = vmax.f32 %v1097_v59, 0.0 }
 0x26e   : > { %v1210_v22 = vsub.f32 1.5, %v1209_v46 }
 0x26f   : > { %v4878_v18 = vpop.eup %4877  ;;  %v1129_v20 = vadd.f32 1e-05, %v1113_v11 }
 0x270   : > { %v1217_v17 = vmul.f32 %v4878_v18, %v1128_v10  ;;  %v1022_v51 = vpop.f32.mrf.mxu1  ;;  %v1211_v21 = vmul.f32 %v4876_v23, %v1210_v22  ;;  %vm1223_vm10 = vweird.f32 %v4878_v18 }
 0x271   : > { %4879 = vrsqrt.f32 %v1129_v20  ;;  %v1066_v63 = vmul.f32 0.125, %v1022_v51  ;;  %vm1224_vm12 = vmor %vm1222_vm11, %vm1223_vm10  ;;  %vm1232_vm14 = vweird.f32 %v1129_v20 }
 0x272   : > { %v1215_v43 = vsel %vm1214_vm9, %v4876_v23, %v1211_v21  ;;  %v1218_v57 = vmul.f32 %v4878_v18, %v1217_v17  ;;  %v1418_v23 = vsub.f32 0.0, %v6224_v45  ;;  %v1083_v17 = vmul.f32 %v6251_v53, %v6251_v53 }
 0x273   : > { %v1098_v55 = vsub.f32 %v1066_v63, %v1082_v24  ;;  %4570 = vmatmul.msk.f32.gmra.mxu2 %vm1296_vm2, %v1215_v43  ;;  %v6248_v29 = vmul.f32 %v1417_v34, %v1215_v43 }
 0x274   : > { %v1219_v7 = vmul.f32 0.5, %v1218_v57  ;;  %v6260_v57 = vmul.f32 0.125, %v6157_v1 }
 0x275   : > { %v1114_v16 = vmax.f32 %v1098_v55, 0.0 }
 0x276   : > { %v1220_v59 = vsub.f32 1.5, %v1219_v7 }
 0x277   : > { %v4880_v39 = vpop.eup %4879  ;;  %v1130_v46 = vadd.f32 1e-05, %v1114_v16 }
 0x278   : > { %v1227_v11 = vmul.f32 %v4880_v39, %v1129_v20  ;;  %v1025_v22 = vpop.f32.mrf.mxu1  ;;  %v1221_v51 = vmul.f32 %v4878_v18, %v1220_v59  ;;  %vm1233_vm13 = vweird.f32 %v4880_v39 }
 0x279   : > { %4881 = vrsqrt.f32 %v1130_v46  ;;  %v1067_v21 = vmul.f32 0.125, %v1025_v22  ;;  %vm1234_vm15 = vmor %vm1232_vm14, %vm1233_vm13  ;;  %vm1242_vm1 = vweird.f32 %v1130_v46 }
 0x27a   : > { %v1225_v34 = vsel %vm1224_vm12, %v4878_v18, %v1221_v51  ;;  %v1228_v61 = vmul.f32 %v4880_v39, %v1227_v11  ;;  %v1419_v18 = vsub.f32 0.0, %v6233_v47  ;;  %v1084_v11 = vmul.f32 %v6260_v57, %v6260_v57 }
 0x27b   : > { %v1099_v24 = vsub.f32 %v1067_v21, %v1083_v17  ;;  %4571 = vmatmul.msk.f32.gmra.mxu2 %vm1296_vm2, %v1225_v34  ;;  %v6257_v63 = vmul.f32 %v1418_v23, %v1225_v34 }
 0x27c   : > { %v1229_v43 = vmul.f32 0.5, %v1228_v61  ;;  %v6269_v61 = vmul.f32 0.125, %v6161_v5 }
 0x27d   : > { %v1115_v10 = vmax.f32 %v1099_v24, 0.0 }
 0x27e   : > { %v1230_v55 = vsub.f32 1.5, %v1229_v43 }
 0x27f   : > { %v4882_v45 = vpop.eup %4881  ;;  %v1131_v7 = vadd.f32 1e-05, %v1115_v10 }
 0x280   : > { %v1237_v16 = vmul.f32 %v4882_v45, %v1130_v46  ;;  %v1028_v59 = vpop.f32.mrf.mxu1  ;;  %v1231_v22 = vmul.f32 %v4880_v39, %v1230_v55  ;;  %vm1243_vm0 = vweird.f32 %v4882_v45  ;;  %v6279_v46 = vmul.f32 0.125, %v6165_v9 }
 0x281   : > { %4883 = vrsqrt.f32 %v1131_v7  ;;  %v1068_v51 = vmul.f32 0.125, %v1028_v59  ;;  %vm1244_vm3 = vmor %vm1242_vm1, %vm1243_vm0  ;;  %vm1252_vm5 = vweird.f32 %v1131_v7 }
 0x282   : > { %v1235_v23 = vsel %vm1234_vm15, %v4880_v39, %v1231_v22  ;;  %v1238_v1 = vmul.f32 %v4882_v45, %v1237_v16  ;;  %v1420_v39 = vsub.f32 0.0, %v6242_v49  ;;  %v1085_v16 = vmul.f32 %v6269_v61, %v6269_v61 }
 0x283   : > { %v1100_v17 = vsub.f32 %v1068_v51, %v1084_v11  ;;  %4572 = vmatmul.msk.f32.gmra.mxu2 %vm1296_vm2, %v1235_v23  ;;  %v6266_v21 = vmul.f32 %v1419_v18, %v1235_v23 }
 0x284   : > { %v1239_v34 = vmul.f32 0.5, %v1238_v1 }
 0x285   : > { %v1116_v20 = vmax.f32 %v1100_v17, 0.0 }
 0x286   : > { %v1240_v24 = vsub.f32 1.5, %v1239_v34 }
 0x287   : > { %v4884_v47 = vpop.eup %4883  ;;  %v1132_v43 = vadd.f32 1e-05, %v1116_v20 }
 0x288   : > { %v1247_v10 = vmul.f32 %v4884_v47, %v1131_v7  ;;  %v1031_v55 = vpop.f32.mrf.mxu1  ;;  %v1241_v59 = vmul.f32 %v4882_v45, %v1240_v24  ;;  %vm1253_vm4 = vweird.f32 %v4884_v47 }
 0x289   : > { %4885 = vrsqrt.f32 %v1132_v43  ;;  %v1069_v22 = vmul.f32 0.125, %v1031_v55  ;;  %vm1254_vm6 = vmor %vm1252_vm5, %vm1253_vm4  ;;  %vm1262_vm8 = vweird.f32 %v1132_v43 }
 0x28a   : > { %v1245_v18 = vsel %vm1244_vm3, %v4882_v45, %v1241_v59  ;;  %v1248_v5 = vmul.f32 %v4884_v47, %v1247_v10  ;;  %v1421_v10 = vsub.f32 0.0, %v6251_v53 }
 0x28b   : > { %v1101_v11 = vsub.f32 %v1069_v22, %v1085_v16  ;;  %4573 = vmatmul.msk.f32.vlgmr.msra.gmra.mxu3 %vm1296_vm2, %v1245_v18  ;;  %v6275_v51 = vmul.f32 %v1420_v39, %v1245_v18 }
 0x28c   : > { %v1249_v23 = vmul.f32 0.5, %v1248_v5  ;;  %2013 = vmatpush.msra.mxu3 %v5964_v25  ;;  %v1086_v25 = vmul.f32 %v6279_v46, %v6279_v46 }
 0x28d   : > { %v1117_v49 = vmax.f32 %v1101_v11, 0.0  ;;  %v1422_v11 = vsub.f32 0.0, %v6260_v57 }
 0x28e   : > { %v1250_v1 = vsub.f32 1.5, %v1249_v23  ;;  %2014 = vmatpush.msra.mxu3 %v5969_v26 }
 0x28f   : > { %v4886_v17 = vpop.eup %4885  ;;  %v1133_v34 = vadd.f32 1e-05, %v1117_v49 }
 0x290   : > { %v1257_v45 = vmul.f32 %v4886_v17, %v1132_v43  ;;  %v1034_v20 = vpop.f32.mrf.mxu1  ;;  %v1251_v24 = vmul.f32 %v4884_v47, %v1250_v1  ;;  %2015 = vmatpush.msra.mxu3 %v5975_v27  ;;  %v6292_v27 = vmul.f32 0.125, %v6169_v13  ;;  %vm1263_vm7 = vweird.f32 %v4886_v17 }
 0x291   : > { %4887 = vrsqrt.f32 %v1133_v34  ;;  %v1070_v9 = vmul.f32 0.125, %v1034_v20  ;;  %vm1264_vm9 = vmor %vm1262_vm8, %vm1263_vm7  ;;  %vm1272_vm11 = vweird.f32 %v1133_v34 }
 0x292   : > { %v1255_v55 = vsel %vm1254_vm6, %v4884_v47, %v1251_v24  ;;  %v1258_v59 = vmul.f32 %v4886_v17, %v1257_v45  ;;  %2016 = vmatpush.msra.mxu3 %v5981_v28 }
 0x293   : > { %v1102_v26 = vsub.f32 %v1070_v9, %v1086_v25  ;;  %4574 = vmatmul.msk.f32.gmra.mxu3 %vm1296_vm2, %v1255_v55  ;;  %v6288_v39 = vmul.f32 %v1421_v10, %v1255_v55 }
 0x294   : > { %v1259_v7 = vmul.f32 0.5, %v1258_v59  ;;  %2017 = vmatpush.msra.mxu3 %v5989_v30  ;;  %v1087_v30 = vmul.f32 %v6292_v27, %v6292_v27 }
 0x295   : > { %v1118_v53 = vmax.f32 %v1102_v26, 0.0 }
 0x296   : > { %v1260_v16 = vsub.f32 1.5, %v1259_v7  ;;  %2018 = vmatpush.msra.mxu3 %v5994_v31 }
 0x297   : > { %v4888_v47 = vpop.eup %4887  ;;  %v1134_v22 = vadd.f32 1e-05, %v1118_v53  ;;  %v1425_v53 = vsub.f32 0.0, %v6292_v27  ;;  %v1916_v27 = vld [vmem:[#allocation8 + $0x30] sm:$0xff] }
 0x298   : > { %v1267_v18 = vmul.f32 %v4888_v47, %v1133_v34  ;;  %v1037_v28 = vpop.f32.mrf.mxu1  ;;  %v1261_v5 = vmul.f32 %v4886_v17, %v1260_v16  ;;  %2019 = vmatpush.msra.mxu3 %v6000_v32  ;;  %vm1273_vm10 = vweird.f32 %v4888_v47 }
 0x299   : > { %4889 = vrsqrt.f32 %v1134_v22  ;;  %v1071_v13 = vmul.f32 0.125, %v1037_v28  ;;  %vm1274_vm12 = vmor %vm1272_vm11, %vm1273_vm10  ;;  %vm1282_vm14 = vweird.f32 %v1134_v22 }
 0x29a   : > { %v1265_v23 = vsel %vm1264_vm9, %v4886_v17, %v1261_v5  ;;  %v1268_v49 = vmul.f32 %v4888_v47, %v1267_v18  ;;  %2020 = vmatpush.msra.mxu3 %v6006_v33  ;;  %v1423_v33 = vsub.f32 0.0, %v6269_v61  ;;  %v1424_v61 = vsub.f32 0.0, %v6279_v46  ;;  %v1918_v46 = vld [vmem:[#allocation8 + $0x40] sm:$0xff]  ;;  %v1913_v5 = vld [vmem:[#allocation8 + $0x18] sm:$0xff] }
 0x29b   : > { %v1103_v31 = vsub.f32 %v1071_v13, %v1087_v30  ;;  %4575 = vmatmul.msk.f32.gmra.mxu3 %vm1296_vm2, %v1265_v23  ;;  %v6301_v1 = vmul.f32 %v1422_v11, %v1265_v23  ;;  %v1912_v11 = vld [vmem:[#allocation8 + $0x10] sm:$0xff]  ;;  %v6358_v30 = vld [vmem:[#allocation7] ss:$0 sm:$0xff]  ;;  %v1911_v13 = vld [vmem:[#allocation8 + $0x8] sm:$0xff] }
 0x29c   : > { %v1269_v43 = vmul.f32 0.5, %v1268_v49  ;;  %2021 = vmatpush.msra.mxu3 %v6014_v35 }
 0x29d   : > { %v1119_v32 = vmax.f32 %v1103_v31, 0.0 }
 0x29e   : > { %v1270_v57 = vsub.f32 1.5, %v1269_v43  ;;  %2022 = vmatpush.msra.mxu3 %v6019_v36 }
 0x29f   : > { %v4890_v45 = vpop.eup %4889  ;;  %v1135_v20 = vadd.f32 1e-05, %v1119_v32 }
 0x2a0   : > { %v1277_v24 = vmul.f32 %v4890_v45, %v1134_v22  ;;  %v1271_v17 = vmul.f32 %v4888_v47, %v1270_v57  ;;  %2023 = vmatpush.msra.mxu3 %v6025_v37  ;;  %vm1283_vm13 = vweird.f32 %v4890_v45  ;;  %v1914_v22 = vld [vmem:[#allocation8 + $0x20] sm:$0xff] }
 0x2a1   : > { %4891 = vrsqrt.f32 %v1135_v20  ;;  %vm1284_vm15 = vmor %vm1282_vm14, %vm1283_vm13  ;;  %vm1292_vm1 = vweird.f32 %v1135_v20 }
 0x2a2   : > { %v1275_v10 = vsel %vm1274_vm12, %v4888_v47, %v1271_v17  ;;  %v1278_v25 = vmul.f32 %v4890_v45, %v1277_v24  ;;  %2024 = vmatpush.msra.mxu3 %v6031_v38  ;;  %v1915_v47 = vld [vmem:[#allocation8 + $0x28] sm:$0xff] }
 0x2a3   : > { %4576 = vmatmul.msk.f32.gmra.mxu3 %vm1296_vm2, %v1275_v10  ;;  %v1439_v35 = vmul.f32 %v1423_v33, %v1275_v10 }
 0x2a4   : > { %v1279_v9 = vmul.f32 0.5, %v1278_v25  ;;  %2025 = vmatpush.msra.mxu3 %v6039_v40 }
 0x2a6   : > { %v1280_v36 = vsub.f32 1.5, %v1279_v9  ;;  %2026 = vmatpush.msra.mxu3 %v6044_v41 }
 0x2a7   : > { %v4892_v34 = vpop.eup %4891 }
 0x2a8   : > { %v1287_v37 = vmul.f32 %v4892_v34, %v1135_v20  ;;  %v1281_v55 = vmul.f32 %v4890_v45, %v1280_v36  ;;  %2027 = vmatpush.msra.mxu3 %v6051_v42  ;;  %vm1293_vm0 = vweird.f32 %v4892_v34 }
 0x2a9   : > { %vm1294_vm3 = vmor %vm1292_vm1, %vm1293_vm0 }
 0x2aa   : > { %v1285_v38 = vsel %vm1284_vm15, %v4890_v45, %v1281_v55  ;;  %v1288_v59 = vmul.f32 %v4892_v34, %v1287_v37  ;;  %2028 = vmatpush.msra.mxu3 %v6058_v44 }
 0x2ab   : > { %4577 = vmatmul.msk.f32.gmra.mxu3 %vm1296_vm2, %v1285_v38  ;;  %v1440_v40 = vmul.f32 %v1424_v61, %v1285_v38 }
 0x2ac   : > { %v1289_v26 = vmul.f32 0.5, %v1288_v59 }
 0x2ae   : > { %v1290_v7 = vsub.f32 1.5, %v1289_v26 }
 0x2b0   : > { %v1291_v41 = vmul.f32 %v4892_v34, %v1290_v7 }
 0x2b2   : > { %v1295_v16 = vsel %vm1294_vm3, %v4892_v34, %v1291_v41 }
 0x2b3   : > { %4578 = vmatmul.msk.f32.gmra.mxu3 %vm1296_vm2, %v1295_v16  ;;  %v1441_v42 = vmul.f32 %v1425_v53, %v1295_v16 }
 0x2b8   : > { %v1362_v18 = vpop.f32.mrf.mxu0 }
 0x2b9   : > { %v1558_v49 = vmul.f32 %v1362_v18, %v6067_v50 }
 0x2bb   : > { %4579 = vmatmul.msk.f32.vlgmr.msrb.gmra.mxu3 %vm1296_vm2, %v6186_v19  ;;  %v1925_v19 = vld [vmem:[#allocation8 + $0x78] sm:$0xff] }
 0x2bc   : > { %1932 = vmatpush.msrb.mxu2 %v1925_v19 }
 0x2c0   : > { %v1365_v43 = vpop.f32.mrf.mxu0 }
 0x2c1   : > { %v1559_v20 = vmul.f32 %v1365_v43, %v6070_v52 }
 0x2c3   : > { %4580 = vmatmul.msk.f32.gmra.mxu3 %vm1296_vm2, %v6194_v14  ;;  %v1924_v14 = vld [vmem:[#allocation8 + $0x70] sm:$0xff] }
 0x2c4   : > { %1933 = vmatpush.msrb.mxu2 %v1924_v14 }
 0x2c8   : > { %v1368_v33 = vpop.f32.mrf.mxu0 }
 0x2c9   : > { %v1560_v9 = vmul.f32 %v1368_v33, %v6073_v54 }
 0x2cb   : > { %4581 = vmatmul.msk.f32.gmra.mxu3 %vm1296_vm2, %v6203_v12 }
 0x2d0   : > { %v1371_v38 = vpop.f32.mrf.mxu0 }
 0x2d1   : > { %v1561_v7 = vmul.f32 %v1371_v38, %v6076_v56 }
 0x2d3   : > { %4582 = vmatmul.msk.f32.gmra.mxu3 %vm1296_vm2, %v6212_v3  ;;  %v1923_v3 = vld [vmem:[#allocation8 + $0x68] sm:$0xff] }
 0x2d4   : > { %1934 = vmatpush.msrb.mxu2 %v1923_v3 }
 0x2db   : > { %4583 = vmatmul.msk.f32.gmra.mxu3 %vm1296_vm2, %v6221_v8  ;;  %v1922_v8 = vld [vmem:[#allocation8 + $0x60] sm:$0xff] }
 0x2dc   : > { %1935 = vmatpush.msrb.mxu2 %v1922_v8 }
 0x2de   : > { %v1374_v37 = vpop.f32.mrf.mxu2 }
 0x2e3   : > { %4584 = vmatmul.msk.f32.gmra.mxu3 %vm1296_vm2, %v6230_v48  ;;  %v1921_v48 = vld [vmem:[#allocation8 + $0x58] sm:$0xff] }
 0x2e4   : > { %1936 = vmatpush.msrb.mxu2 %v1921_v48 }
 0x2eb   : > { %4585 = vmatmul.msk.f32.gmra.mxu3 %vm1296_vm2, %v6239_v15 }
 0x2f3   : > { %4586 = vmatmul.msk.f32.gmra.mxu3 %vm1296_vm2, %v6248_v29 }
 0x2fb   : > { %4587 = vmatmul.msk.f32.gmra.mxu3 %vm1296_vm2, %v6257_v63  ;;  %v1920_v63 = vld [vmem:[#allocation8 + $0x50] sm:$0xff] }
 0x2fc   : > { %1937 = vmatpush.msrb.mxu2 %v1920_v63  ;;  %v1377_v63 = vpop.f32.mrf.mxu2 }
 0x303   : > { %4588 = vmatmul.msk.f32.gmra.mxu3 %vm1296_vm2, %v6266_v21  ;;  %v1919_v21 = vld [vmem:[#allocation8 + $0x48] sm:$0xff] }
 0x304   : > { %1938 = vmatpush.msrb.mxu2 %v1919_v21  ;;  %v1380_v33 = vpop.f32.mrf.mxu2 }
 0x306   : > { %1939 = vmatpush.msrb.mxu2 %v1918_v46 }
 0x30b   : > { %4589 = vmatmul.msk.f32.gmra.mxu3 %vm1296_vm2, %v6275_v51 }
 0x30e   : > { %v6339_v44 = vpop.f32.mrf.mxu3 }
 0x313   : > { %4590 = vmatmul.msk.f32.gmra.mxu3 %vm1296_vm2, %v6288_v39  ;;  %v1917_v39 = vld [vmem:[#allocation8 + $0x38] sm:$0xff] }
 0x314   : > { %1940 = vmatpush.msrb.mxu2 %v1917_v39 }
 0x316   : > { %v6343_v12 = vpop.f32.mrf.mxu3  ;;  %1941 = vmatpush.msrb.mxu2 %v1916_v27 }
 0x318   : > { %1942 = vmatpush.msrb.mxu2 %v1915_v47 }
 0x31a   : > { %1943 = vmatpush.msrb.mxu2 %v1914_v22  ;;  %v1562_v22 = vmul.f32 %v1374_v37, %v6079_v58 }
 0x31b   : > { %4591 = vmatmul.msk.f32.gmra.mxu3 %vm1296_vm2, %v6301_v1  ;;  %v1910_v1 = vld [vmem:[#allocation8] sm:$0xff] }
 0x31c   : > { %1944 = vmatpush.msrb.mxu2 %v1913_v5 }
 0x31e   : > { %v6347_v15 = vpop.f32.mrf.mxu3  ;;  %1945 = vmatpush.msrb.mxu2 %v1912_v11 }
 0x320   : > { %1946 = vmatpush.msrb.mxu2 %v1911_v13 }
 0x322   : > { %1947 = vmatpush.msrb.mxu2 %v1910_v1 }
 0x323   : > { %4592 = vmatmul.msk.f32.gmra.mxu3 %vm1296_vm2, %v1439_v35 }
 0x326   : > { %v6350_v29 = vpop.f32.mrf.mxu3 }
 0x32b   : > { %4593 = vmatmul.msk.f32.gmra.mxu3 %vm1296_vm2, %v1440_v40 }
 0x32e   : > { %v6353_v51 = vpop.f32.mrf.mxu3 }
 0x333   : > { %4594 = vmatmul.msk.f32.gmra.mxu3 %vm1296_vm2, %v1441_v42 }
 0x336   : > { %v6356_v28 = vpop.f32.mrf.mxu3 }
 0x33e   : > { %v1510_v23 = vpop.f32.mrf.mxu3 }
 0x33f   : > { %v1511_v31 = vadd.f32 %v6358_v30, %v1510_v23 }
 0x341   : > { %v1574_v32 = vadd.f32 %v1558_v49, %v1511_v31 }
 0x343   : > { %v4595_v57 = vmul.f32 -1.442695, %v1574_v32 }
 0x345   : > { %4893 = vpow2.f32 %v4595_v57 }
 0x346   : > { %v1513_v45 = vpop.f32.mrf.mxu3 }
 0x347   : > { %v1514_v24 = vadd.f32 %v6358_v30, %v1513_v45 }
 0x349   : > { %v6364_v17 = vadd.f32 %v1559_v20, %v1514_v24 }
 0x34b   : > { %v4894_v10 = vpop.eup %4893  ;;  %v4596_v25 = vmul.f32 -1.442695, %v6364_v17 }
 0x34c   : > { %v1638_v50 = vadd.f32 1.0, %v4894_v10 }
 0x34d   : > { %4895 = vpow2.f32 %v4596_v25 }
 0x34e   : > { %4897 = vrcp.f32 %v1638_v50  ;;  %v1516_v35 = vpop.f32.mrf.mxu3  ;;  %v1665_v53 = vand.u32 2147483648, %v1638_v50  ;;  %v1663_v42 = vand.u32 2147483647, %v1638_v50  ;;  %vm1659_vm5 = vweird.f32 %v1638_v50 }
 0x34f   : > { %v1517_v36 = vadd.f32 %v6358_v30, %v1516_v35 }
 0x350   : > { %v1666_v21 = vor.u32 1.1754944e-38, %v1665_v53  ;;  %vm1664_vm7 = vcmp.eq.f32.partialorder %v1663_v42, 8.507059e+37 }
 0x351   : > { %v6369_v34 = vadd.f32 %v1560_v9, %v1517_v36 }
 0x353   : > { %v4896_v52 = vpop.eup %4895  ;;  %v4597_v55 = vmul.f32 -1.442695, %v6369_v34 }
 0x354   : > { %v4898_v61 = vpop.eup %4897  ;;  %v1639_v59 = vadd.f32 1.0, %v4896_v52 }
 0x355   : > { %v1655_v40 = vmul.f32 %v4898_v61, %v1638_v50  ;;  %4899 = vpow2.f32 %v4597_v55  ;;  %vm1660_vm4 = vweird.f32 %v4898_v61  ;;  %v1563_v50 = vmul.f32 %v1377_v63, %v6082_v60 }
 0x356   : > { %v1519_v26 = vpop.f32.mrf.mxu3  ;;  %4901 = vrcp.f32 %v1639_v59  ;;  %vm1661_vm6 = vmor %vm1659_vm5, %vm1660_vm4  ;;  %v1680_v13 = vand.u32 2147483648, %v1639_v59  ;;  %v1678_v49 = vand.u32 2147483647, %v1639_v59  ;;  %vm1674_vm9 = vweird.f32 %v1639_v59 }
 0x357   : > { %v1520_v41 = vadd.f32 %v6358_v30, %v1519_v26  ;;  %v1656_v54 = vsub.f32 1.0, %v1655_v40 }
 0x358   : > { %v1681_v20 = vor.u32 1.1754944e-38, %v1680_v13  ;;  %vm1679_vm11 = vcmp.eq.f32.partialorder %v1678_v49, 8.507059e+37 }
 0x359   : > { %v1657_v16 = vmul.f32 %v4898_v61, %v1656_v54  ;;  %v6374_v19 = vadd.f32 %v1561_v7, %v1520_v41 }
 0x35b   : > { %v4900_v14 = vpop.eup %4899  ;;  %v1658_v3 = vadd.f32 %v4898_v61, %v1657_v16  ;;  %v4598_v8 = vmul.f32 -1.442695, %v6374_v19  ;;  %v1564_v16 = vmul.f32 %v1380_v33, %v6085_v62 }
 0x35c   : > { %v4902_v48 = vpop.eup %4901  ;;  %v1640_v46 = vadd.f32 1.0, %v4900_v14 }
 0x35d   : > { %v1662_v56 = vsel %vm1661_vm6, %v4898_v61, %v1658_v3  ;;  %v1670_v39 = vmul.f32 %v4902_v48, %v1639_v59  ;;  %4903 = vpow2.f32 %v4598_v8  ;;  %vm1675_vm8 = vweird.f32 %v4902_v48  ;;  %v1383_v8 = vpop.f32.mrf.mxu2 }
 0x35e   : > { %v1522_v27 = vpop.f32.mrf.mxu3  ;;  %v1667_v47 = vsel %vm1664_vm7, %v1666_v21, %v1662_v56  ;;  %4905 = vrcp.f32 %v1640_v46  ;;  %vm1676_vm10 = vmor %vm1674_vm9, %vm1675_vm8  ;;  %v1695_v37 = vand.u32 2147483648, %v1640_v46  ;;  %v1693_v55 = vand.u32 2147483647, %v1640_v46 }
 0x35f   : > { %v1523_v18 = vadd.f32 %v6358_v30, %v1522_v27  ;;  %v1894_v5 = vmul.f32 %v1667_v47, %v1574_v32  ;;  %v1671_v11 = vsub.f32 1.0, %v1670_v39  ;;  %vm1689_vm13 = vweird.f32 %v1640_v46 }
 0x360   : > { %v1696_v60 = vor.u32 1.1754944e-38, %v1695_v37  ;;  %vm1694_vm15 = vcmp.eq.f32.partialorder %v1693_v55, 8.507059e+37  ;;  %v1565_v13 = vmul.f32 %v1383_v8, %v6088_v0 }
 0x361   : > { %1948 = vmatmul.f32.vlgmr.msrb.gmra.mxu2 %v1894_v5  ;;  %v1672_v23 = vmul.f32 %v4902_v48, %v1671_v11  ;;  %v6379_v31 = vadd.f32 %v1562_v22, %v1523_v18 }
 0x363   : > { %v4904_v1 = vpop.eup %4903  ;;  %v1673_v43 = vadd.f32 %v4902_v48, %v1672_v23  ;;  %v4599_v57 = vmul.f32 -1.442695, %v6379_v31 }
 0x364   : > { %v4906_v45 = vpop.eup %4905  ;;  %v1641_v58 = vadd.f32 1.0, %v4904_v1 }
 0x365   : > { %v1677_v24 = vsel %vm1676_vm10, %v4902_v48, %v1673_v43  ;;  %v1685_v32 = vmul.f32 %v4906_v45, %v1640_v46  ;;  %4907 = vpow2.f32 %v4599_v57  ;;  %vm1690_vm12 = vweird.f32 %v4906_v45 }
 0x366   : > { %v1525_v10 = vpop.f32.mrf.mxu3  ;;  %v1682_v25 = vsel %vm1679_vm11, %v1681_v20, %v1677_v24  ;;  %4909 = vrcp.f32 %v1641_v58  ;;  %vm1691_vm14 = vmor %vm1689_vm13, %vm1690_vm12  ;;  %v1710_v48 = vand.u32 2147483648, %v1641_v58  ;;  %v1708_v21 = vand.u32 2147483647, %v1641_v58 }
 0x367   : > { %v1526_v35 = vadd.f32 %v6358_v30, %v1525_v10  ;;  %v1895_v9 = vmul.f32 %v1682_v25, %v6364_v17  ;;  %v1686_v36 = vsub.f32 1.0, %v1685_v32  ;;  %vm1704_vm1 = vweird.f32 %v1641_v58 }
 0x368   : > { %v1711_v62 = vor.u32 1.1754944e-38, %v1710_v48  ;;  %vm1709_vm4 = vcmp.eq.f32.partialorder %v1708_v21, 8.507059e+37 }
 0x369   : > { %1951 = vmatmul.f32.gmra.mxu2 %v1895_v9  ;;  %v1687_v52 = vmul.f32 %v4906_v45, %v1686_v36  ;;  %v6385_v61 = vadd.f32 %v1563_v50, %v1526_v35 }
 0x36b   : > { %v4908_v38 = vpop.eup %4907  ;;  %v1688_v59 = vadd.f32 %v4906_v45, %v1687_v52  ;;  %v4600_v40 = vmul.f32 -1.442695, %v6385_v61 }
 0x36c   : > { %v4910_v26 = vpop.eup %4909  ;;  %v1642_v7 = vadd.f32 1.0, %v4908_v38 }
 0x36d   : > { %v1692_v41 = vsel %vm1691_vm14, %v4906_v45, %v1688_v59  ;;  %v1700_v17 = vmul.f32 %v4910_v26, %v1641_v58  ;;  %4911 = vpow2.f32 %v4600_v40  ;;  %vm1705_vm0 = vweird.f32 %v4910_v26  ;;  %v1386_v58 = vpop.f32.mrf.mxu2 }
 0x36e   : > { %v1528_v54 = vpop.f32.mrf.mxu3  ;;  %v1697_v53 = vsel %vm1694_vm15, %v1696_v60, %v1692_v41  ;;  %4913 = vrcp.f32 %v1642_v7  ;;  %vm1706_vm3 = vmor %vm1704_vm1, %vm1705_vm0  ;;  %v1725_v43 = vand.u32 2147483648, %v1642_v7  ;;  %v1723_v45 = vand.u32 2147483647, %v1642_v7 }
 0x36f   : > { %v1529_v42 = vadd.f32 %v6358_v30, %v1528_v54  ;;  %v1896_v14 = vmul.f32 %v1697_v53, %v6369_v34  ;;  %v1701_v3 = vsub.f32 1.0, %v1700_v17  ;;  %vm1719_vm6 = vweird.f32 %v1642_v7 }
 0x370   : > { %v1726_v0 = vor.u32 1.1754944e-38, %v1725_v43  ;;  %vm1724_vm8 = vcmp.eq.f32.partialorder %v1723_v45, 8.507059e+37  ;;  %v1566_v36 = vmul.f32 %v1386_v58, %v6091_v2 }
 0x371   : > { %1954 = vmatmul.f32.gmra.mxu2 %v1896_v14  ;;  %v1702_v63 = vmul.f32 %v4910_v26, %v1701_v3  ;;  %v6391_v46 = vadd.f32 %v1564_v16, %v1529_v42 }
 0x373   : > { %v4912_v56 = vpop.eup %4911  ;;  %v1703_v39 = vadd.f32 %v4910_v26, %v1702_v63  ;;  %v4601_v27 = vmul.f32 -1.442695, %v6391_v46 }
 0x374   : > { %v4914_v47 = vpop.eup %4913  ;;  %v1643_v22 = vadd.f32 1.0, %v4912_v56 }
 0x375   : > { %v1707_v18 = vsel %vm1706_vm3, %v4910_v26, %v1703_v39  ;;  %v1715_v34 = vmul.f32 %v4914_v47, %v1642_v7  ;;  %4915 = vpow2.f32 %v4601_v27  ;;  %vm1720_vm5 = vweird.f32 %v4914_v47  ;;  %v1389_v54 = vpop.f32.mrf.mxu2 }
 0x376   : > { %v1531_v5 = vpop.f32.mrf.mxu3  ;;  %v1712_v11 = vsel %vm1709_vm4, %v1711_v62, %v1707_v18  ;;  %4917 = vrcp.f32 %v1643_v22  ;;  %vm1721_vm7 = vmor %vm1719_vm6, %vm1720_vm5  ;;  %v1740_v38 = vand.u32 2147483648, %v1643_v22  ;;  %v1738_v40 = vand.u32 2147483647, %v1643_v22 }
 0x377   : > { %v1532_v23 = vadd.f32 %v6358_v30, %v1531_v5  ;;  %v1897_v49 = vmul.f32 %v1712_v11, %v6374_v19  ;;  %v1716_v1 = vsub.f32 1.0, %v1715_v34  ;;  %vm1734_vm10 = vweird.f32 %v1643_v22 }
 0x378   : > { %v1741_v2 = vor.u32 1.1754944e-38, %v1740_v38  ;;  %vm1739_vm12 = vcmp.eq.f32.partialorder %v1738_v40, 8.507059e+37  ;;  %v1567_v3 = vmul.f32 %v1389_v54, %v6094_v4 }
 0x379   : > { %1957 = vmatmul.f32.gmra.mxu2 %v1897_v49  ;;  %v1717_v57 = vmul.f32 %v4914_v47, %v1716_v1  ;;  %v6397_v20 = vadd.f32 %v1565_v13, %v1532_v23  ;;  %v1568_v23 = vmul.f32 %v6339_v44, %v6097_v6 }
 0x37b   : > { %v4916_v24 = vpop.eup %4915  ;;  %v1718_v32 = vadd.f32 %v4914_v47, %v1717_v57  ;;  %v4602_v33 = vmul.f32 -1.442695, %v6397_v20 }
 0x37c   : > { %v4918_v10 = vpop.eup %4917  ;;  %v1644_v25 = vadd.f32 1.0, %v4916_v24 }
 0x37d   : > { %v1722_v50 = vsel %vm1721_vm7, %v4914_v47, %v1718_v32  ;;  %v1730_v19 = vmul.f32 %v4918_v10, %v1643_v22  ;;  %4919 = vpow2.f32 %v4602_v33  ;;  %vm1735_vm9 = vweird.f32 %v4918_v10 }
 0x37e   : > { %v1534_v35 = vpop.f32.mrf.mxu3  ;;  %v1727_v9 = vsel %vm1724_vm8, %v1726_v0, %v1722_v50  ;;  %4921 = vrcp.f32 %v1644_v25  ;;  %vm1736_vm11 = vmor %vm1734_vm10, %vm1735_vm9  ;;  %v1755_v21 = vand.u32 2147483648, %v1644_v25  ;;  %v1753_v39 = vand.u32 2147483647, %v1644_v25 }
 0x37f   : > { %v1535_v37 = vadd.f32 %v6358_v30, %v1534_v35  ;;  %v1898_v52 = vmul.f32 %v1727_v9, %v6379_v31  ;;  %v1731_v55 = vsub.f32 1.0, %v1730_v19  ;;  %vm1749_vm14 = vweird.f32 %v1644_v25  ;;  %v7636_v35 = vld [vmem:[#allocation30_spill] sm:$0xff] }
 0x380   : > { %v1756_v4 = vor.u32 1.1754944e-38, %v1755_v21  ;;  %vm1754_vm0 = vcmp.eq.f32.partialorder %v1753_v39, 8.507059e+37  ;;  %v1569_v9 = vmul.f32 %v6343_v12, %v7636_v35 }
 0x381   : > { %1960 = vmatmul.f32.gmra.mxu2 %v1898_v52  ;;  %v1732_v59 = vmul.f32 %v4918_v10, %v1731_v55  ;;  %v6403_v26 = vadd.f32 %v1566_v36, %v1535_v37 }
 0x383   : > { %v4920_v60 = vpop.eup %4919  ;;  %v1733_v7 = vadd.f32 %v4918_v10, %v1732_v59  ;;  %v4603_v41 = vmul.f32 -1.442695, %v6403_v26 }
 0x384   : > { %v4922_v17 = vpop.eup %4921  ;;  %v1645_v53 = vadd.f32 1.0, %v4920_v60 }
 0x385   : > { %v1737_v16 = vsel %vm1736_vm11, %v4918_v10, %v1733_v7  ;;  %v1745_v31 = vmul.f32 %v4922_v17, %v1644_v25  ;;  %4923 = vpow2.f32 %v4603_v41  ;;  %vm1750_vm13 = vweird.f32 %v4922_v17 }
 0x386   : > { %v1537_v42 = vpop.f32.mrf.mxu3  ;;  %v1742_v14 = vsel %vm1739_vm12, %v1741_v2, %v1737_v16  ;;  %4925 = vrcp.f32 %v1645_v53  ;;  %vm1751_vm15 = vmor %vm1749_vm14, %vm1750_vm13  ;;  %v1770_v57 = vand.u32 2147483648, %v1645_v53  ;;  %v1768_v58 = vand.u32 2147483647, %v1645_v53 }
 0x387   : > { %v1538_v8 = vadd.f32 %v6358_v30, %v1537_v42  ;;  %v1899_v48 = vmul.f32 %v1742_v14, %v6385_v61  ;;  %v1746_v63 = vsub.f32 1.0, %v1745_v31  ;;  %vm1764_vm3 = vweird.f32 %v1645_v53  ;;  %v7637_v31 = vld [vmem:[#allocation31_spill] sm:$0xff] }
 0x388   : > { %v1771_v6 = vor.u32 1.1754944e-38, %v1770_v57  ;;  %vm1769_vm5 = vcmp.eq.f32.partialorder %v1768_v58, 8.507059e+37  ;;  %v1570_v42 = vmul.f32 %v6347_v15, %v7637_v31 }
 0x389   : > { %1963 = vmatmul.f32.gmra.mxu2 %v1899_v48  ;;  %v1747_v56 = vmul.f32 %v4922_v17, %v1746_v63  ;;  %v6409_v27 = vadd.f32 %v1567_v3, %v1538_v8 }
 0x38b   : > { %v4924_v47 = vpop.eup %4923  ;;  %v1748_v62 = vadd.f32 %v4922_v17, %v1747_v56  ;;  %v4604_v22 = vmul.f32 -1.442695, %v6409_v27 }
 0x38c   : > { %v4926_v18 = vpop.eup %4925  ;;  %v1646_v34 = vadd.f32 1.0, %v4924_v47 }
 0x38d   : > { %v1752_v5 = vsel %vm1751_vm15, %v4922_v17, %v1748_v62  ;;  %v1760_v61 = vmul.f32 %v4926_v18, %v1645_v53  ;;  %4927 = vpow2.f32 %v4604_v22  ;;  %vm1765_vm1 = vweird.f32 %v4926_v18 }
 0x38e   : > { %v1540_v11 = vpop.f32.mrf.mxu3  ;;  %v1757_v13 = vsel %vm1754_vm0, %v1756_v4, %v1752_v5  ;;  %4929 = vrcp.f32 %v1646_v34  ;;  %vm1766_vm4 = vmor %vm1764_vm3, %vm1765_vm1  ;;  %v1785_v55 = vand.u32 2147483648, %v1646_v34  ;;  %v1783_v59 = vand.u32 2147483647, %v1646_v34 }
 0x38f   : > { %v1541_v49 = vadd.f32 %v6358_v30, %v1540_v11  ;;  %v1900_v1 = vmul.f32 %v1757_v13, %v6391_v46  ;;  %v1761_v43 = vsub.f32 1.0, %v1760_v61  ;;  %vm1779_vm7 = vweird.f32 %v1646_v34  ;;  %v7638_v61 = vld [vmem:[#allocation32_spill] sm:$0xff] }
 0x390   : > { %v1786_v12 = vor.u32 1.1754944e-38, %v1785_v55  ;;  %vm1784_vm9 = vcmp.eq.f32.partialorder %v1783_v59, 8.507059e+37  ;;  %v1571_v11 = vmul.f32 %v6350_v29, %v7638_v61 }
 0x391   : > { %1966 = vmatmul.f32.gmra.mxu2 %v1900_v1  ;;  %v1762_v45 = vmul.f32 %v4926_v18, %v1761_v43  ;;  %v6416_v24 = vadd.f32 %v1568_v23, %v1541_v49 }
 0x393   : > { %v4928_v32 = vpop.eup %4927  ;;  %v1763_v33 = vadd.f32 %v4926_v18, %v1762_v45  ;;  %v4605_v10 = vmul.f32 -1.442695, %v6416_v24 }
 0x394   : > { %v4930_v0 = vpop.eup %4929  ;;  %v1647_v44 = vadd.f32 1.0, %v4928_v32 }
 0x395   : > { %v1767_v25 = vsel %vm1766_vm4, %v4926_v18, %v1763_v33  ;;  %v1775_v46 = vmul.f32 %v4930_v0, %v1646_v34  ;;  %4931 = vpow2.f32 %v4605_v10  ;;  %vm1780_vm6 = vweird.f32 %v4930_v0 }
 0x396   : > { %v1543_v50 = vpop.f32.mrf.mxu3  ;;  %v1772_v19 = vsel %vm1769_vm5, %v1771_v6, %v1767_v25  ;;  %4933 = vrcp.f32 %v1647_v44  ;;  %vm1781_vm8 = vmor %vm1779_vm7, %vm1780_vm6  ;;  %v1800_v48 = vand.u32 2147483648, %v1647_v44  ;;  %v1798_v21 = vand.u32 2147483647, %v1647_v44 }
 0x397   : > { %v1544_v36 = vadd.f32 %v6358_v30, %v1543_v50  ;;  %v1901_v37 = vmul.f32 %v1772_v19, %v6397_v20  ;;  %v1776_v52 = vsub.f32 1.0, %v1775_v46  ;;  %vm1794_vm11 = vweird.f32 %v1647_v44  ;;  %v7639_v46 = vld [vmem:[#allocation33_spill] sm:$0xff] }
 0x398   : > { %v1801_v15 = vor.u32 1.1754944e-38, %v1800_v48  ;;  %vm1799_vm13 = vcmp.eq.f32.partialorder %v1798_v21, 8.507059e+37  ;;  %v1572_v50 = vmul.f32 %v6353_v51, %v7639_v46 }
 0x399   : > { %1969 = vmatmul.f32.gmra.mxu2 %v1901_v37  ;;  %v1777_v38 = vmul.f32 %v4930_v0, %v1776_v52  ;;  %v6423_v40 = vadd.f32 %v1569_v9, %v1544_v36 }
 0x39b   : > { %v4932_v60 = vpop.eup %4931  ;;  %v1778_v7 = vadd.f32 %v4930_v0, %v1777_v38  ;;  %v4606_v41 = vmul.f32 -1.442695, %v6423_v40 }
 0x39c   : > { %v4934_v17 = vpop.eup %4933  ;;  %v1648_v54 = vadd.f32 1.0, %v4932_v60 }
 0x39d   : > { %v1782_v2 = vsel %vm1781_vm8, %v4930_v0, %v1778_v7  ;;  %v1790_v20 = vmul.f32 %v4934_v17, %v1647_v44  ;;  %4935 = vpow2.f32 %v4606_v41  ;;  %vm1795_vm10 = vweird.f32 %v4934_v17 }
 0x39e   : > { %v1546_v53 = vpop.f32.mrf.mxu3  ;;  %v1787_v16 = vsel %vm1784_vm9, %v1786_v12, %v1782_v2  ;;  %4937 = vrcp.f32 %v1648_v54  ;;  %vm1796_vm12 = vmor %vm1794_vm11, %vm1795_vm10  ;;  %v1815_v1 = vand.u32 2147483648, %v1648_v54  ;;  %v1813_v57 = vand.u32 2147483647, %v1648_v54  ;;  %v7640_v2 = vld [vmem:[#allocation34_spill] sm:$0xff] }
 0x39f   : > { %v1547_v14 = vadd.f32 %v6358_v30, %v1546_v53  ;;  %v1902_v3 = vmul.f32 %v1787_v16, %v6403_v26  ;;  %v1791_v8 = vsub.f32 1.0, %v1790_v20  ;;  %vm1809_vm15 = vweird.f32 %v1648_v54 }
 0x3a0   : > { %v1816_v29 = vor.u32 1.1754944e-38, %v1815_v1  ;;  %vm1814_vm1 = vcmp.eq.f32.partialorder %v1813_v57, 8.507059e+37  ;;  %v1573_v20 = vmul.f32 %v6356_v28, %v7640_v2 }
 0x3a1   : > { %1972 = vmatmul.f32.gmra.mxu2 %v1902_v3  ;;  %v1792_v63 = vmul.f32 %v4934_v17, %v1791_v8  ;;  %v6430_v56 = vadd.f32 %v1570_v42, %v1547_v14 }
 0x3a3   : > { %v4936_v39 = vpop.eup %4935  ;;  %v1793_v47 = vadd.f32 %v4934_v17, %v1792_v63  ;;  %v4607_v62 = vmul.f32 -1.442695, %v6430_v56 }
 0x3a4   : > { %v4938_v22 = vpop.eup %4937  ;;  %v1649_v18 = vadd.f32 1.0, %v4936_v39 }
 0x3a5   : > { %v1797_v4 = vsel %vm1796_vm12, %v4934_v17, %v1793_v47  ;;  %v1805_v26 = vmul.f32 %v4938_v22, %v1648_v54  ;;  %4939 = vpow2.f32 %v4607_v62  ;;  %vm1810_vm14 = vweird.f32 %v4938_v22 }
 0x3a6   : > { %v1549_v34 = vpop.f32.mrf.mxu3  ;;  %v1802_v5 = vsel %vm1799_vm13, %v1801_v15, %v1797_v4  ;;  %4941 = vrcp.f32 %v1649_v18  ;;  %vm1811_vm0 = vmor %vm1809_vm15, %vm1810_vm14  ;;  %v1830_v36 = vand.u32 2147483648, %v1649_v18  ;;  %v1828_v52 = vand.u32 2147483647, %v1649_v18 }
 0x3a7   : > { %v1550_v13 = vadd.f32 %v6358_v30, %v1549_v34  ;;  %v1903_v23 = vmul.f32 %v1802_v5, %v6409_v27  ;;  %v1806_v49 = vsub.f32 1.0, %v1805_v26  ;;  %vm1824_vm4 = vweird.f32 %v1649_v18 }
 0x3a8   : > { %v1831_v51 = vor.u32 1.1754944e-38, %v1830_v36  ;;  %vm1829_vm6 = vcmp.eq.f32.partialorder %v1828_v52, 8.507059e+37  ;;  %v4855_v52 = vld [vmem:[#allocation10] ss:$0 sm:$0xff] }
 0x3a9   : > { %1975 = vmatmul.f32.gmra.mxu2 %v1903_v23  ;;  %v1807_v43 = vmul.f32 %v4938_v22, %v1806_v49  ;;  %v6437_v45 = vadd.f32 %v1571_v11, %v1550_v13 }
 0x3ab   : > { %v4940_v58 = vpop.eup %4939  ;;  %v1808_v32 = vadd.f32 %v4938_v22, %v1807_v43  ;;  %v4608_v33 = vmul.f32 -1.442695, %v6437_v45 }
 0x3ac   : > { %v4942_v10 = vpop.eup %4941  ;;  %v1650_v0 = vadd.f32 1.0, %v4940_v58 }
 0x3ad   : > { %v1812_v6 = vsel %vm1811_vm0, %v4938_v22, %v1808_v32  ;;  %v1820_v27 = vmul.f32 %v4942_v10, %v1649_v18  ;;  %4943 = vpow2.f32 %v4608_v33  ;;  %vm1825_vm3 = vweird.f32 %v4942_v10 }
 0x3ae   : > { %v1552_v44 = vpop.f32.mrf.mxu3  ;;  %v1817_v25 = vsel %vm1814_vm1, %v1816_v29, %v1812_v6  ;;  %4945 = vrcp.f32 %v1650_v0  ;;  %vm1826_vm5 = vmor %vm1824_vm4, %vm1825_vm3  ;;  %v1845_v42 = vand.u32 2147483648, %v1650_v0  ;;  %v1843_v3 = vand.u32 2147483647, %v1650_v0 }
 0x3af   : > { %v1553_v19 = vadd.f32 %v6358_v30, %v1552_v44  ;;  %v1904_v35 = vmul.f32 %v1817_v25, %v6416_v24  ;;  %v1821_v9 = vsub.f32 1.0, %v1820_v27  ;;  %vm1839_vm8 = vweird.f32 %v1650_v0 }
 0x3b0   : > { %v1846_v28 = vor.u32 1.1754944e-38, %v1845_v42  ;;  %vm1844_vm10 = vcmp.eq.f32.partialorder %v1843_v3, 8.507059e+37 }
 0x3b1   : > { %1978 = vmatmul.f32.gmra.mxu2 %v1904_v35  ;;  %v1822_v37 = vmul.f32 %v4942_v10, %v1821_v9  ;;  %v6444_v55 = vadd.f32 %v1572_v50, %v1553_v19 }
 0x3b3   : > { %v4944_v38 = vpop.eup %4943  ;;  %v1823_v59 = vadd.f32 %v4942_v10, %v1822_v37  ;;  %v4609_v60 = vmul.f32 -1.442695, %v6444_v55 }
 0x3b4   : > { %v4946_v7 = vpop.eup %4945  ;;  %v1651_v41 = vadd.f32 1.0, %v4944_v38 }
 0x3b5   : > { %v1827_v17 = vsel %vm1826_vm5, %v4942_v10, %v1823_v59  ;;  %v1835_v24 = vmul.f32 %v4946_v7, %v1650_v0  ;;  %4947 = vpow2.f32 %v4609_v60  ;;  %vm1840_vm7 = vweird.f32 %v4946_v7 }
 0x3b6   : > { %v1555_v12 = vpop.f32.mrf.mxu3  ;;  %v1832_v54 = vsel %vm1829_vm6, %v1831_v51, %v1827_v17  ;;  %4949 = vrcp.f32 %v1651_v41  ;;  %vm1841_vm9 = vmor %vm1839_vm8, %vm1840_vm7  ;;  %v1860_v18 = vand.u32 2147483648, %v1651_v41  ;;  %v1858_v26 = vand.u32 2147483647, %v1651_v41 }
 0x3b7   : > { %v1556_v53 = vadd.f32 %v6358_v30, %v1555_v12  ;;  %v1905_v16 = vmul.f32 %v1832_v54, %v6423_v40  ;;  %v1836_v31 = vsub.f32 1.0, %v1835_v24  ;;  %vm1854_vm12 = vweird.f32 %v1651_v41 }
 0x3b8   : > { %v1861_v11 = vor.u32 1.1754944e-38, %v1860_v18  ;;  %vm1859_vm14 = vcmp.eq.f32.partialorder %v1858_v26, 8.507059e+37 }
 0x3b9   : > { %1981 = vmatmul.f32.gmra.mxu2 %v1905_v16  ;;  %v1837_v14 = vmul.f32 %v4946_v7, %v1836_v31  ;;  %v6451_v8 = vadd.f32 %v1573_v20, %v1556_v53 }
 0x3bb   : > { %v4948_v48 = vpop.eup %4947  ;;  %v1838_v63 = vadd.f32 %v4946_v7, %v1837_v14  ;;  %v4610_v21 = vmul.f32 -1.442695, %v6451_v8 }
 0x3bc   : > { %v4950_v39 = vpop.eup %4949  ;;  %v1652_v47 = vadd.f32 1.0, %v4948_v48 }
 0x3bd   : > { %v1842_v30 = vsel %vm1841_vm9, %v4946_v7, %v1838_v63  ;;  %v1850_v40 = vmul.f32 %v4950_v39, %v1651_v41  ;;  %4951 = vpow2.f32 %v4610_v21  ;;  %vm1855_vm11 = vweird.f32 %v4950_v39 }
 0x3be   : > { %v1847_v62 = vsel %vm1844_vm10, %v1846_v28, %v1842_v30  ;;  %4953 = vrcp.f32 %v1652_v47  ;;  %vm1856_vm13 = vmor %vm1854_vm12, %vm1855_vm11  ;;  %v1875_v57 = vand.u32 2147483648, %v1652_v47  ;;  %v1873_v32 = vand.u32 2147483647, %v1652_v47 }
 0x3bf   : > { %v1906_v22 = vmul.f32 %v1847_v62, %v6430_v56  ;;  %v1851_v15 = vsub.f32 1.0, %v1850_v40  ;;  %vm1869_vm0 = vweird.f32 %v1652_v47 }
 0x3c0   : > { %v1876_v29 = vor.u32 1.1754944e-38, %v1875_v57  ;;  %vm1874_vm3 = vcmp.eq.f32.partialorder %v1873_v32, 8.507059e+37 }
 0x3c1   : > { %1984 = vmatmul.f32.gmra.mxu2 %v1906_v22  ;;  %v1852_v4 = vmul.f32 %v4950_v39, %v1851_v15 }
 0x3c3   : > { %v4952_v34 = vpop.eup %4951  ;;  %v1853_v5 = vadd.f32 %v4950_v39, %v1852_v4 }
 0x3c4   : > { %v4954_v61 = vpop.eup %4953  ;;  %v1653_v13 = vadd.f32 1.0, %v4952_v34 }
 0x3c5   : > { %v1857_v23 = vsel %vm1856_vm13, %v4950_v39, %v1853_v5  ;;  %v1865_v49 = vmul.f32 %v4954_v61, %v1652_v47  ;;  %vm1870_vm15 = vweird.f32 %v4954_v61 }
 0x3c6   : > { %v1862_v1 = vsel %vm1859_vm14, %v1861_v11, %v1857_v23  ;;  %4955 = vrcp.f32 %v1653_v13  ;;  %vm1871_vm1 = vmor %vm1869_vm0, %vm1870_vm15  ;;  %v1890_v46 = vand.u32 2147483648, %v1653_v13  ;;  %v1888_v50 = vand.u32 2147483647, %v1653_v13 }
 0x3c7   : > { %v1907_v56 = vmul.f32 %v1862_v1, %v6437_v45  ;;  %v1866_v43 = vsub.f32 1.0, %v1865_v49  ;;  %vm1884_vm5 = vweird.f32 %v1653_v13 }
 0x3c8   : > { %v1891_v35 = vor.u32 1.1754944e-38, %v1890_v46  ;;  %vm1889_vm7 = vcmp.eq.f32.partialorder %v1888_v50, 8.507059e+37  ;;  %v1927_v46 = vld [vmem:[#allocation11] sm:$0xff]  ;;  %v5150_v50 = vld [vmem:[%s7630_s25 + $0x70] sm:$0xff] }
 0x3c9   : > { %1987 = vmatmul.f32.gmra.mxu2 %v1907_v56  ;;  %v1867_v58 = vmul.f32 %v4954_v61, %v1866_v43  ;;  %2445 = vmatpush.msra.mxu0 %v1927_v46 }
 0x3ca   : > { %2593 = vmatpush.msra.mxu2 %v1927_v46 }
 0x3cb   : > { %v1868_v33 = vadd.f32 %v4954_v61, %v1867_v58 }
 0x3cc   : > { %v4956_v10 = vpop.eup %4955 }
 0x3cd   : > { %v1872_v0 = vsel %vm1871_vm1, %v4954_v61, %v1868_v33  ;;  %v1880_v6 = vmul.f32 %v4956_v10, %v1653_v13  ;;  %vm1885_vm4 = vweird.f32 %v4956_v10 }
 0x3ce   : > { %v1877_v27 = vsel %vm1874_vm3, %v1876_v29, %v1872_v0  ;;  %vm1886_vm6 = vmor %vm1884_vm5, %vm1885_vm4 }
 0x3cf   : > { %v1908_v44 = vmul.f32 %v1877_v27, %v6444_v55  ;;  %v1881_v25 = vsub.f32 1.0, %v1880_v6 }
 0x3d1   : > { %1990 = vmatmul.f32.gmra.mxu2 %v1908_v44  ;;  %v1882_v45 = vmul.f32 %v4956_v10, %v1881_v25 }
 0x3d3   : > { %v1883_v19 = vadd.f32 %v4956_v10, %v1882_v45  ;;  %v5149_v45 = vld [vmem:[%s7630_s25 + $0x78] sm:$0xff] }
 0x3d4   : > { %3231 = vmatpush.msrb.mxu2 %v5149_v45 }
 0x3d5   : > { %v1887_v9 = vsel %vm1886_vm6, %v4956_v10, %v1883_v19 }
 0x3d6   : > { %v1892_v36 = vsel %vm1889_vm7, %v1891_v35, %v1887_v9  ;;  %3232 = vmatpush.msrb.mxu2 %v5150_v50  ;;  %v5151_v35 = vld [vmem:[%s7630_s25 + $0x68] sm:$0xff] }
 0x3d7   : > { %v1909_v37 = vmul.f32 %v1892_v36, %v6451_v8  ;;  %v5152_v36 = vld [vmem:[%s7630_s25 + $0x60] sm:$0xff] }
 0x3d8   : > { %3233 = vmatpush.msrb.mxu2 %v5151_v35 }
 0x3d9   : > { %1993 = vmatmul.f32.gmra.mxu2 %v1909_v37  ;;  %v5153_v37 = vld [vmem:[%s7630_s25 + $0x58] sm:$0xff] }
 0x3da   : > { %3234 = vmatpush.msrb.mxu2 %v5152_v36 }
 0x3dc   : > { %3235 = vmatpush.msrb.mxu2 %v5153_v37 }
 0x3e4   : > { %v1949_v38 = vpop.f32.mrf.mxu2 }
 0x3e5   : > { %v6458_v59 = vadd.f32 %v4855_v52, %v1949_v38 }
 0x3e7   : > { %2029 = vmatmul.f32.vlgmr.msra.gmra.mxu3 %v6458_v59  ;;  %v1997_v4 = vmul.f32 %v6458_v59, %v6458_v59 }
 0x3ec   : > { %v1952_v55 = vpop.f32.mrf.mxu2 }
 0x3ed   : > { %v6461_v60 = vadd.f32 %v4855_v52, %v1952_v55  ;;  %v5155_v55 = vld [vmem:[%s7630_s25 + $0x48] sm:$0xff] }
 0x3ef   : > { %2032 = vmatmul.f32.gmra.mxu3 %v6461_v60  ;;  %v1998_v34 = vmul.f32 %v6461_v60, %v6461_v60 }
 0x3f4   : > { %v1955_v7 = vpop.f32.mrf.mxu2 }
 0x3f5   : > { %v6464_v51 = vadd.f32 %v4855_v52, %v1955_v7 }
 0x3f7   : > { %2035 = vmatmul.f32.gmra.mxu3 %v6464_v51  ;;  %v1999_v61 = vmul.f32 %v6464_v51, %v6464_v51 }
 0x3fc   : > { %v1958_v41 = vpop.f32.mrf.mxu2 }
 0x3fd   : > { %v6467_v17 = vadd.f32 %v4855_v52, %v1958_v41  ;;  %v5156_v41 = vld [vmem:[%s7630_s25 + $0x40] sm:$0xff] }
 0x3ff   : > { %2038 = vmatmul.f32.gmra.mxu3 %v6467_v17  ;;  %v2000_v13 = vmul.f32 %v6467_v17, %v6467_v17 }
 0x404   : > { %v1961_v24 = vpop.f32.mrf.mxu2 }
 0x405   : > { %v6470_v12 = vadd.f32 %v4855_v52, %v1961_v24  ;;  %v5157_v24 = vld [vmem:[%s7630_s25 + $0x38] sm:$0xff] }
 0x407   : > { %2041 = vmatmul.f32.gmra.mxu3 %v6470_v12  ;;  %v2001_v49 = vmul.f32 %v6470_v12, %v6470_v12 }
 0x40c   : > { %v1964_v54 = vpop.f32.mrf.mxu2 }
 0x40d   : > { %v6473_v2 = vadd.f32 %v4855_v52, %v1964_v54  ;;  %v5158_v54 = vld [vmem:[%s7630_s25 + $0x30] sm:$0xff] }
 0x40f   : > { %2044 = vmatmul.f32.gmra.mxu3 %v6473_v2  ;;  %v2002_v56 = vmul.f32 %v6473_v2, %v6473_v2 }
 0x414   : > { %v1967_v20 = vpop.f32.mrf.mxu2 }
 0x415   : > { %v6476_v53 = vadd.f32 %v4855_v52, %v1967_v20 }
 0x417   : > { %2047 = vmatmul.f32.gmra.mxu3 %v6476_v53  ;;  %v2003_v57 = vmul.f32 %v6476_v53, %v6476_v53 }
 0x41c   : > { %v1970_v16 = vpop.f32.mrf.mxu2 }
 0x41d   : > { %v6479_v31 = vadd.f32 %v4855_v52, %v1970_v16  ;;  %v5159_v16 = vld [vmem:[%s7630_s25 + $0x28] sm:$0xff] }
 0x41f   : > { %2050 = vmatmul.f32.gmra.mxu3 %v6479_v31  ;;  %v2004_v32 = vmul.f32 %v6479_v31, %v6479_v31 }
 0x424   : > { %v1973_v42 = vpop.f32.mrf.mxu2 }
 0x425   : > { %v6482_v14 = vadd.f32 %v4855_v52, %v1973_v42 }
 0x427   : > { %2053 = vmatmul.f32.gmra.mxu3 %v6482_v14  ;;  %v2005_v10 = vmul.f32 %v6482_v14, %v6482_v14 }
 0x42c   : > { %v1976_v3 = vpop.f32.mrf.mxu2 }
 0x42d   : > { %v6485_v8 = vadd.f32 %v4855_v52, %v1976_v3  ;;  %v5160_v3 = vld [vmem:[%s7630_s25 + $0x20] sm:$0xff] }
 0x42f   : > { %2056 = vmatmul.f32.gmra.mxu3 %v6485_v8  ;;  %v2006_v0 = vmul.f32 %v6485_v8, %v6485_v8 }
 0x434   : > { %v1979_v48 = vpop.f32.mrf.mxu2 }
 0x435   : > { %v6488_v63 = vadd.f32 %v4855_v52, %v1979_v48  ;;  %v5161_v48 = vld [vmem:[%s7630_s25 + $0x18] sm:$0xff] }
 0x437   : > { %2059 = vmatmul.f32.gmra.mxu3 %v6488_v63  ;;  %v2007_v27 = vmul.f32 %v6488_v63, %v6488_v63 }
 0x43c   : > { %v1982_v21 = vpop.f32.mrf.mxu2 }
 0x43d   : > { %v6491_v39 = vadd.f32 %v4855_v52, %v1982_v21  ;;  %v5162_v21 = vld [vmem:[%s7630_s25 + $0x10] sm:$0xff] }
 0x43f   : > { %2062 = vmatmul.f32.gmra.mxu3 %v6491_v39  ;;  %v2008_v25 = vmul.f32 %v6491_v39, %v6491_v39 }
 0x444   : > { %v1985_v28 = vpop.f32.mrf.mxu2 }
 0x445   : > { %v6494_v47 = vadd.f32 %v4855_v52, %v1985_v28 }
 0x447   : > { %2065 = vmatmul.f32.gmra.mxu3 %v6494_v47  ;;  %v2009_v9 = vmul.f32 %v6494_v47, %v6494_v47 }
 0x44c   : > { %v1988_v30 = vpop.f32.mrf.mxu2 }
 0x44d   : > { %v6497_v40 = vadd.f32 %v4855_v52, %v1988_v30  ;;  %v5163_v30 = vld [vmem:[%s7630_s25 + $0x8] sm:$0xff] }
 0x44f   : > { %2068 = vmatmul.f32.gmra.mxu3 %v6497_v40  ;;  %v2010_v7 = vmul.f32 %v6497_v40, %v6497_v40 }
 0x454   : > { %v1991_v62 = vpop.f32.mrf.mxu2 }
 0x455   : > { %v6500_v22 = vadd.f32 %v4855_v52, %v1991_v62 }
 0x457   : > { %2071 = vmatmul.f32.gmra.mxu3 %v6500_v22  ;;  %v2011_v42 = vmul.f32 %v6500_v22, %v6500_v22 }
 0x45c   : > { %v1994_v15 = vpop.f32.mrf.mxu2 }
 0x45d   : > { %v6503_v18 = vadd.f32 %v4855_v52, %v1994_v15  ;;  %v5154_v52 = vld [vmem:[%s7630_s25 + $0x50] sm:$0xff]  ;;  %v5164_v15 = vld [vmem:[%s7630_s25] sm:$0xff] }
 0x45e   : > { %3236 = vmatpush.msrb.mxu2 %v5154_v52  ;;  %v3025_v52 = vld [vmem:[#allocation16 + $0x70] sm:$0xff] }
 0x45f   : > { %2074 = vmatmul.f32.gmra.mxu3 %v6503_v18  ;;  %v2012_v62 = vmul.f32 %v6503_v18, %v6503_v18 }
 0x460   : > { %3237 = vmatpush.msrb.mxu2 %v5155_v55 }
 0x462   : > { %3238 = vmatpush.msrb.mxu2 %v5156_v41 }
 0x464   : > { %3239 = vmatpush.msrb.mxu2 %v5157_v24 }
 0x466   : > { %3240 = vmatpush.msrb.mxu2 %v5158_v54 }
 0x467   : > { %2077 = vmatmul.f32.gmra.mxu3 %v1997_v4 }
 0x468   : > { %3241 = vmatpush.msrb.mxu2 %v5159_v16 }
 0x46a   : > { %v6508_v26 = vpop.f32.mrf.mxu3  ;;  %3242 = vmatpush.msrb.mxu2 %v5160_v3 }
 0x46c   : > { %3243 = vmatpush.msrb.mxu2 %v5161_v48 }
 0x46e   : > { %3244 = vmatpush.msrb.mxu2 %v5162_v21 }
 0x46f   : > { %2080 = vmatmul.f32.gmra.mxu3 %v1998_v34  ;;  %v2126_v34 = vmul.f32 0.125, %v6508_v26 }
 0x470   : > { %3245 = vmatpush.msrb.mxu2 %v5163_v30 }
 0x472   : > { %v6512_v5 = vpop.f32.mrf.mxu3  ;;  %3246 = vmatpush.msrb.mxu2 %v5164_v15  ;;  %v3024_v15 = vld [vmem:[#allocation16 + $0x68] sm:$0xff] }
 0x477   : > { %2083 = vmatmul.f32.gmra.mxu3 %v1999_v61 }
 0x47a   : > { %v6516_v11 = vpop.f32.mrf.mxu3 }
 0x47b   : > { %v6625_v50 = vmul.f32 0.125, %v6516_v11 }
 0x47d   : > { %v2160_v55 = vmul.f32 %v6625_v50, %v6625_v50 }
 0x47f   : > { %2086 = vmatmul.f32.gmra.mxu3 %v2000_v13  ;;  %v2158_v13 = vmul.f32 %v2126_v34, %v2126_v34 }
 0x482   : > { %v6520_v23 = vpop.f32.mrf.mxu3 }
 0x483   : > { %v6630_v16 = vmul.f32 0.125, %v6520_v23 }
 0x487   : > { %2089 = vmatmul.f32.gmra.mxu3 %v2001_v49 }
 0x48a   : > { %v6524_v1 = vpop.f32.mrf.mxu3 }
 0x48f   : > { %2092 = vmatmul.f32.gmra.mxu3 %v2002_v56 }
 0x492   : > { %v6528_v43 = vpop.f32.mrf.mxu3 }
 0x497   : > { %2095 = vmatmul.f32.gmra.mxu3 %v2003_v57  ;;  %v6620_v57 = vmul.f32 0.125, %v6512_v5 }
 0x499   : > { %v2159_v46 = vmul.f32 %v6620_v57, %v6620_v57 }
 0x49a   : > { %v6532_v58 = vpop.f32.mrf.mxu3 }
 0x49f   : > { %2098 = vmatmul.f32.gmra.mxu3 %v2004_v32 }
 0x4a2   : > { %v6536_v33 = vpop.f32.mrf.mxu3 }
 0x4a7   : > { %2101 = vmatmul.f32.gmra.mxu3 %v2005_v10 }
 0x4aa   : > { %v6540_v29 = vpop.f32.mrf.mxu3 }
 0x4af   : > { %2104 = vmatmul.f32.gmra.mxu3 %v2006_v0 }
 0x4b2   : > { %v6544_v6 = vpop.f32.mrf.mxu3 }
 0x4b7   : > { %2107 = vmatmul.f32.gmra.mxu3 %v2007_v27  ;;  %v3026_v27 = vld [vmem:[#allocation16 + $0x78] sm:$0xff] }
 0x4b8   : > { %3027 = vmatpush.msrb.mxu0 %v3026_v27 }
 0x4ba   : > { %v6548_v44 = vpop.f32.mrf.mxu3  ;;  %3028 = vmatpush.msrb.mxu0 %v3025_v52  ;;  %v2496_v52 = vsub.f32 0.0, %v6620_v57 }
 0x4bc   : > { %3029 = vmatpush.msrb.mxu0 %v3024_v15 }
 0x4bf   : > { %2110 = vmatmul.f32.gmra.mxu3 %v2008_v25  ;;  %v3143_v25 = vld [vmem:[#allocation14 + $0x78] sm:$0xff] }
 0x4c0   : > { %3150 = vmatpush.msrb.mxu1 %v3143_v25 }
 0x4c2   : > { %v6558_v19 = vpop.f32.mrf.mxu3 }
 0x4c7   : > { %2113 = vmatmul.f32.gmra.mxu3 %v2009_v9 }
 0x4ca   : > { %v6574_v38 = vpop.f32.mrf.mxu3 }
 0x4cf   : > { %2116 = vmatmul.f32.gmra.mxu3 %v2010_v7 }
 0x4d2   : > { %v6590_v20 = vpop.f32.mrf.mxu3 }
 0x4d7   : > { %2119 = vmatmul.f32.gmra.mxu3 %v2011_v42 }
 0x4da   : > { %v6606_v28 = vpop.f32.mrf.mxu3 }
 0x4df   : > { %2122 = vmatmul.f32.gmra.mxu3 %v2012_v62 }
 0x4e2   : > { %v6616_v4 = vpop.f32.mrf.mxu3 }
 0x4ea   : > { %v2078_v61 = vpop.f32.mrf.mxu3 }
 0x4eb   : > { %v2142_v49 = vmul.f32 0.125, %v2078_v61  ;;  %v3142_v61 = vld [vmem:[#allocation14 + $0x70] sm:$0xff] }
 0x4ec   : > { %3151 = vmatpush.msrb.mxu1 %v3142_v61 }
 0x4ed   : > { %v2174_v56 = vsub.f32 %v2142_v49, %v2158_v13  ;;  %v2495_v13 = vsub.f32 0.0, %v2126_v34  ;;  %v2161_v49 = vmul.f32 %v6630_v16, %v6630_v16 }
 0x4ef   : > { %v2190_v32 = vmax.f32 %v2174_v56, 0.0 }
 0x4f1   : > { %v2206_v10 = vadd.f32 1e-05, %v2190_v32 }
 0x4f2   : > { %v2081_v0 = vpop.f32.mrf.mxu3 }
 0x4f3   : > { %4957 = vrsqrt.f32 %v2206_v10  ;;  %v2143_v45 = vmul.f32 0.125, %v2081_v0  ;;  %vm2228_vm9 = vweird.f32 %v2206_v10 }
 0x4f5   : > { %v2175_v26 = vsub.f32 %v2143_v45, %v2159_v46 }
 0x4f7   : > { %v2191_v35 = vmax.f32 %v2175_v26, 0.0 }
 0x4f9   : > { %v4958_v9 = vpop.eup %4957  ;;  %v2207_v5 = vadd.f32 1e-05, %v2191_v35 }
 0x4fa   : > { %v2223_v36 = vmul.f32 %v4958_v9, %v2206_v10  ;;  %v2084_v37 = vpop.f32.mrf.mxu3  ;;  %vm2229_vm8 = vweird.f32 %v4958_v9  ;;  %v6636_v10 = vmul.f32 0.125, %v6524_v1 }
 0x4fb   : > { %4959 = vrsqrt.f32 %v2207_v5  ;;  %v2144_v7 = vmul.f32 0.125, %v2084_v37  ;;  %vm2230_vm10 = vmor %vm2228_vm9, %vm2229_vm8  ;;  %vm2238_vm12 = vweird.f32 %v2207_v5 }
 0x4fc   : > { %v2224_v41 = vmul.f32 %v4958_v9, %v2223_v36 }
 0x4fd   : > { %v2176_v24 = vsub.f32 %v2144_v7, %v2160_v55  ;;  %v2162_v55 = vmul.f32 %v6636_v10, %v6636_v10 }
 0x4fe   : > { %v2225_v54 = vmul.f32 0.5, %v2224_v41 }
 0x4ff   : > { %v2192_v11 = vmax.f32 %v2176_v24, 0.0 }
 0x500   : > { %v2226_v42 = vsub.f32 1.5, %v2225_v54 }
 0x501   : > { %v4960_v3 = vpop.eup %4959  ;;  %v2208_v48 = vadd.f32 1e-05, %v2192_v11 }
 0x502   : > { %v2233_v21 = vmul.f32 %v4960_v3, %v2207_v5  ;;  %v2087_v30 = vpop.f32.mrf.mxu3  ;;  %v2227_v62 = vmul.f32 %v4958_v9, %v2226_v42  ;;  %vm2239_vm11 = vweird.f32 %v4960_v3  ;;  %v6644_v42 = vmul.f32 0.125, %v6528_v43 }
 0x503   : > { %4961 = vrsqrt.f32 %v2208_v48  ;;  %v2145_v56 = vmul.f32 0.125, %v2087_v30  ;;  %vm2240_vm13 = vmor %vm2238_vm12, %vm2239_vm11  ;;  %vm2248_vm15 = vweird.f32 %v2208_v48 }
 0x504   : > { %v2231_v23 = vsel %vm2230_vm10, %v4958_v9, %v2227_v62  ;;  %v2234_v32 = vmul.f32 %v4960_v3, %v2233_v21  ;;  %v3023_v9 = vld [vmem:[#allocation16 + $0x60] sm:$0xff] }
 0x505   : > { %v2177_v0 = vsub.f32 %v2145_v56, %v2161_v49  ;;  %4611 = vmatmul.msk.f32.vlgmr.msra.gmra.mxu0 %vm1296_vm2, %v2231_v23  ;;  %v2511_v27 = vmul.f32 %v2495_v13, %v2231_v23  ;;  %v3141_v13 = vld [vmem:[#allocation14 + $0x68] sm:$0xff]  ;;  %v2497_v49 = vsub.f32 0.0, %v6625_v50  ;;  %v2163_v56 = vmul.f32 %v6644_v42, %v6644_v42 }
 0x506   : > { %v2235_v25 = vmul.f32 0.5, %v2234_v32  ;;  %3030 = vmatpush.msrb.mxu0 %v3023_v9  ;;  %3152 = vmatpush.msrb.mxu1 %v3141_v13 }
 0x507   : > { %v2193_v46 = vmax.f32 %v2177_v0, 0.0  ;;  %4627 = vmatmul.msk.f32.vlgmr.msra.gmra.mxu2 %vm1296_vm2, %v2511_v27 }
 0x508   : > { %v2236_v34 = vsub.f32 1.5, %v2235_v25 }
 0x509   : > { %v4962_v45 = vpop.eup %4961  ;;  %v2209_v26 = vadd.f32 1e-05, %v2193_v46 }
 0x50a   : > { %v2243_v35 = vmul.f32 %v4962_v45, %v2208_v48  ;;  %v2090_v36 = vpop.f32.mrf.mxu3  ;;  %v2237_v37 = vmul.f32 %v4960_v3, %v2236_v34  ;;  %vm2249_vm14 = vweird.f32 %v4962_v45  ;;  %v6652_v48 = vmul.f32 0.125, %v6532_v58 }
 0x50b   : > { %4963 = vrsqrt.f32 %v2209_v26  ;;  %v2146_v1 = vmul.f32 0.125, %v2090_v36  ;;  %vm2250_vm0 = vmor %vm2248_vm15, %vm2249_vm14  ;;  %vm2258_vm3 = vweird.f32 %v2209_v26 }
 0x50c   : > { %v2241_v7 = vsel %vm2240_vm13, %v4960_v3, %v2237_v37  ;;  %v2244_v41 = vmul.f32 %v4962_v45, %v2243_v35  ;;  %v3022_v3 = vld [vmem:[#allocation16 + $0x58] sm:$0xff] }
 0x50d   : > { %v2178_v24 = vsub.f32 %v2146_v1, %v2162_v55  ;;  %4612 = vmatmul.msk.f32.gmra.mxu0 %vm1296_vm2, %v2241_v7  ;;  %v2512_v54 = vmul.f32 %v2496_v52, %v2241_v7  ;;  %v2164_v52 = vmul.f32 %v6652_v48, %v6652_v48  ;;  %v3021_v7 = vld [vmem:[#allocation16 + $0x50] sm:$0xff] }
 0x50e   : > { %v2245_v11 = vmul.f32 0.5, %v2244_v41  ;;  %3031 = vmatpush.msrb.mxu0 %v3022_v3 }
 0x50f   : > { %v2194_v5 = vmax.f32 %v2178_v24, 0.0  ;;  %4628 = vmatmul.msk.f32.gmra.mxu2 %vm1296_vm2, %v2512_v54 }
 0x510   : > { %v2246_v57 = vsub.f32 1.5, %v2245_v11  ;;  %3032 = vmatpush.msrb.mxu0 %v3021_v7  ;;  %v6660_v11 = vmul.f32 0.125, %v6536_v33 }
 0x511   : > { %v4964_v21 = vpop.eup %4963  ;;  %v2210_v30 = vadd.f32 1e-05, %v2194_v5 }
 0x512   : > { %v2253_v62 = vmul.f32 %v4964_v21, %v2209_v26  ;;  %v2093_v15 = vpop.f32.mrf.mxu3  ;;  %v2247_v61 = vmul.f32 %v4962_v45, %v2246_v57  ;;  %vm2259_vm1 = vweird.f32 %v4964_v21  ;;  %v2165_v3 = vmul.f32 %v6660_v11, %v6660_v11 }
 0x513   : > { %4965 = vrsqrt.f32 %v2210_v30  ;;  %v2147_v43 = vmul.f32 0.125, %v2093_v15  ;;  %vm2260_vm4 = vmor %vm2258_vm3, %vm2259_vm1  ;;  %vm2268_vm6 = vweird.f32 %v2210_v30 }
 0x514   : > { %v2251_v23 = vsel %vm2250_vm0, %v4962_v45, %v2247_v61  ;;  %v2254_v32 = vmul.f32 %v4964_v21, %v2253_v62  ;;  %v2498_v45 = vsub.f32 0.0, %v6630_v16  ;;  %v2499_v61 = vsub.f32 0.0, %v6636_v10 }
 0x515   : > { %v2179_v0 = vsub.f32 %v2147_v43, %v2163_v56  ;;  %4613 = vmatmul.msk.f32.gmra.mxu0 %vm1296_vm2, %v2251_v23  ;;  %v2513_v27 = vmul.f32 %v2497_v49, %v2251_v23  ;;  %v3020_v56 = vld [vmem:[#allocation16 + $0x48] sm:$0xff]  ;;  %v3140_v43 = vld [vmem:[#allocation14 + $0x60] sm:$0xff] }
 0x516   : > { %v2255_v25 = vmul.f32 0.5, %v2254_v32  ;;  %3153 = vmatpush.msrb.mxu1 %v3140_v43  ;;  %3033 = vmatpush.msrb.mxu0 %v3020_v56 }
 0x517   : > { %v2195_v46 = vmax.f32 %v2179_v0, 0.0  ;;  %4629 = vmatmul.msk.f32.gmra.mxu2 %vm1296_vm2, %v2513_v27 }
 0x518   : > { %v2256_v50 = vsub.f32 1.5, %v2255_v25 }
 0x519   : > { %v4966_v34 = vpop.eup %4965  ;;  %v2211_v35 = vadd.f32 1e-05, %v2195_v46 }
 0x51a   : > { %v2263_v36 = vmul.f32 %v4966_v34, %v2210_v30  ;;  %v2096_v37 = vpop.f32.mrf.mxu3  ;;  %v2257_v9 = vmul.f32 %v4964_v21, %v2256_v50  ;;  %vm2269_vm5 = vweird.f32 %v4966_v34  ;;  %v6668_v30 = vmul.f32 0.125, %v6540_v29 }
 0x51b   : > { %4967 = vrsqrt.f32 %v2211_v35  ;;  %v2148_v55 = vmul.f32 0.125, %v2096_v37  ;;  %vm2270_vm7 = vmor %vm2268_vm6, %vm2269_vm5  ;;  %vm2278_vm9 = vweird.f32 %v2211_v35  ;;  %v2500_v37 = vsub.f32 0.0, %v6644_v42 }
 0x51c   : > { %v2261_v58 = vsel %vm2260_vm4, %v4964_v21, %v2257_v9  ;;  %v2264_v1 = vmul.f32 %v4966_v34, %v2263_v36  ;;  %v2166_v9 = vmul.f32 %v6668_v30, %v6668_v30 }
 0x51d   : > { %v2180_v41 = vsub.f32 %v2148_v55, %v2164_v52  ;;  %4614 = vmatmul.msk.f32.gmra.mxu0 %vm1296_vm2, %v2261_v58  ;;  %v2514_v24 = vmul.f32 %v2498_v45, %v2261_v58  ;;  %v3019_v55 = vld [vmem:[#allocation16 + $0x40] sm:$0xff] }
 0x51e   : > { %v2265_v54 = vmul.f32 0.5, %v2264_v1  ;;  %3034 = vmatpush.msrb.mxu0 %v3019_v55 }
 0x51f   : > { %v2196_v26 = vmax.f32 %v2180_v41, 0.0  ;;  %4630 = vmatmul.msk.f32.gmra.mxu2 %vm1296_vm2, %v2514_v24  ;;  %v6676_v41 = vmul.f32 0.125, %v6544_v6 }
 0x520   : > { %v2266_v16 = vsub.f32 1.5, %v2265_v54 }
 0x521   : > { %v4968_v5 = vpop.eup %4967  ;;  %v2212_v57 = vadd.f32 1e-05, %v2196_v26 }
 0x522   : > { %v2273_v62 = vmul.f32 %v4968_v5, %v2211_v35  ;;  %v2099_v21 = vpop.f32.mrf.mxu3  ;;  %v2267_v15 = vmul.f32 %v4966_v34, %v2266_v16  ;;  %vm2279_vm8 = vweird.f32 %v4968_v5 }
 0x523   : > { %4969 = vrsqrt.f32 %v2212_v57  ;;  %v2149_v13 = vmul.f32 0.125, %v2099_v21  ;;  %vm2280_vm10 = vmor %vm2278_vm9, %vm2279_vm8  ;;  %vm2288_vm12 = vweird.f32 %v2212_v57  ;;  %v2167_v21 = vmul.f32 %v6676_v41, %v6676_v41 }
 0x524   : > { %v2271_v33 = vsel %vm2270_vm7, %v4966_v34, %v2267_v15  ;;  %v2274_v49 = vmul.f32 %v4968_v5, %v2273_v62  ;;  %v2501_v62 = vsub.f32 0.0, %v6652_v48 }
 0x525   : > { %v2181_v23 = vsub.f32 %v2149_v13, %v2165_v3  ;;  %4615 = vmatmul.msk.f32.gmra.mxu0 %vm1296_vm2, %v2271_v33  ;;  %v2515_v32 = vmul.f32 %v2499_v61, %v2271_v33  ;;  %v3018_v3 = vld [vmem:[#allocation16 + $0x38] sm:$0xff] }
 0x526   : > { %v2275_v0 = vmul.f32 0.5, %v2274_v49  ;;  %v3139_v13 = vld [vmem:[#allocation14 + $0x58] sm:$0xff]  ;;  %3035 = vmatpush.msrb.mxu0 %v3018_v3 }
 0x527   : > { %v2197_v10 = vmax.f32 %v2181_v23, 0.0  ;;  %4631 = vmatmul.msk.f32.gmra.mxu2 %vm1296_vm2, %v2515_v32  ;;  %3154 = vmatpush.msrb.mxu1 %v3139_v13 }
 0x528   : > { %v2276_v27 = vsub.f32 1.5, %v2275_v0 }
 0x529   : > { %v4970_v25 = vpop.eup %4969  ;;  %v2213_v46 = vadd.f32 1e-05, %v2197_v10 }
 0x52a   : > { %v2283_v50 = vmul.f32 %v4970_v25, %v2212_v57  ;;  %v2102_v34 = vpop.f32.mrf.mxu3  ;;  %v2277_v36 = vmul.f32 %v4968_v5, %v2276_v27  ;;  %vm2289_vm11 = vweird.f32 %v4970_v25  ;;  %v6684_v57 = vmul.f32 0.125, %v6548_v44 }
 0x52b   : > { %4971 = vrsqrt.f32 %v2213_v46  ;;  %v2150_v45 = vmul.f32 0.125, %v2102_v34  ;;  %vm2290_vm13 = vmor %vm2288_vm12, %vm2289_vm11  ;;  %vm2298_vm15 = vweird.f32 %v2213_v46 }
 0x52c   : > { %v2281_v29 = vsel %vm2280_vm10, %v4968_v5, %v2277_v36  ;;  %v2284_v52 = vmul.f32 %v4970_v25, %v2283_v50  ;;  %v2168_v50 = vmul.f32 %v6684_v57, %v6684_v57 }
 0x52d   : > { %v2182_v58 = vsub.f32 %v2150_v45, %v2166_v9  ;;  %4616 = vmatmul.msk.f32.gmra.mxu0 %vm1296_vm2, %v2281_v29  ;;  %v2516_v1 = vmul.f32 %v2500_v37, %v2281_v29  ;;  %v3017_v37 = vld [vmem:[#allocation16 + $0x30] sm:$0xff] }
 0x52e   : > { %v2285_v7 = vmul.f32 0.5, %v2284_v52  ;;  %3036 = vmatpush.msrb.mxu0 %v3017_v37  ;;  %v6692_v52 = vmul.f32 0.125, %v6558_v19 }
 0x52f   : > { %v2198_v35 = vmax.f32 %v2182_v58, 0.0  ;;  %4632 = vmatmul.msk.f32.gmra.mxu2 %vm1296_vm2, %v2516_v1 }
 0x530   : > { %v2286_v42 = vsub.f32 1.5, %v2285_v7 }
 0x531   : > { %v4972_v24 = vpop.eup %4971  ;;  %v2214_v54 = vadd.f32 1e-05, %v2198_v35 }
 0x532   : > { %v2293_v26 = vmul.f32 %v4972_v24, %v2213_v46  ;;  %v2105_v16 = vpop.f32.mrf.mxu3  ;;  %v2287_v5 = vmul.f32 %v4970_v25, %v2286_v42  ;;  %vm2299_vm14 = vweird.f32 %v4972_v24  ;;  %v2503_v42 = vsub.f32 0.0, %v6668_v30 }
 0x533   : > { %4973 = vrsqrt.f32 %v2214_v54  ;;  %v2151_v15 = vmul.f32 0.125, %v2105_v16  ;;  %vm2300_vm0 = vmor %vm2298_vm15, %vm2299_vm14  ;;  %vm2308_vm3 = vweird.f32 %v2214_v54 }
 0x534   : > { %v2291_v6 = vsel %vm2290_vm13, %v4970_v25, %v2287_v5  ;;  %v2294_v61 = vmul.f32 %v4972_v24, %v2293_v26  ;;  %v2502_v25 = vsub.f32 0.0, %v6660_v11  ;;  %v3016_v5 = vld [vmem:[#allocation16 + $0x28] sm:$0xff] }
 0x535   : > { %v2183_v33 = vsub.f32 %v2151_v15, %v2167_v21  ;;  %4617 = vmatmul.msk.f32.gmra.mxu0 %vm1296_vm2, %v2291_v6  ;;  %v2517_v49 = vmul.f32 %v2501_v62, %v2291_v6  ;;  %v3138_v62 = vld [vmem:[#allocation14 + $0x50] sm:$0xff] }
 0x536   : > { %v2295_v56 = vmul.f32 0.5, %v2294_v61  ;;  %3155 = vmatpush.msrb.mxu1 %v3138_v62  ;;  %3037 = vmatpush.msrb.mxu0 %v3016_v5 }
 0x537   : > { %v2199_v48 = vmax.f32 %v2183_v33, 0.0  ;;  %4633 = vmatmul.msk.f32.gmra.mxu2 %vm1296_vm2, %v2517_v49 }
 0x538   : > { %v2296_v43 = vsub.f32 1.5, %v2295_v56 }
 0x539   : > { %v4974_v23 = vpop.eup %4973  ;;  %v2215_v32 = vadd.f32 1e-05, %v2199_v48  ;;  %v2504_v48 = vsub.f32 0.0, %v6676_v41 }
 0x53a   : > { %v2303_v0 = vmul.f32 %v4974_v23, %v2214_v54  ;;  %v2108_v10 = vpop.f32.mrf.mxu3  ;;  %v2297_v27 = vmul.f32 %v4972_v24, %v2296_v43  ;;  %vm2309_vm1 = vweird.f32 %v4974_v23  ;;  %v6700_v54 = vmul.f32 0.125, %v6574_v38 }
 0x53b   : > { %4975 = vrsqrt.f32 %v2215_v32  ;;  %v2152_v34 = vmul.f32 0.125, %v2108_v10  ;;  %vm2310_vm4 = vmor %vm2308_vm3, %vm2309_vm1  ;;  %vm2318_vm6 = vweird.f32 %v2215_v32  ;;  %v3015_v10 = vld [vmem:[#allocation16 + $0x20] sm:$0xff] }
 0x53c   : > { %v2304_v44 = vmul.f32 %v4974_v23, %v2303_v0  ;;  %v2301_v36 = vsel %vm2300_vm0, %v4972_v24, %v2297_v27  ;;  %v2169_v24 = vmul.f32 %v6692_v52, %v6692_v52  ;;  %v2170_v43 = vmul.f32 %v6700_v54, %v6700_v54  ;;  %3038 = vmatpush.msrb.mxu0 %v3015_v10 }
 0x53d   : > { %v2184_v9 = vsub.f32 %v2152_v34, %v2168_v50  ;;  %4618 = vmatmul.msk.f32.gmra.mxu0 %vm1296_vm2, %v2301_v36  ;;  %v2518_v45 = vmul.f32 %v2502_v25, %v2301_v36 }
 0x53e   : > { %v2305_v29 = vmul.f32 0.5, %v2304_v44 }
 0x53f   : > { %v2200_v46 = vmax.f32 %v2184_v9, 0.0  ;;  %4634 = vmatmul.msk.f32.gmra.mxu2 %vm1296_vm2, %v2518_v45 }
 0x540   : > { %v2306_v11 = vsub.f32 1.5, %v2305_v29  ;;  %v2505_v29 = vsub.f32 0.0, %v6684_v57  ;;  %v6723_v57 = vmul.f32 0.125, %v6606_v28  ;;  %v2506_v28 = vsub.f32 0.0, %v6692_v52 }
 0x541   : > { %v4976_v55 = vpop.eup %4975  ;;  %v2216_v58 = vadd.f32 1e-05, %v2200_v46 }
 0x542   : > { %v2313_v1 = vmul.f32 %v4976_v55, %v2215_v32  ;;  %v2111_v7 = vpop.f32.mrf.mxu3  ;;  %v2307_v35 = vmul.f32 %v4974_v23, %v2306_v11  ;;  %vm2319_vm5 = vweird.f32 %v4976_v55  ;;  %v6711_v32 = vmul.f32 0.125, %v6590_v20 }
 0x543   : > { %4977 = vrsqrt.f32 %v2216_v58  ;;  %v2153_v26 = vmul.f32 0.125, %v2111_v7  ;;  %vm2320_vm7 = vmor %vm2318_vm6, %vm2319_vm5  ;;  %vm2328_vm9 = vweird.f32 %v2216_v58  ;;  %v3137_v7 = vld [vmem:[#allocation14 + $0x48] sm:$0xff] }
 0x544   : > { %v2314_v19 = vmul.f32 %v4976_v55, %v2313_v1  ;;  %v2311_v16 = vsel %vm2310_vm4, %v4974_v23, %v2307_v35  ;;  %v2171_v46 = vmul.f32 %v6711_v32, %v6711_v32  ;;  %v3014_v1 = vld [vmem:[#allocation16 + $0x18] sm:$0xff]  ;;  %3156 = vmatpush.msrb.mxu1 %v3137_v7  ;;  %v2508_v7 = vsub.f32 0.0, %v6711_v32 }
 0x545   : > { %v2185_v21 = vsub.f32 %v2153_v26, %v2169_v24  ;;  %4619 = vmatmul.msk.f32.gmra.mxu0 %vm1296_vm2, %v2311_v16  ;;  %v2519_v15 = vmul.f32 %v2503_v42, %v2311_v16  ;;  %v3013_v24 = vld [vmem:[#allocation16 + $0x10] sm:$0xff]  ;;  %v3136_v16 = vld [vmem:[#allocation14 + $0x40] sm:$0xff] }
 0x546   : > { %v2315_v6 = vmul.f32 0.5, %v2314_v19  ;;  %3039 = vmatpush.msrb.mxu0 %v3014_v1  ;;  %v3012_v19 = vld [vmem:[#allocation16 + $0x8] sm:$0xff]  ;;  %3157 = vmatpush.msrb.mxu1 %v3136_v16 }
 0x547   : > { %v2201_v30 = vmax.f32 %v2185_v21, 0.0  ;;  %4635 = vmatmul.msk.f32.gmra.mxu2 %vm1296_vm2, %v2519_v15 }
 0x548   : > { %v2316_v61 = vsub.f32 1.5, %v2315_v6  ;;  %3040 = vmatpush.msrb.mxu0 %v3013_v24 }
 0x549   : > { %v4978_v3 = vpop.eup %4977  ;;  %v6703_v13 = vadd.f32 1e-05, %v2201_v30 }
 0x54a   : > { %v2323_v33 = vmul.f32 %v4978_v3, %v2216_v58  ;;  %v2114_v49 = vpop.f32.mrf.mxu3  ;;  %v2317_v56 = vmul.f32 %v4976_v55, %v2316_v61  ;;  %vm2329_vm8 = vweird.f32 %v4978_v3  ;;  %3041 = vmatpush.msrb.mxu0 %v3012_v19  ;;  %v2172_v61 = vmul.f32 %v6723_v57, %v6723_v57 }
 0x54b   : > { %4979 = vrsqrt.f32 %v6703_v13  ;;  %v2154_v38 = vmul.f32 0.125, %v2114_v49  ;;  %vm2330_vm10 = vmor %vm2328_vm9, %vm2329_vm8  ;;  %vm2338_vm12 = vweird.f32 %v6703_v13 }
 0x54c   : > { %v2324_v23 = vmul.f32 %v4978_v3, %v2323_v33  ;;  %v2321_v0 = vsel %vm2320_vm7, %v4976_v55, %v2317_v56 }
 0x54d   : > { %v2186_v27 = vsub.f32 %v2154_v38, %v2170_v43  ;;  %4620 = vmatmul.msk.f32.gmra.mxu0 %vm1296_vm2, %v2321_v0  ;;  %v2520_v25 = vmul.f32 %v2504_v48, %v2321_v0  ;;  %v3011_v43 = vld [vmem:[#allocation16] sm:$0xff] }
 0x54e   : > { %v2325_v50 = vmul.f32 0.5, %v2324_v23  ;;  %3042 = vmatpush.msrb.mxu0 %v3011_v43  ;;  %v2996_v43 = vld [vmem:[%s5878_s24 + $0x8] sm:$0xff] }
 0x54f   : > { %v2202_v41 = vmax.f32 %v2186_v27, 0.0  ;;  %4636 = vmatmul.msk.f32.gmra.mxu2 %vm1296_vm2, %v2520_v25 }
 0x550   : > { %v2326_v34 = vsub.f32 1.5, %v2325_v50 }
 0x551   : > { %v4980_v44 = vpop.eup %4979  ;;  %v6714_v36 = vadd.f32 1e-05, %v2202_v41  ;;  %v2507_v41 = vsub.f32 0.0, %v6700_v54 }
 0x552   : > { %v2333_v37 = vmul.f32 %v4980_v44, %v6703_v13  ;;  %v2117_v9 = vpop.f32.mrf.mxu3  ;;  %v2327_v45 = vmul.f32 %v4978_v3, %v2326_v34  ;;  %vm2339_vm11 = vweird.f32 %v4980_v44  ;;  %v6733_v13 = vmul.f32 0.125, %v6616_v4 }
 0x553   : > { %4981 = vrsqrt.f32 %v6714_v36  ;;  %v2155_v20 = vmul.f32 0.125, %v2117_v9  ;;  %vm2340_vm13 = vmor %vm2338_vm12, %vm2339_vm11  ;;  %vm2348_vm15 = vweird.f32 %v6714_v36 }
 0x554   : > { %v2334_v11 = vmul.f32 %v4980_v44, %v2333_v37  ;;  %v2331_v55 = vsel %vm2330_vm10, %v4978_v3, %v2327_v45  ;;  %v2173_v34 = vmul.f32 %v6733_v13, %v6733_v13 }
 0x555   : > { %v2187_v35 = vsub.f32 %v2155_v20, %v2171_v46  ;;  %4621 = vmatmul.msk.f32.gmra.mxu0 %vm1296_vm2, %v2331_v55  ;;  %v2521_v42 = vmul.f32 %v2505_v29, %v2331_v55  ;;  %v3135_v29 = vld [vmem:[#allocation14 + $0x38] sm:$0xff] }
 0x556   : > { %v2335_v58 = vmul.f32 0.5, %v2334_v11  ;;  %3158 = vmatpush.msrb.mxu1 %v3135_v29  ;;  %v3002_v29 = vld [vmem:[%s5878_s24 + $0x38] sm:$0xff] }
 0x557   : > { %v2203_v26 = vmax.f32 %v2187_v35, 0.0  ;;  %4637 = vmatmul.msk.f32.gmra.mxu2 %vm1296_vm2, %v2521_v42 }
 0x558   : > { %v2336_v5 = vsub.f32 1.5, %v2335_v58 }
 0x559   : > { %v4982_v62 = vpop.eup %4981  ;;  %v2219_v21 = vadd.f32 1e-05, %v2203_v26 }
 0x55a   : > { %v2343_v15 = vmul.f32 %v4982_v62, %v6714_v36  ;;  %v2120_v6 = vpop.f32.mrf.mxu3  ;;  %v2337_v30 = vmul.f32 %v4980_v44, %v2336_v5  ;;  %vm2349_vm14 = vweird.f32 %v4982_v62 }
 0x55b   : > { %4983 = vrsqrt.f32 %v2219_v21  ;;  %v2156_v3 = vmul.f32 0.125, %v2120_v6  ;;  %vm2350_vm0 = vmor %vm2348_vm15, %vm2349_vm14  ;;  %vm2358_vm3 = vweird.f32 %v2219_v21 }
 0x55c   : > { %v2344_v33 = vmul.f32 %v4982_v62, %v2343_v15  ;;  %v2341_v49 = vsel %vm2340_vm13, %v4980_v44, %v2337_v30 }
 0x55d   : > { %v2188_v56 = vsub.f32 %v2156_v3, %v2172_v61  ;;  %4622 = vmatmul.msk.f32.gmra.mxu0 %vm1296_vm2, %v2341_v49  ;;  %v2522_v48 = vmul.f32 %v2506_v28, %v2341_v49  ;;  %v2510_v61 = vsub.f32 0.0, %v6733_v13  ;;  %v2995_v49 = vld [vmem:[%s5878_s24] sm:$0xff]  ;;  %v2997_v13 = vld [vmem:[%s5878_s24 + $0x10] sm:$0xff] }
 0x55e   : > { %v2345_v38 = vmul.f32 0.5, %v2344_v33 }
 0x55f   : > { %v2204_v23 = vmax.f32 %v2188_v56, 0.0  ;;  %4638 = vmatmul.msk.f32.gmra.mxu2 %vm1296_vm2, %v2522_v48  ;;  %v3134_v56 = vld [vmem:[#allocation14 + $0x30] sm:$0xff] }
 0x560   : > { %v2346_v52 = vsub.f32 1.5, %v2345_v38  ;;  %3159 = vmatpush.msrb.mxu1 %v3134_v56 }
 0x561   : > { %v4984_v0 = vpop.eup %4983  ;;  %v2220_v10 = vadd.f32 1e-05, %v2204_v23  ;;  %v3133_v23 = vld [vmem:[#allocation14 + $0x28] sm:$0xff] }
 0x562   : > { %v2353_v27 = vmul.f32 %v4984_v0, %v2219_v21  ;;  %v2123_v25 = vpop.f32.mrf.mxu3  ;;  %v2347_v50 = vmul.f32 %v4982_v62, %v2346_v52  ;;  %vm2359_vm1 = vweird.f32 %v4984_v0  ;;  %3160 = vmatpush.msrb.mxu1 %v3133_v23 }
 0x563   : > { %4985 = vrsqrt.f32 %v2220_v10  ;;  %v2157_v4 = vmul.f32 0.125, %v2123_v25  ;;  %vm2360_vm4 = vmor %vm2358_vm3, %vm2359_vm1  ;;  %vm2368_vm6 = vweird.f32 %v2220_v10  ;;  %v3132_v25 = vld [vmem:[#allocation14 + $0x20] sm:$0xff] }
 0x564   : > { %v2354_v44 = vmul.f32 %v4984_v0, %v2353_v27  ;;  %v2351_v37 = vsel %vm2350_vm0, %v4982_v62, %v2347_v50  ;;  %v2509_v62 = vsub.f32 0.0, %v6723_v57  ;;  %v2999_v27 = vld [vmem:[%s5878_s24 + $0x20] sm:$0xff]  ;;  %3161 = vmatpush.msrb.mxu1 %v3132_v25 }
 0x565   : > { %v2189_v9 = vsub.f32 %v2157_v4, %v2173_v34  ;;  %4623 = vmatmul.msk.f32.gmra.mxu0 %vm1296_vm2, %v2351_v37  ;;  %v2523_v45 = vmul.f32 %v2507_v41, %v2351_v37  ;;  %v3000_v34 = vld [vmem:[%s5878_s24 + $0x28] sm:$0xff]  ;;  %v3001_v37 = vld [vmem:[%s5878_s24 + $0x30] sm:$0xff] }
 0x566   : > { %v2355_v46 = vmul.f32 0.5, %v2354_v44 }
 0x567   : > { %v2205_v20 = vmax.f32 %v2189_v9, 0.0  ;;  %4639 = vmatmul.msk.f32.gmra.mxu2 %vm1296_vm2, %v2523_v45  ;;  %v3131_v9 = vld [vmem:[#allocation14 + $0x18] sm:$0xff] }
 0x568   : > { %v2356_v36 = vsub.f32 1.5, %v2355_v46  ;;  %3162 = vmatpush.msrb.mxu1 %v3131_v9 }
 0x569   : > { %v4986_v54 = vpop.eup %4985  ;;  %v2221_v11 = vadd.f32 1e-05, %v2205_v20 }
 0x56a   : > { %v2363_v55 = vmul.f32 %v4986_v54, %v2220_v10  ;;  %v2357_v1 = vmul.f32 %v4984_v0, %v2356_v36  ;;  %vm2369_vm5 = vweird.f32 %v4986_v54  ;;  %v3003_v36 = vld [vmem:[%s5878_s24 + $0x40] sm:$0xff] }
 0x56b   : > { %4987 = vrsqrt.f32 %v2221_v11  ;;  %vm2370_vm7 = vmor %vm2368_vm6, %vm2369_vm5  ;;  %vm2378_vm9 = vweird.f32 %v2221_v11 }
 0x56c   : > { %v2364_v35 = vmul.f32 %v4986_v54, %v2363_v55  ;;  %v2361_v42 = vsel %vm2360_vm4, %v4984_v0, %v2357_v1  ;;  %v2998_v0 = vld [vmem:[%s5878_s24 + $0x18] sm:$0xff] }
 0x56d   : > { %4624 = vmatmul.msk.f32.gmra.mxu0 %vm1296_vm2, %v2361_v42  ;;  %v2524_v24 = vmul.f32 %v2508_v7, %v2361_v42 }
 0x56e   : > { %v2365_v58 = vmul.f32 0.5, %v2364_v35  ;;  %v3004_v35 = vld [vmem:[%s5878_s24 + $0x48] sm:$0xff] }
 0x56f   : > { %4640 = vmatmul.msk.f32.gmra.mxu2 %vm1296_vm2, %v2524_v24 }
 0x570   : > { %v2366_v26 = vsub.f32 1.5, %v2365_v58 }
 0x571   : > { %v4988_v19 = vpop.eup %4987 }
 0x572   : > { %v2373_v16 = vmul.f32 %v4988_v19, %v2221_v11  ;;  %v2367_v5 = vmul.f32 %v4986_v54, %v2366_v26  ;;  %vm2379_vm8 = vweird.f32 %v4988_v19  ;;  %v6772_v11 = vld [vmem:[#allocation13] ss:$0 sm:$0xff] }
 0x573   : > { %vm2380_vm10 = vmor %vm2378_vm9, %vm2379_vm8 }
 0x574   : > { %v2374_v32 = vmul.f32 %v4988_v19, %v2373_v16  ;;  %v2371_v21 = vsel %vm2370_vm7, %v4986_v54, %v2367_v5  ;;  %v3130_v54 = vld [vmem:[#allocation14 + $0x10] sm:$0xff]  ;;  %v3005_v5 = vld [vmem:[%s5878_s24 + $0x50] sm:$0xff] }
 0x575   : > { %4625 = vmatmul.msk.f32.gmra.mxu0 %vm1296_vm2, %v2371_v21  ;;  %v2525_v15 = vmul.f32 %v2509_v62, %v2371_v21  ;;  %3163 = vmatpush.msrb.mxu1 %v3130_v54  ;;  %v3129_v62 = vld [vmem:[#allocation14 + $0x8] sm:$0xff] }
 0x576   : > { %v2375_v6 = vmul.f32 0.5, %v2374_v32 }
 0x577   : > { %4641 = vmatmul.msk.f32.gmra.mxu2 %vm1296_vm2, %v2525_v15  ;;  %3164 = vmatpush.msrb.mxu1 %v3129_v62 }
 0x578   : > { %v2376_v30 = vsub.f32 1.5, %v2375_v6 }
 0x57a   : > { %v2377_v28 = vmul.f32 %v4988_v19, %v2376_v30 }
 0x57c   : > { %v2381_v57 = vsel %vm2380_vm10, %v4988_v19, %v2377_v28 }
 0x57d   : > { %4626 = vmatmul.msk.f32.gmra.mxu0 %vm1296_vm2, %v2381_v57  ;;  %v2526_v3 = vmul.f32 %v2510_v61, %v2381_v57  ;;  %v3006_v61 = vld [vmem:[%s5878_s24 + $0x58] sm:$0xff] }
 0x57f   : > { %4642 = vmatmul.msk.f32.gmra.mxu2 %vm1296_vm2, %v2526_v3 }
 0x582   : > { %v2447_v33 = vpop.f32.mrf.mxu0 }
 0x583   : > { %v2643_v42 = vmul.f32 %v2447_v33, %v6458_v59 }
 0x585   : > { %3043 = vmatmul.f32.vlgmr.msrb.gmra.mxu0 %v2995_v49 }
 0x58a   : > { %v2450_v48 = vpop.f32.mrf.mxu0  ;;  %v2595_v50 = vpop.f32.mrf.mxu2 }
 0x58b   : > { %v2596_v1 = vadd.f32 %v6772_v11, %v2595_v50  ;;  %v2644_v32 = vmul.f32 %v2450_v48, %v6461_v60  ;;  %v3128_v48 = vld [vmem:[#allocation14] sm:$0xff] }
 0x58c   : > { %3165 = vmatpush.msrb.mxu1 %v3128_v48 }
 0x58d   : > { %3046 = vmatmul.f32.gmra.mxu0 %v2996_v43  ;;  %v6779_v24 = vadd.f32 %v2643_v42, %v2596_v1 }
 0x58f   : > { %v4643_v26 = vmul.f32 -1.442695, %v6779_v24 }
 0x591   : > { %4989 = vpow2.f32 %v4643_v26 }
 0x592   : > { %v2453_v38 = vpop.f32.mrf.mxu0  ;;  %v2598_v4 = vpop.f32.mrf.mxu2 }
 0x593   : > { %v2599_v19 = vadd.f32 %v6772_v11, %v2598_v4  ;;  %v2645_v6 = vmul.f32 %v2453_v38, %v6464_v51  ;;  %v3007_v51 = vld [vmem:[%s5878_s24 + $0x60] sm:$0xff] }
 0x595   : > { %3049 = vmatmul.f32.gmra.mxu0 %v2997_v13  ;;  %v6787_v21 = vadd.f32 %v2644_v32, %v2599_v19 }
 0x597   : > { %v4644_v15 = vmul.f32 -1.442695, %v6787_v21  ;;  %v4990_v57 = vpop.eup %4989 }
 0x598   : > { %v6797_v60 = vadd.f32 1.0, %v4990_v57 }
 0x599   : > { %4991 = vpow2.f32 %v4644_v15 }
 0x59a   : > { %v6754_v52 = vpop.f32.mrf.mxu0  ;;  %v2601_v46 = vpop.f32.mrf.mxu2  ;;  %4993 = vrcp.f32 %v6797_v60  ;;  %vm2744_vm12 = vweird.f32 %v6797_v60 }
 0x59b   : > { %v2602_v59 = vadd.f32 %v6772_v11, %v2601_v46  ;;  %v2646_v38 = vmul.f32 %v6754_v52, %v6467_v17  ;;  %v3008_v17 = vld [vmem:[%s5878_s24 + $0x68] sm:$0xff] }
 0x59d   : > { %3052 = vmatmul.f32.gmra.mxu0 %v2998_v0  ;;  %v6795_v3 = vadd.f32 %v2645_v6, %v2602_v59 }
 0x59f   : > { %v4645_v33 = vmul.f32 -1.442695, %v6795_v3  ;;  %v4992_v43 = vpop.eup %4991 }
 0x5a0   : > { %v6809_v0 = vadd.f32 1.0, %v4992_v43 }
 0x5a1   : > { %4995 = vpow2.f32 %v4645_v33  ;;  %v3010_v33 = vld [vmem:[%s5878_s24 + $0x78] sm:$0xff] }
 0x5a2   : > { %v6757_v10 = vpop.f32.mrf.mxu0  ;;  %v2604_v55 = vpop.f32.mrf.mxu2  ;;  %4997 = vrcp.f32 %v6809_v0  ;;  %vm2759_vm0 = vweird.f32 %v6809_v0 }
 0x5a3   : > { %v2605_v49 = vadd.f32 %v6772_v11, %v2604_v55  ;;  %v2647_v52 = vmul.f32 %v6757_v10, %v6470_v12  ;;  %v3009_v12 = vld [vmem:[%s5878_s24 + $0x70] sm:$0xff] }
 0x5a5   : > { %3055 = vmatmul.f32.gmra.mxu0 %v2999_v27  ;;  %v6807_v23 = vadd.f32 %v2646_v38, %v2605_v49  ;;  %v4994_v27 = vpop.eup %4993 }
 0x5a6   : > { %vm2745_vm11 = vweird.f32 %v4994_v27 }
 0x5a7   : > { %v4646_v25 = vmul.f32 -1.442695, %v6807_v23  ;;  %vm2746_vm13 = vmor %vm2744_vm12, %vm2745_vm11 }
 0x5a9   : > { %4999 = vpow2.f32 %v4646_v25 }
 0x5aa   : > { %v6760_v41 = vpop.f32.mrf.mxu0  ;;  %v2607_v58 = vpop.f32.mrf.mxu2 }
 0x5ab   : > { %v2608_v50 = vadd.f32 %v6772_v11, %v2607_v58  ;;  %v2648_v42 = vmul.f32 %v6760_v41, %v6473_v2  ;;  %v2750_v2 = vand.u32 2147483648, %v6797_v60 }
 0x5ad   : > { %3058 = vmatmul.f32.gmra.mxu0 %v3000_v34  ;;  %v4996_v34 = vpop.eup %4995 }
 0x5ae   : > { %v6820_v9 = vadd.f32 1.0, %v4996_v34  ;;  %v6824_v54 = vpop.eup %4997  ;;  %v2765_v34 = vand.u32 2147483648, %v6809_v0 }
 0x5af   : > { %v5000_v10 = vpop.eup %4999  ;;  %v2755_v26 = vmul.f32 %v6824_v54, %v6809_v0  ;;  %vm2760_vm15 = vweird.f32 %v6824_v54 }
 0x5b0   : > { %5001 = vrcp.f32 %v6820_v9  ;;  %vm2761_vm1 = vmor %vm2759_vm0, %vm2760_vm15  ;;  %vm2774_vm5 = vweird.f32 %v6820_v9 }
 0x5b1   : > { %v2756_v59 = vsub.f32 1.0, %v2755_v26  ;;  %v2766_v26 = vor.u32 1.1754944e-38, %v2765_v34 }
 0x5b2   : > { %v6763_v44 = vpop.f32.mrf.mxu0  ;;  %v2610_v30 = vpop.f32.mrf.mxu2 }
 0x5b3   : > { %v2611_v1 = vadd.f32 %v6772_v11, %v2610_v30  ;;  %v2748_v30 = vand.u32 2147483647, %v6797_v60  ;;  %v2757_v43 = vmul.f32 %v6824_v54, %v2756_v59 }
 0x5b5   : > { %3061 = vmatmul.f32.gmra.mxu0 %v3001_v37  ;;  %v2740_v37 = vmul.f32 %v4994_v27, %v6797_v60  ;;  %v6836_v19 = vadd.f32 %v2648_v42, %v2611_v1  ;;  %vm2749_vm14 = vcmp.eq.f32.partialorder %v2748_v30, 8.507059e+37  ;;  %v2758_v25 = vadd.f32 %v6824_v54, %v2757_v43 }
 0x5b6   : > { %v6840_v62 = vpop.eup %5001 }
 0x5b7   : > { %v4648_v41 = vmul.f32 -1.442695, %v6836_v19  ;;  %v2770_v49 = vmul.f32 %v6840_v62, %v6820_v9  ;;  %v2762_v42 = vsel %vm2761_vm1, %v6824_v54, %v2758_v25  ;;  %vm2775_vm4 = vweird.f32 %v6840_v62 }
 0x5b8   : > { %v2778_v54 = vand.u32 2147483647, %v6820_v9  ;;  %vm6897_vm6 = vmor %vm2774_vm5, %vm2775_vm4 }
 0x5ba   : > { %v6766_v45 = vpop.f32.mrf.mxu0  ;;  %v2613_v13 = vpop.f32.mrf.mxu2  ;;  %vm2779_vm7 = vcmp.eq.f32.partialorder %v2778_v54, 8.507059e+37 }
 0x5bb   : > { %v2614_v15 = vadd.f32 %v6772_v11, %v2613_v13  ;;  %v2751_v13 = vor.u32 1.1754944e-38, %v2750_v2 }
 0x5bd   : > { %3064 = vmatmul.f32.gmra.mxu0 %v3002_v29  ;;  %v6822_v29 = vadd.f32 %v2647_v52, %v2608_v50 }
 0x5bf   : > { %v4647_v55 = vmul.f32 -1.442695, %v6822_v29 }
 0x5c1   : > { %5003 = vpow2.f32 %v4647_v55 }
 0x5c2   : > { %v6769_v20 = vpop.f32.mrf.mxu0  ;;  %v2616_v46 = vpop.f32.mrf.mxu2 }
 0x5c5   : > { %3067 = vmatmul.f32.gmra.mxu0 %v3003_v36  ;;  %v2741_v36 = vsub.f32 1.0, %v2740_v37  ;;  %v6871_v37 = vld [vmem:[%s7571_s16] ss:$0 sm:$0xff] }
 0x5c7   : > { %v2742_v58 = vmul.f32 %v4994_v27, %v2741_v36  ;;  %v2763_v36 = vand.u32 2147483647, %v6809_v0 }
 0x5c9   : > { %v2743_v32 = vadd.f32 %v4994_v27, %v2742_v58  ;;  %vm2764_vm3 = vcmp.eq.f32.partialorder %v2763_v36, 8.507059e+37 }
 0x5ca   : > { %v6775_v7 = vpop.f32.mrf.mxu0  ;;  %v2619_v6 = vpop.f32.mrf.mxu2 }
 0x5cb   : > { %v2747_v48 = vsel %vm2746_vm13, %v4994_v27, %v2743_v32 }
 0x5cd   : > { %3070 = vmatmul.f32.gmra.mxu0 %v3004_v35 }
 0x5d2   : > { %v6783_v16 = vpop.f32.mrf.mxu0  ;;  %v2622_v55 = vpop.f32.mrf.mxu2 }
 0x5d5   : > { %3073 = vmatmul.f32.gmra.mxu0 %v3005_v5  ;;  %v6838_v5 = vadd.f32 1.0, %v5000_v10 }
 0x5d7   : > { %5005 = vrcp.f32 %v6838_v5  ;;  %vm2789_vm9 = vweird.f32 %v6838_v5  ;;  %v2795_v36 = vand.u32 2147483648, %v6838_v5 }
 0x5d8   : > { %5007 = vpow2.f32 %v4648_v41  ;;  %v2780_v41 = vand.u32 2147483648, %v6820_v9  ;;  %v2651_v9 = vmul.f32 %v6769_v20, %v6482_v14 }
 0x5da   : > { %v6792_v28 = vpop.f32.mrf.mxu0 }
 0x5dd   : > { %3076 = vmatmul.f32.gmra.mxu0 %v3006_v61  ;;  %v2649_v61 = vmul.f32 %v6763_v44, %v6476_v53  ;;  %v2752_v53 = vsel %vm2749_vm14, %v2751_v13, %v2747_v48  ;;  %v2771_v44 = vsub.f32 1.0, %v2770_v49 }
 0x5de   : > { %v2979_v52 = vmul.f32 %v2752_v53, %v6779_v24  ;;  %v2650_v24 = vmul.f32 %v6766_v45, %v6479_v31  ;;  %v2625_v53 = vpop.f32.mrf.mxu2 }
 0x5df   : > { %v6856_v38 = vadd.f32 %v2649_v61, %v2614_v15  ;;  %v2767_v15 = vsel %vm2764_vm3, %v2766_v26, %v2762_v42  ;;  %v2620_v61 = vadd.f32 %v6772_v11, %v2619_v6 }
 0x5e1   : > { %v4649_v27 = vmul.f32 -1.442695, %v6856_v38 }
 0x5e2   : > { %v6802_v56 = vpop.f32.mrf.mxu0 }
 0x5e5   : > { %3079 = vmatmul.f32.gmra.mxu0 %v3007_v51  ;;  %v5004_v51 = vpop.eup %5003 }
 0x5e6   : > { %v6858_v60 = vadd.f32 1.0, %v5004_v51  ;;  %v6862_v50 = vpop.eup %5005 }
 0x5e7   : > { %v5008_v10 = vpop.eup %5007  ;;  %v2785_v58 = vmul.f32 %v6862_v50, %v6838_v5  ;;  %vm2790_vm8 = vweird.f32 %v6862_v50 }
 0x5e8   : > { %5009 = vrcp.f32 %v6858_v60  ;;  %v6885_v59 = vadd.f32 1.0, %v5008_v10  ;;  %v2793_v10 = vand.u32 2147483647, %v6838_v5  ;;  %vm2791_vm10 = vmor %vm2789_vm9, %vm2790_vm8  ;;  %vm2804_vm13 = vweird.f32 %v6858_v60 }
 0x5e9   : > { %5011 = vpow2.f32 %v4649_v27  ;;  %v2786_v31 = vsub.f32 1.0, %v2785_v58  ;;  %v6912_v27 = vadd.f32 %v2651_v9, %v2620_v61  ;;  %v2626_v61 = vadd.f32 %v6772_v11, %v2625_v53 }
 0x5ea   : > { %v6814_v4 = vpop.f32.mrf.mxu0  ;;  %5013 = vrcp.f32 %v6885_v59  ;;  %vm2794_vm11 = vcmp.eq.f32.partialorder %v2793_v10, 8.507059e+37  ;;  %v2808_v49 = vand.u32 2147483647, %v6858_v60  ;;  %v2653_v9 = vmul.f32 %v6783_v16, %v6488_v63 }
 0x5eb   : > { %v2787_v6 = vmul.f32 %v6862_v50, %v2786_v31  ;;  %vm2819_vm1 = vweird.f32 %v6885_v59 }
 0x5ec   : > { %v6954_v53 = vadd.f32 %v2653_v9, %v2626_v61  ;;  %vm2809_vm15 = vcmp.eq.f32.partialorder %v2808_v49, 8.507059e+37 }
 0x5ed   : > { %3082 = vmatmul.f32.gmra.mxu0 %v3008_v17  ;;  %v2617_v17 = vadd.f32 %v6772_v11, %v2616_v46  ;;  %v2788_v14 = vadd.f32 %v6862_v50, %v2787_v6 }
 0x5ee   : > { %v6889_v45 = vpop.eup %5009 }
 0x5ef   : > { %v6882_v0 = vadd.f32 %v2650_v24, %v2617_v17  ;;  %v5012_v51 = vpop.eup %5011  ;;  %v2652_v24 = vmul.f32 %v6775_v7, %v6485_v8  ;;  %v2628_v8 = vpop.f32.mrf.mxu2  ;;  %vm2805_vm12 = vweird.f32 %v6889_v45 }
 0x5f0   : > { %v6910_v25 = vadd.f32 1.0, %v5012_v51  ;;  %v6917_v17 = vpop.eup %5013  ;;  %vm2806_vm14 = vmor %vm2804_vm13, %vm2805_vm12 }
 0x5f1   : > { %v4650_v30 = vmul.f32 -1.442695, %v6882_v0  ;;  %vm2820_vm0 = vweird.f32 %v6917_v17 }
 0x5f2   : > { %v6829_v35 = vpop.f32.mrf.mxu0  ;;  %vm2821_vm3 = vmor %vm2819_vm1, %vm2820_vm0 }
 0x5f3   : > { %5015 = vpow2.f32 %v4650_v30  ;;  %v2810_v30 = vand.u32 2147483648, %v6858_v60 }
 0x5f4   : > { %5017 = vrcp.f32 %v6910_v25 }
 0x5f5   : > { %3085 = vmatmul.f32.gmra.mxu0 %v3009_v12  ;;  %v2772_v12 = vmul.f32 %v6840_v62, %v2771_v44  ;;  %v2781_v44 = vor.u32 1.1754944e-38, %v2780_v41 }
 0x5f7   : > { %v2773_v2 = vadd.f32 %v6840_v62, %v2772_v12  ;;  %v2631_v16 = vpop.f32.mrf.mxu2 }
 0x5f9   : > { %v2777_v43 = vsel %vm6897_vm6, %v6840_v62, %v2773_v2  ;;  %v5016_v42 = vpop.eup %5015  ;;  %v2796_v2 = vor.u32 1.1754944e-38, %v2795_v36  ;;  %v2629_v36 = vadd.f32 %v6772_v11, %v2628_v8  ;;  %vm2834_vm6 = vweird.f32 %v6910_v25 }
 0x5fa   : > { %v6850_v57 = vpop.f32.mrf.mxu0  ;;  %v2782_v62 = vsel %vm2779_vm7, %v2781_v44, %v2777_v43  ;;  %v6935_v5 = vadd.f32 1.0, %v5016_v42  ;;  %v6937_v31 = vpop.eup %5017  ;;  %v2840_v8 = vand.u32 2147483648, %v6910_v25 }
 0x5fb   : > { %v2981_v12 = vmul.f32 %v2782_v62, %v6795_v3  ;;  %vm2835_vm5 = vweird.f32 %v6937_v31 }
 0x5fc   : > { %vm6992_vm7 = vmor %vm2834_vm6, %vm2835_vm5 }
 0x5fd   : > { %3088 = vmatmul.f32.gmra.mxu0 %v3010_v33  ;;  %v2980_v33 = vmul.f32 %v2767_v15, %v6787_v21  ;;  %v2800_v21 = vmul.f32 %v6889_v45, %v6858_v60 }
 0x5ff   : > { %v2801_v20 = vsub.f32 1.0, %v2800_v21  ;;  %v2811_v21 = vor.u32 1.1754944e-38, %v2810_v30  ;;  %v2634_v30 = vpop.f32.mrf.mxu2 }
 0x601   : > { %v2802_v26 = vmul.f32 %v6889_v45, %v2801_v20  ;;  %v2825_v20 = vand.u32 2147483648, %v6885_v59 }
 0x602   : > { %v3044_v1 = vpop.f32.mrf.mxu0 }
 0x603   : > { %v3092_v46 = vadd.f32 %v3044_v1, %v2979_v52  ;;  %v2623_v52 = vadd.f32 %v6772_v11, %v2622_v55  ;;  %v4651_v1 = vmul.f32 -1.442695, %v6912_v27  ;;  %v2792_v55 = vsel %vm2791_vm10, %v6862_v50, %v2788_v14 }
 0x604   : > { %v2797_v7 = vsel %vm2794_vm11, %v2796_v2, %v2792_v55  ;;  %v2803_v50 = vadd.f32 %v6889_v45, %v2802_v26  ;;  %vm2849_vm10 = vweird.f32 %v6935_v5 }
 0x605   : > { %v3112_v32 = vadd.f32 %v6871_v37, %v3092_v46  ;;  %v6932_v15 = vadd.f32 %v2652_v24, %v2623_v52  ;;  %5019 = vpow2.f32 %v4651_v1  ;;  %v4653_v52 = vmul.f32 -1.442695, %v6954_v53 }
 0x606   : > { %5021 = vrcp.f32 %v6935_v5  ;;  %v2807_v6 = vsel %vm2806_vm14, %v6889_v45, %v2803_v50  ;;  %v2823_v45 = vand.u32 2147483647, %v6885_v59  ;;  %v2632_v50 = vadd.f32 %v6772_v11, %v2631_v16 }
 0x607   : > { %3166 = vmatmul.f32.vlgmr.msrb.gmra.mxu1 %v3112_v32  ;;  %v2815_v32 = vmul.f32 %v6917_v17, %v6885_v59  ;;  %v4652_v41 = vmul.f32 -1.442695, %v6932_v15 }
 0x608   : > { %vm2824_vm4 = vcmp.eq.f32.partialorder %v2823_v45, 8.507059e+37 }
 0x609   : > { %v2816_v54 = vsub.f32 1.0, %v2815_v32  ;;  %5023 = vpow2.f32 %v4652_v41 }
 0x60a   : > { %v3047_v48 = vpop.f32.mrf.mxu0 }
 0x60b   : > { %v3093_v13 = vadd.f32 %v3047_v48, %v2980_v33  ;;  %v2982_v33 = vmul.f32 %v2797_v7, %v6807_v23  ;;  %v2830_v48 = vmul.f32 %v6937_v31, %v6910_v25  ;;  %v5020_v43 = vpop.eup %5019  ;;  %v2817_v23 = vmul.f32 %v6917_v17, %v2816_v54 }
 0x60c   : > { %v6957_v44 = vadd.f32 1.0, %v5020_v43  ;;  %v6961_v63 = vpop.eup %5021  ;;  %v2841_v43 = vor.u32 1.1754944e-38, %v2840_v8  ;;  %v2657_v8 = vmul.f32 %v6829_v35, %v6500_v22 }
 0x60d   : > { %v3113_v34 = vadd.f32 %v6871_v37, %v3093_v13  ;;  %v2831_v62 = vsub.f32 1.0, %v2830_v48  ;;  %v2818_v14 = vadd.f32 %v6917_v17, %v2817_v23  ;;  %v2845_v55 = vmul.f32 %v6961_v63, %v6935_v5 }
 0x60e   : > { %5025 = vrcp.f32 %v6957_v44  ;;  %vm2850_vm9 = vweird.f32 %v6961_v63  ;;  %vm2864_vm14 = vweird.f32 %v6957_v44 }
 0x60f   : > { %3169 = vmatmul.f32.gmra.mxu1 %v3113_v34  ;;  %v2812_v34 = vsel %vm2809_vm15, %v2811_v21, %v2807_v6  ;;  %v2832_v24 = vmul.f32 %v6937_v31, %v2831_v62  ;;  %5027 = vpow2.f32 %v4653_v52  ;;  %v2855_v21 = vand.u32 2147483648, %v6935_v5  ;;  %vm2851_vm11 = vmor %vm2849_vm10, %vm2850_vm9 }
 0x610   : > { %v2983_v1 = vmul.f32 %v2812_v34, %v6822_v29  ;;  %v2826_v29 = vor.u32 1.1754944e-38, %v2825_v20  ;;  %v2635_v34 = vadd.f32 %v6772_v11, %v2634_v30  ;;  %v2656_v52 = vmul.f32 %v6814_v4, %v6497_v40 }
 0x612   : > { %v3050_v46 = vpop.f32.mrf.mxu0 }
 0x613   : > { %v3094_v58 = vadd.f32 %v3050_v46, %v2981_v12  ;;  %v5024_v12 = vpop.eup %5023  ;;  %v2654_v46 = vmul.f32 %v6792_v28, %v6491_v39  ;;  %v2846_v39 = vsub.f32 1.0, %v2845_v55 }
 0x614   : > { %v6976_v26 = vadd.f32 1.0, %v5024_v12  ;;  %v6983_v28 = vpop.eup %5025 }
 0x615   : > { %v3114_v3 = vadd.f32 %v6871_v37, %v3094_v58  ;;  %v2822_v58 = vsel %vm2821_vm3, %v6917_v17, %v2818_v14  ;;  %v6978_v59 = vadd.f32 %v2654_v46, %v2629_v36  ;;  %v2838_v17 = vand.u32 2147483647, %v6910_v25  ;;  %v5028_v49 = vpop.eup %5027 }
 0x616   : > { %v2827_v2 = vsel %vm2824_vm4, %v2826_v29, %v2822_v58  ;;  %5029 = vrcp.f32 %v6976_v26  ;;  %v2655_v25 = vmul.f32 %v6802_v56, %v6494_v47  ;;  %v2847_v48 = vmul.f32 %v6961_v63, %v2846_v39 }
 0x617   : > { %3172 = vmatmul.f32.gmra.mxu1 %v3114_v3  ;;  %v2833_v3 = vadd.f32 %v6937_v31, %v2832_v24  ;;  %v4654_v7 = vmul.f32 -1.442695, %v6978_v59  ;;  %v2984_v54 = vmul.f32 %v2827_v2, %v6836_v19  ;;  %v2860_v19 = vmul.f32 %v6983_v28, %v6957_v44 }
 0x618   : > { %v7004_v9 = vadd.f32 %v2655_v25, %v2632_v50  ;;  %vm2839_vm8 = vcmp.eq.f32.partialorder %v2838_v17, 8.507059e+37  ;;  %v7007_v6 = vadd.f32 1.0, %v5028_v49  ;;  %v2848_v47 = vadd.f32 %v6961_v63, %v2847_v48 }
 0x619   : > { %5031 = vpow2.f32 %v4654_v7  ;;  %v2861_v56 = vsub.f32 1.0, %v2860_v19  ;;  %v2853_v14 = vand.u32 2147483647, %v6935_v5  ;;  %v7026_v5 = vadd.f32 %v2656_v52, %v2635_v34 }
 0x61a   : > { %v3053_v51 = vpop.f32.mrf.mxu0  ;;  %5033 = vrcp.f32 %v7007_v6  ;;  %vm2865_vm13 = vweird.f32 %v6983_v28  ;;  %v2868_v2 = vand.u32 2147483647, %v6957_v44  ;;  %vm2879_vm3 = vweird.f32 %v6976_v26 }
 0x61b   : > { %v3095_v13 = vadd.f32 %v3053_v51, %v2982_v33  ;;  %v2837_v33 = vsel %vm6992_vm7, %v6937_v31, %v2833_v3  ;;  %v2862_v12 = vmul.f32 %v6983_v28, %v2861_v56  ;;  %vm2854_vm12 = vcmp.eq.f32.partialorder %v2853_v14, 8.507059e+37  ;;  %vm2866_vm15 = vmor %vm2864_vm14, %vm2865_vm13 }
 0x61c   : > { %v2842_v31 = vsel %vm2839_vm8, %v2841_v43, %v2837_v33  ;;  %v7009_v23 = vpop.eup %5029  ;;  %v4656_v55 = vmul.f32 -1.442695, %v7026_v5  ;;  %vm2869_vm0 = vcmp.eq.f32.partialorder %v2868_v2, 8.507059e+37  ;;  %v2883_v43 = vand.u32 2147483647, %v6976_v26 }
 0x61d   : > { %v3115_v60 = vadd.f32 %v6871_v37, %v3095_v13  ;;  %v2985_v62 = vmul.f32 %v2842_v31, %v6856_v38  ;;  %v2875_v45 = vmul.f32 %v7009_v23, %v6976_v26  ;;  %v2856_v38 = vor.u32 1.1754944e-38, %v2855_v21 }
 0x61e   : > { %v2863_v40 = vadd.f32 %v6983_v28, %v2862_v12  ;;  %vm2880_vm1 = vweird.f32 %v7009_v23  ;;  %v2658_v56 = vmul.f32 %v6850_v57, %v6503_v18  ;;  %vm2884_vm5 = vcmp.eq.f32.partialorder %v2883_v43, 8.507059e+37 }
 0x61f   : > { %3175 = vmatmul.f32.gmra.mxu1 %v3115_v60  ;;  %v4655_v60 = vmul.f32 -1.442695, %v7004_v9  ;;  %v5032_v20 = vpop.eup %5031  ;;  %v2876_v58 = vsub.f32 1.0, %v2875_v45  ;;  %vm7062_vm4 = vmor %vm2879_vm3, %vm2880_vm1  ;;  %vm2894_vm7 = vweird.f32 %v7007_v6  ;;  %v2898_v52 = vand.u32 2147483647, %v7007_v6 }
 0x620   : > { %v7029_v46 = vadd.f32 1.0, %v5032_v20  ;;  %v7033_v4 = vpop.eup %5033  ;;  %v2867_v50 = vsel %vm2866_vm15, %v6983_v28, %v2863_v40  ;;  %v2885_v28 = vand.u32 2147483648, %v6976_v26 }
 0x621   : > { %5035 = vpow2.f32 %v4655_v60  ;;  %v2877_v39 = vmul.f32 %v7009_v23, %v2876_v58  ;;  %vm2895_vm6 = vweird.f32 %v7033_v4  ;;  %vm2899_vm9 = vcmp.eq.f32.partialorder %v2898_v52, 8.507059e+37 }
 0x622   : > { %v3056_v10 = vpop.f32.mrf.mxu0  ;;  %5037 = vrcp.f32 %v7029_v46  ;;  %v2886_v60 = vor.u32 1.1754944e-38, %v2885_v28  ;;  %vm2896_vm8 = vmor %vm2894_vm7, %vm2895_vm6 }
 0x623   : > { %v3096_v42 = vadd.f32 %v3056_v10, %v2983_v1  ;;  %v2852_v1 = vsel %vm2851_vm11, %v6961_v63, %v2848_v47  ;;  %v2637_v10 = vpop.f32.mrf.mxu2  ;;  %v2870_v63 = vand.u32 2147483648, %v6957_v44  ;;  %5039 = vpow2.f32 %v4656_v55 }
 0x624   : > { %v2638_v29 = vadd.f32 %v6772_v11, %v2637_v10  ;;  %v2878_v49 = vadd.f32 %v7009_v23, %v2877_v39  ;;  %v2915_v55 = vand.u32 2147483648, %v7029_v46  ;;  %vm2909_vm11 = vweird.f32 %v7029_v46 }
 0x625   : > { %v3116_v32 = vadd.f32 %v6871_v37, %v3096_v42  ;;  %v2857_v42 = vsel %vm2854_vm12, %v2856_v38, %v2852_v1  ;;  %v2871_v41 = vor.u32 1.1754944e-38, %v2870_v63 }
 0x626   : > { %v2882_v31 = vsel %vm7062_vm4, %v7009_v23, %v2878_v49 }
 0x627   : > { %3178 = vmatmul.f32.gmra.mxu1 %v3116_v32  ;;  %v2986_v32 = vmul.f32 %v2857_v42, %v6882_v0  ;;  %v5036_v17 = vpop.eup %5035  ;;  %v7048_v0 = vadd.f32 %v2657_v8, %v2638_v29  ;;  %v2872_v33 = vsel %vm2869_vm0, %v2871_v41, %v2867_v50  ;;  %v2887_v23 = vsel %vm2884_vm5, %v2886_v60, %v2882_v31 }
 0x628   : > { %v7051_v30 = vadd.f32 1.0, %v5036_v17  ;;  %v7055_v35 = vpop.eup %5037  ;;  %v2987_v48 = vmul.f32 %v2872_v33, %v6912_v27  ;;  %v2988_v20 = vmul.f32 %v2887_v23, %v6932_v15  ;;  %v2916_v50 = vor.u32 1.1754944e-38, %v2915_v55 }
 0x629   : > { %v4657_v25 = vmul.f32 -1.442695, %v7048_v0  ;;  %v5040_v47 = vpop.eup %5039  ;;  %v2905_v21 = vmul.f32 %v7055_v35, %v7029_v46  ;;  %vm2910_vm10 = vweird.f32 %v7055_v35 }
 0x62a   : > { %v3059_v61 = vpop.f32.mrf.mxu0  ;;  %5041 = vrcp.f32 %v7051_v30  ;;  %vm2911_vm12 = vmor %vm2909_vm11, %vm2910_vm10  ;;  %v2930_v33 = vand.u32 2147483648, %v7051_v30  ;;  %vm2924_vm15 = vweird.f32 %v7051_v30 }
 0x62b   : > { %v3097_v51 = vadd.f32 %v3059_v61, %v2984_v54  ;;  %v2890_v54 = vmul.f32 %v7033_v4, %v7007_v6  ;;  %v2640_v61 = vpop.f32.mrf.mxu2  ;;  %5043 = vpow2.f32 %v4657_v25  ;;  %v2906_v18 = vsub.f32 1.0, %v2905_v21 }
 0x62c   : > { %v2931_v19 = vor.u32 1.1754944e-38, %v2930_v33 }
 0x62d   : > { %v3117_v13 = vadd.f32 %v6871_v37, %v3097_v51  ;;  %v2891_v22 = vsub.f32 1.0, %v2890_v54  ;;  %v2641_v51 = vadd.f32 %v6772_v11, %v2640_v61  ;;  %v2907_v38 = vmul.f32 %v7055_v35, %v2906_v18 }
 0x62f   : > { %3181 = vmatmul.f32.gmra.mxu1 %v3117_v13  ;;  %v2892_v27 = vmul.f32 %v7033_v4, %v2891_v22  ;;  %v7076_v26 = vadd.f32 %v2658_v56, %v2641_v51  ;;  %v2908_v40 = vadd.f32 %v7055_v35, %v2907_v38  ;;  %v2928_v22 = vand.u32 2147483647, %v7051_v30 }
 0x630   : > { %v7083_v57 = vpop.eup %5041 }
 0x631   : > { %v2893_v14 = vadd.f32 %v7033_v4, %v2892_v27  ;;  %v4658_v45 = vmul.f32 -1.442695, %v7076_v26  ;;  %v5044_v1 = vpop.eup %5043  ;;  %v2912_v17 = vsel %vm2911_vm12, %v7055_v35, %v2908_v40  ;;  %vm2925_vm14 = vweird.f32 %v7083_v57 }
 0x632   : > { %v3062_v16 = vpop.f32.mrf.mxu0  ;;  %v7096_v58 = vadd.f32 1.0, %v5044_v1  ;;  %vm2926_vm0 = vmor %vm2924_vm15, %vm2925_vm14  ;;  %vm2929_vm1 = vcmp.eq.f32.partialorder %v2928_v22, 8.507059e+37 }
 0x633   : > { %v3098_v36 = vadd.f32 %v3062_v16, %v2985_v62  ;;  %v7079_v62 = vadd.f32 1.0, %v5040_v47  ;;  %v2900_v16 = vand.u32 2147483648, %v7007_v6  ;;  %v2897_v10 = vsel %vm2896_vm8, %v7033_v4, %v2893_v14 }
 0x634   : > { %vm2954_vm8 = vweird.f32 %v7096_v58 }
 0x635   : > { %v3118_v24 = vadd.f32 %v6871_v37, %v3098_v36  ;;  %5045 = vrcp.f32 %v7079_v62  ;;  %v2901_v42 = vor.u32 1.1754944e-38, %v2900_v16  ;;  %v2945_v47 = vand.u32 2147483648, %v7079_v62 }
 0x636   : > { %5047 = vpow2.f32 %v4658_v45  ;;  %vm2939_vm4 = vweird.f32 %v7079_v62  ;;  %v2960_v45 = vand.u32 2147483648, %v7096_v58 }
 0x637   : > { %3184 = vmatmul.f32.gmra.mxu1 %v3118_v24  ;;  %v2920_v24 = vmul.f32 %v7083_v57, %v7051_v30  ;;  %v2902_v6 = vsel %vm2899_vm9, %v2901_v42, %v2897_v10  ;;  %5049 = vrcp.f32 %v7096_v58  ;;  %v2946_v14 = vor.u32 1.1754944e-38, %v2945_v47 }
 0x638   : > { %v2989_v29 = vmul.f32 %v2902_v6, %v6954_v53  ;;  %v2961_v10 = vor.u32 1.1754944e-38, %v2960_v45 }
 0x639   : > { %v2921_v63 = vsub.f32 1.0, %v2920_v24 }
 0x63a   : > { %v3065_v3 = vpop.f32.mrf.mxu0 }
 0x63b   : > { %v3099_v7 = vadd.f32 %v3065_v3, %v2986_v32  ;;  %v5046_v4 = vpop.eup %5045  ;;  %v2913_v32 = vand.u32 2147483647, %v7029_v46  ;;  %v2922_v8 = vmul.f32 %v7083_v57, %v2921_v63 }
 0x63c   : > { %v5048_v3 = vpop.eup %5047  ;;  %vm2940_vm3 = vweird.f32 %v5046_v4 }
 0x63d   : > { %v3119_v44 = vadd.f32 %v6871_v37, %v3099_v7  ;;  %v2935_v7 = vmul.f32 %v5046_v4, %v7079_v62  ;;  %vm2914_vm13 = vcmp.eq.f32.partialorder %v2913_v32, 8.507059e+37  ;;  %v7109_v53 = vadd.f32 1.0, %v5048_v3  ;;  %v5050_v61 = vpop.eup %5049  ;;  %vm2941_vm5 = vmor %vm2939_vm4, %vm2940_vm3 }
 0x63e   : > { %v2917_v41 = vsel %vm2914_vm13, %v2916_v50, %v2912_v17  ;;  %v2923_v46 = vadd.f32 %v7083_v57, %v2922_v8  ;;  %vm2955_vm7 = vweird.f32 %v5050_v61 }
 0x63f   : > { %3187 = vmatmul.f32.gmra.mxu1 %v3119_v44  ;;  %v2936_v44 = vsub.f32 1.0, %v2935_v7  ;;  %v2990_v49 = vmul.f32 %v2917_v41, %v6978_v59  ;;  %5051 = vrcp.f32 %v7109_v53  ;;  %vm2956_vm9 = vmor %vm2954_vm8, %vm2955_vm7  ;;  %vm2969_vm12 = vweird.f32 %v7109_v53  ;;  %v3145_v7 = vld [vmem:[%s7648_s26] sm:$0xff]  ;;  %s5497_s26 = scalar_lea.hbm %s5496_s23, 128 }
 0x640   : > { %v2927_v25 = vsel %vm2926_vm0, %v7083_v57, %v2923_v46  ;;  %3663 = vmatpush.msrb.mxu3 %v3145_v7  ;;  %3811 = vmatpush.msra.mxu0 %v3145_v7  ;;  %p5498_p1 = scmp.ne.s32.totalorder %s5496_s23, %s5497_s26 }
 0x641   : > { %v2937_v51 = vmul.f32 %v5046_v4, %v2936_v44 }
 0x642   : > { %v3068_v13 = vpop.f32.mrf.mxu0  ;;  %p5499_p3 = pnand %p5498_p1, %p5804_p5 }
 0x643   : > { %v3100_v11 = vadd.f32 %v3068_v13, %v2987_v48  ;;  %v2950_v48 = vmul.f32 %v5050_v61, %v7096_v58  ;;  %v2932_v13 = vsel %vm2929_vm1, %v2931_v19, %v2927_v25  ;;  %v2938_v59 = vadd.f32 %v5046_v4, %v2937_v51 }
 0x644   : > { %v2991_v56 = vmul.f32 %v2932_v13, %v7004_v9  ;;  %p5500_p12 = pneg %p5499_p3 }
 0x645   : > { %v3120_v34 = vadd.f32 %v6871_v37, %v3100_v11  ;;  %v2951_v31 = vsub.f32 1.0, %v2950_v48  ;;  %v5052_v30 = vpop.eup %5051  ;;  %v2943_v11 = vand.u32 2147483647, %v7079_v62  ;;  %v2942_v60 = vsel %vm2941_vm5, %v5046_v4, %v2938_v59 }
 0x646   : > { %v2965_v23 = vmul.f32 %v5052_v30, %v7109_v53  ;;  %vm2970_vm11 = vweird.f32 %v5052_v30 }
 0x647   : > { %3190 = vmatmul.f32.gmra.mxu1 %v3120_v34  ;;  %v2952_v34 = vmul.f32 %v5050_v61, %v2951_v31  ;;  %vm2944_vm6 = vcmp.eq.f32.partialorder %v2943_v11, 8.507059e+37  ;;  %vm2971_vm13 = vmor %vm2969_vm12, %vm2970_vm11 }
 0x648   : > { %v2947_v57 = vsel %vm2944_vm6, %v2946_v14, %v2942_v60  ;;  %v2966_v9 = vsub.f32 1.0, %v2965_v23 }
 0x649   : > { %v2953_v16 = vadd.f32 %v5050_v61, %v2952_v34  ;;  %v2992_v62 = vmul.f32 %v2947_v57, %v7026_v5 }
 0x64a   : > { %v3071_v36 = vpop.f32.mrf.mxu0 }
 0x64b   : > { %v3101_v12 = vadd.f32 %v3071_v36, %v2988_v20  ;;  %v2958_v20 = vand.u32 2147483647, %v7096_v58  ;;  %v2957_v1 = vsel %vm2956_vm9, %v5050_v61, %v2953_v16  ;;  %v2973_v58 = vand.u32 2147483647, %v7109_v53 }
 0x64d   : > { %v3121_v15 = vadd.f32 %v6871_v37, %v3101_v12  ;;  %v2967_v12 = vmul.f32 %v5052_v30, %v2966_v9  ;;  %vm2959_vm10 = vcmp.eq.f32.partialorder %v2958_v20, 8.507059e+37  ;;  %vm2974_vm14 = vcmp.eq.f32.partialorder %v2973_v58, 8.507059e+37 }
 0x64e   : > { %v2962_v24 = vsel %vm2959_vm10, %v2961_v10, %v2957_v1 }
 0x64f   : > { %3193 = vmatmul.f32.gmra.mxu1 %v3121_v15  ;;  %v2968_v42 = vadd.f32 %v5052_v30, %v2967_v12  ;;  %v2975_v15 = vand.u32 2147483648, %v7109_v53  ;;  %v2993_v5 = vmul.f32 %v2962_v24, %v7048_v0 }
 0x651   : > { %v2972_v63 = vsel %vm2971_vm13, %v5052_v30, %v2968_v42  ;;  %v2976_v4 = vor.u32 1.1754944e-38, %v2975_v15 }
 0x652   : > { %v3074_v2 = vpop.f32.mrf.mxu0 }
 0x653   : > { %v3102_v39 = vadd.f32 %v3074_v2, %v2989_v29  ;;  %v2977_v29 = vsel %vm2974_vm14, %v2976_v4, %v2972_v63 }
 0x654   : > { %v2994_v32 = vmul.f32 %v2977_v29, %v7076_v26 }
 0x655   : > { %v3122_v54 = vadd.f32 %v6871_v37, %v3102_v39  ;;  %v4858_v39 = vld [vmem:[%s7647_s14] ss:$0 sm:$0xff]  ;;  %s4359_s14 = sshll.u32 %s7473_s17, 4  ;;  %s4360_s14 = int_to_ptr.vmem [resolvable:$true] %s4359_s14 }
 0x657   : > { %3196 = vmatmul.f32.gmra.mxu1 %v3122_v54 }
 0x65a   : > { %v3077_v35 = vpop.f32.mrf.mxu0 }
 0x65b   : > { %v3103_v28 = vadd.f32 %v3077_v35, %v2990_v49 }
 0x65d   : > { %v3123_v43 = vadd.f32 %v6871_v37, %v3103_v28 }
 0x65f   : > { %3199 = vmatmul.f32.gmra.mxu1 %v3123_v43 }
 0x662   : > { %v3080_v27 = vpop.f32.mrf.mxu0 }
 0x663   : > { %v3104_v21 = vadd.f32 %v3080_v27, %v2991_v56 }
 0x665   : > { %v3124_v18 = vadd.f32 %v6871_v37, %v3104_v21 }
 0x667   : > { %3202 = vmatmul.f32.gmra.mxu1 %v3124_v18 }
 0x66a   : > { %v3083_v52 = vpop.f32.mrf.mxu0 }
 0x66b   : > { %v3105_v36 = vadd.f32 %v3083_v52, %v2992_v62 }
 0x66d   : > { %v3125_v38 = vadd.f32 %v6871_v37, %v3105_v36 }
 0x66f   : > { %3205 = vmatmul.f32.gmra.mxu1 %v3125_v38 }
 0x672   : > { %v3086_v6 = vpop.f32.mrf.mxu0 }
 0x673   : > { %v3106_v40 = vadd.f32 %v3086_v6, %v2993_v5 }
 0x675   : > { %v3126_v55 = vadd.f32 %v6871_v37, %v3106_v40 }
 0x677   : > { %3208 = vmatmul.f32.gmra.mxu1 %v3126_v55 }
 0x67a   : > { %v3089_v2 = vpop.f32.mrf.mxu0 }
 0x67b   : > { %v3107_v3 = vadd.f32 %v3089_v2, %v2994_v32 }
 0x67d   : > { %v3127_v0 = vadd.f32 %v6871_v37, %v3107_v3 }
 0x67f   : > { %3211 = vmatmul.f32.gmra.mxu1 %v3127_v0 }
 0x684   : > { %v3167_v17 = vpop.f32.mrf.mxu1 }
 0x685   : > { %v7142_v8 = vadd.f32 %v4858_v39, %v3167_v17 }
 0x687   : > { %3247 = vmatmul.f32.vlgmr.msrb.gmra.mxu2 %v7142_v8  ;;  %v3215_v23 = vmul.f32 %v7142_v8, %v7142_v8 }
 0x68c   : > { %v3170_v26 = vpop.f32.mrf.mxu1 }
 0x68d   : > { %v7148_v50 = vadd.f32 %v4858_v39, %v3170_v26 }
 0x68f   : > { %3250 = vmatmul.f32.gmra.mxu2 %v7148_v50  ;;  %v3216_v18 = vmul.f32 %v7148_v50, %v7148_v50 }
 0x694   : > { %v3173_v37 = vpop.f32.mrf.mxu1 }
 0x695   : > { %v7151_v54 = vadd.f32 %v4858_v39, %v3173_v37 }
 0x697   : > { %3253 = vmatmul.f32.gmra.mxu2 %v7151_v54  ;;  %v3217_v16 = vmul.f32 %v7151_v54, %v7151_v54 }
 0x69c   : > { %v3176_v53 = vpop.f32.mrf.mxu1 }
 0x69d   : > { %v7154_v41 = vadd.f32 %v4858_v39, %v3176_v53 }
 0x69f   : > { %3256 = vmatmul.f32.gmra.mxu2 %v7154_v41  ;;  %v3218_v45 = vmul.f32 %v7154_v41, %v7154_v41 }
 0x6a4   : > { %v3179_v46 = vpop.f32.mrf.mxu1 }
 0x6a5   : > { %v7157_v44 = vadd.f32 %v4858_v39, %v3179_v46 }
 0x6a7   : > { %3259 = vmatmul.f32.gmra.mxu2 %v7157_v44  ;;  %v3219_v20 = vmul.f32 %v7157_v44, %v7157_v44 }
 0x6ac   : > { %v3182_v61 = vpop.f32.mrf.mxu1 }
 0x6ad   : > { %v7160_v33 = vadd.f32 %v4858_v39, %v3182_v61 }
 0x6af   : > { %3262 = vmatmul.f32.gmra.mxu2 %v7160_v33  ;;  %v3220_v36 = vmul.f32 %v7160_v33, %v7160_v33 }
 0x6b4   : > { %v3185_v49 = vpop.f32.mrf.mxu1 }
 0x6b5   : > { %v7163_v22 = vadd.f32 %v4858_v39, %v3185_v49 }
 0x6b7   : > { %3265 = vmatmul.f32.gmra.mxu2 %v7163_v22  ;;  %v3221_v12 = vmul.f32 %v7163_v22, %v7163_v22 }
 0x6bc   : > { %v3188_v35 = vpop.f32.mrf.mxu1 }
 0x6bd   : > { %v7166_v28 = vadd.f32 %v4858_v39, %v3188_v35 }
 0x6bf   : > { %3268 = vmatmul.f32.gmra.mxu2 %v7166_v28  ;;  %v3222_v38 = vmul.f32 %v7166_v28, %v7166_v28 }
 0x6c4   : > { %v3191_v25 = vpop.f32.mrf.mxu1 }
 0x6c5   : > { %v7169_v51 = vadd.f32 %v4858_v39, %v3191_v25 }
 0x6c7   : > { %3271 = vmatmul.f32.gmra.mxu2 %v7169_v51  ;;  %v3223_v42 = vmul.f32 %v7169_v51, %v7169_v51 }
 0x6cc   : > { %v3194_v48 = vpop.f32.mrf.mxu1 }
 0x6cd   : > { %v7172_v19 = vadd.f32 %v4858_v39, %v3194_v48 }
 0x6cf   : > { %3274 = vmatmul.f32.gmra.mxu2 %v7172_v19  ;;  %v3224_v5 = vmul.f32 %v7172_v19, %v7172_v19 }
 0x6d4   : > { %v3197_v43 = vpop.f32.mrf.mxu1 }
 0x6d5   : > { %v7175_v13 = vadd.f32 %v4858_v39, %v3197_v43 }
 0x6d7   : > { %3277 = vmatmul.f32.gmra.mxu2 %v7175_v13  ;;  %v3225_v6 = vmul.f32 %v7175_v13, %v7175_v13 }
 0x6dc   : > { %v3200_v59 = vpop.f32.mrf.mxu1 }
 0x6dd   : > { %v7178_v31 = vadd.f32 %v4858_v39, %v3200_v59 }
 0x6df   : > { %3280 = vmatmul.f32.gmra.mxu2 %v7178_v31  ;;  %v3226_v63 = vmul.f32 %v7178_v31, %v7178_v31 }
 0x6e4   : > { %v3203_v30 = vpop.f32.mrf.mxu1 }
 0x6e5   : > { %v7181_v47 = vadd.f32 %v4858_v39, %v3203_v30 }
 0x6e7   : > { %3283 = vmatmul.f32.gmra.mxu2 %v7181_v47  ;;  %v3227_v55 = vmul.f32 %v7181_v47, %v7181_v47 }
 0x6ec   : > { %v3206_v56 = vpop.f32.mrf.mxu1 }
 0x6ed   : > { %v7184_v11 = vadd.f32 %v4858_v39, %v3206_v56 }
 0x6ef   : > { %3286 = vmatmul.f32.gmra.mxu2 %v7184_v11  ;;  %v3228_v32 = vmul.f32 %v7184_v11, %v7184_v11 }
 0x6f4   : > { %v3209_v27 = vpop.f32.mrf.mxu1 }
 0x6f5   : > { %v7187_v21 = vadd.f32 %v4858_v39, %v3209_v27 }
 0x6f7   : > { %3289 = vmatmul.f32.gmra.mxu2 %v7187_v21  ;;  %v3229_v3 = vmul.f32 %v7187_v21, %v7187_v21 }
 0x6fc   : > { %v3212_v60 = vpop.f32.mrf.mxu1 }
 0x6fd   : > { %v7190_v34 = vadd.f32 %v4858_v39, %v3212_v60 }
 0x6ff   : > { %3292 = vmatmul.f32.gmra.mxu2 %v7190_v34  ;;  %v3230_v39 = vmul.f32 %v7190_v34, %v7190_v34 }
 0x707   : > { %3295 = vmatmul.f32.gmra.mxu2 %v3215_v23 }
 0x70a   : > { %v3248_v14 = vpop.f32.mrf.mxu2 }
 0x70b   : > { %v3344_v7 = vmul.f32 0.125, %v3248_v14 }
 0x70d   : > { %v3376_v37 = vmul.f32 %v3344_v7, %v3344_v7 }
 0x70f   : > { %3298 = vmatmul.f32.gmra.mxu2 %v3216_v18 }
 0x712   : > { %v3251_v57 = vpop.f32.mrf.mxu2 }
 0x713   : > { %v3345_v61 = vmul.f32 0.125, %v3251_v57 }
 0x715   : > { %v3377_v48 = vmul.f32 %v3345_v61, %v3345_v61 }
 0x717   : > { %3301 = vmatmul.f32.gmra.mxu2 %v3217_v16 }
 0x71a   : > { %v3254_v9 = vpop.f32.mrf.mxu2 }
 0x71b   : > { %v7249_v30 = vmul.f32 0.125, %v3254_v9 }
 0x71d   : > { %v3378_v14 = vmul.f32 %v7249_v30, %v7249_v30 }
 0x71f   : > { %3304 = vmatmul.f32.gmra.mxu2 %v3218_v45 }
 0x722   : > { %v3257_v62 = vpop.f32.mrf.mxu2 }
 0x727   : > { %3307 = vmatmul.f32.gmra.mxu2 %v3219_v20 }
 0x72a   : > { %v7203_v52 = vpop.f32.mrf.mxu2 }
 0x72f   : > { %3310 = vmatmul.f32.gmra.mxu2 %v3220_v36  ;;  %v7253_v36 = vmul.f32 0.125, %v3257_v62 }
 0x732   : > { %v7207_v1 = vpop.f32.mrf.mxu2 }
 0x737   : > { %3313 = vmatmul.f32.gmra.mxu2 %v3221_v12 }
 0x73a   : > { %v7211_v10 = vpop.f32.mrf.mxu2 }
 0x73f   : > { %3316 = vmatmul.f32.gmra.mxu2 %v3222_v38 }
 0x742   : > { %v7215_v24 = vpop.f32.mrf.mxu2 }
 0x747   : > { %3319 = vmatmul.f32.gmra.mxu2 %v3223_v42 }
 0x74a   : > { %v7219_v15 = vpop.f32.mrf.mxu2 }
 0x74f   : > { %3322 = vmatmul.f32.gmra.mxu2 %v3224_v5 }
 0x752   : > { %v7223_v58 = vpop.f32.mrf.mxu2 }
 0x757   : > { %3325 = vmatmul.f32.gmra.mxu2 %v3225_v6 }
 0x75a   : > { %v7227_v40 = vpop.f32.mrf.mxu2 }
 0x75f   : > { %3328 = vmatmul.f32.gmra.mxu2 %v3226_v63 }
 0x762   : > { %v7231_v4 = vpop.f32.mrf.mxu2 }
 0x767   : > { %3331 = vmatmul.f32.gmra.mxu2 %v3227_v55  ;;  %v3713_v55 = vsub.f32 0.0, %v3344_v7 }
 0x76a   : > { %v7235_v29 = vpop.f32.mrf.mxu2 }
 0x76f   : > { %3334 = vmatmul.f32.gmra.mxu2 %v3228_v32  ;;  %v3379_v32 = vmul.f32 %v7253_v36, %v7253_v36 }
 0x772   : > { %v7239_v2 = vpop.f32.mrf.mxu2 }
 0x777   : > { %3337 = vmatmul.f32.gmra.mxu2 %v3229_v3 }
 0x77a   : > { %v7243_v0 = vpop.f32.mrf.mxu2 }
 0x77f   : > { %3340 = vmatmul.f32.gmra.mxu2 %v3230_v39 }
 0x782   : > { %v7247_v17 = vpop.f32.mrf.mxu2 }
 0x78a   : > { %v3296_v26 = vpop.f32.mrf.mxu2 }
 0x78b   : > { %v3360_v53 = vmul.f32 0.125, %v3296_v26 }
 0x78d   : > { %v3392_v46 = vsub.f32 %v3360_v53, %v3376_v37 }
 0x78f   : > { %v3408_v49 = vmax.f32 %v3392_v46, 0.0  ;;  %v7259_v46 = vmul.f32 0.125, %v7203_v52 }
 0x791   : > { %v3424_v35 = vadd.f32 1e-05, %v3408_v49 }
 0x792   : > { %v3299_v25 = vpop.f32.mrf.mxu2 }
 0x793   : > { %5053 = vrsqrt.f32 %v3424_v35  ;;  %v3361_v43 = vmul.f32 0.125, %v3299_v25  ;;  %vm3446_vm0 = vweird.f32 %v3424_v35 }
 0x795   : > { %v3393_v59 = vsub.f32 %v3361_v43, %v3377_v48 }
 0x797   : > { %v3409_v56 = vmax.f32 %v3393_v59, 0.0 }
 0x799   : > { %v5054_v27 = vpop.eup %5053  ;;  %v3425_v60 = vadd.f32 1e-05, %v3409_v56  ;;  %v3714_v56 = vsub.f32 0.0, %v3345_v61 }
 0x79a   : > { %v3441_v23 = vmul.f32 %v5054_v27, %v3424_v35  ;;  %v3302_v18 = vpop.f32.mrf.mxu2  ;;  %vm3447_vm15 = vweird.f32 %v5054_v27 }
 0x79b   : > { %5055 = vrsqrt.f32 %v3425_v60  ;;  %v3362_v16 = vmul.f32 0.125, %v3302_v18  ;;  %vm3448_vm1 = vmor %vm3446_vm0, %vm3447_vm15  ;;  %vm3456_vm4 = vweird.f32 %v3425_v60 }
 0x79c   : > { %v3442_v57 = vmul.f32 %v5054_v27, %v3441_v23 }
 0x79d   : > { %v3394_v45 = vsub.f32 %v3362_v16, %v3378_v14 }
 0x79e   : > { %v3443_v20 = vmul.f32 0.5, %v3442_v57 }
 0x79f   : > { %v3410_v12 = vmax.f32 %v3394_v45, 0.0  ;;  %v7266_v45 = vmul.f32 0.125, %v7207_v1 }
 0x7a0   : > { %v3444_v38 = vsub.f32 1.5, %v3443_v20 }
 0x7a1   : > { %v5056_v9 = vpop.eup %5055  ;;  %v3426_v42 = vadd.f32 1e-05, %v3410_v12 }
 0x7a2   : > { %v3451_v5 = vmul.f32 %v5056_v9, %v3425_v60  ;;  %v3305_v6 = vpop.f32.mrf.mxu2  ;;  %v3445_v63 = vmul.f32 %v5054_v27, %v3444_v38  ;;  %vm3457_vm3 = vweird.f32 %v5056_v9 }
 0x7a3   : > { %5057 = vrsqrt.f32 %v3426_v42  ;;  %v3363_v3 = vmul.f32 0.125, %v3305_v6  ;;  %vm3458_vm5 = vmor %vm3456_vm4, %vm3457_vm3  ;;  %vm3466_vm7 = vweird.f32 %v3426_v42 }
 0x7a4   : > { %v3452_v39 = vmul.f32 %v5056_v9, %v3451_v5  ;;  %v3449_v26 = vsel %vm3448_vm1, %v5054_v27, %v3445_v63  ;;  %v3380_v27 = vmul.f32 %v7259_v46, %v7259_v46  ;;  %v3381_v63 = vmul.f32 %v7266_v45, %v7266_v45 }
 0x7a5   : > { %v3395_v62 = vsub.f32 %v3363_v3, %v3379_v32  ;;  %4659 = vmatmul.msk.f32.vlgmr.msrb.gmra.mxu3 %vm1296_vm2, %v3449_v26  ;;  %v3729_v37 = vmul.f32 %v3713_v55, %v3449_v26 }
 0x7a6   : > { %v3453_v53 = vmul.f32 0.5, %v3452_v39 }
 0x7a7   : > { %v3411_v49 = vmax.f32 %v3395_v62, 0.0  ;;  %4675 = vmatmul.msk.f32.vlgmr.msra.gmra.mxu0 %vm1296_vm2, %v3729_v37  ;;  %v7274_v62 = vmul.f32 0.125, %v7211_v10 }
 0x7a8   : > { %v3454_v7 = vsub.f32 1.5, %v3453_v53 }
 0x7a9   : > { %v5058_v35 = vpop.eup %5057  ;;  %v3427_v25 = vadd.f32 1e-05, %v3411_v49 }
 0x7aa   : > { %v3461_v48 = vmul.f32 %v5058_v35, %v3426_v42  ;;  %v3308_v43 = vpop.f32.mrf.mxu2  ;;  %v3455_v59 = vmul.f32 %v5056_v9, %v3454_v7  ;;  %vm3467_vm6 = vweird.f32 %v5058_v35 }
 0x7ab   : > { %5059 = vrsqrt.f32 %v3427_v25  ;;  %v3364_v23 = vmul.f32 0.125, %v3308_v43  ;;  %vm3468_vm8 = vmor %vm3466_vm7, %vm3467_vm6  ;;  %vm3476_vm10 = vweird.f32 %v3427_v25  ;;  %v3382_v43 = vmul.f32 %v7274_v62, %v7274_v62 }
 0x7ac   : > { %v3462_v52 = vmul.f32 %v5058_v35, %v3461_v48  ;;  %v3459_v18 = vsel %vm3458_vm5, %v5056_v9, %v3455_v59  ;;  %v3715_v9 = vsub.f32 0.0, %v7249_v30 }
 0x7ad   : > { %v3396_v14 = vsub.f32 %v3364_v23, %v3380_v27  ;;  %4660 = vmatmul.msk.f32.gmra.mxu3 %vm1296_vm2, %v3459_v18  ;;  %v3730_v16 = vmul.f32 %v3714_v56, %v3459_v18  ;;  %v4228_v27 = vld [vmem:[#allocation17 + $0x78] sm:$0xff] }
 0x7ae   : > { %v3463_v57 = vmul.f32 0.5, %v3462_v52  ;;  %4229 = vmatpush.msra.mxu1 %v4228_v27  ;;  %v7298_v27 = vmul.f32 0.125, %v7223_v58 }
 0x7af   : > { %v3412_v20 = vmax.f32 %v3396_v14, 0.0  ;;  %4676 = vmatmul.msk.f32.gmra.mxu0 %vm1296_vm2, %v3730_v16  ;;  %v7282_v14 = vmul.f32 0.125, %v7215_v24 }
 0x7b0   : > { %v3464_v61 = vsub.f32 1.5, %v3463_v57 }
 0x7b1   : > { %v5060_v60 = vpop.eup %5059  ;;  %v3428_v12 = vadd.f32 1e-05, %v3412_v20 }
 0x7b2   : > { %v3471_v38 = vmul.f32 %v5060_v60, %v3427_v25  ;;  %v3311_v5 = vpop.f32.mrf.mxu2  ;;  %v3465_v6 = vmul.f32 %v5058_v35, %v3464_v61  ;;  %vm3477_vm9 = vweird.f32 %v5060_v60 }
 0x7b3   : > { %5061 = vrsqrt.f32 %v3428_v12  ;;  %v3365_v55 = vmul.f32 0.125, %v3311_v5  ;;  %vm3478_vm11 = vmor %vm3476_vm10, %vm3477_vm9  ;;  %vm3486_vm13 = vweird.f32 %v3428_v12  ;;  %v3383_v5 = vmul.f32 %v7282_v14, %v7282_v14 }
 0x7b4   : > { %v3472_v1 = vmul.f32 %v5060_v60, %v3471_v38  ;;  %v3469_v32 = vsel %vm3468_vm8, %v5058_v35, %v3465_v6  ;;  %v3716_v35 = vsub.f32 0.0, %v7253_v36  ;;  %v3717_v38 = vsub.f32 0.0, %v7259_v46 }
 0x7b5   : > { %v3397_v3 = vsub.f32 %v3365_v55, %v3381_v63  ;;  %4661 = vmatmul.msk.f32.gmra.mxu3 %vm1296_vm2, %v3469_v32  ;;  %v3731_v39 = vmul.f32 %v3715_v9, %v3469_v32  ;;  %v4227_v63 = vld [vmem:[#allocation17 + $0x70] sm:$0xff] }
 0x7b6   : > { %v3473_v26 = vmul.f32 0.5, %v3472_v1  ;;  %4230 = vmatpush.msra.mxu1 %v4227_v63 }
 0x7b7   : > { %v3413_v37 = vmax.f32 %v3397_v3, 0.0  ;;  %4677 = vmatmul.msk.f32.gmra.mxu0 %vm1296_vm2, %v3731_v39  ;;  %v7290_v3 = vmul.f32 0.125, %v7219_v15 }
 0x7b8   : > { %v3474_v30 = vsub.f32 1.5, %v3473_v26 }
 0x7b9   : > { %v5062_v42 = vpop.eup %5061  ;;  %v3429_v53 = vadd.f32 1e-05, %v3413_v37 }
 0x7ba   : > { %v3481_v49 = vmul.f32 %v5062_v42, %v3428_v12  ;;  %v3314_v7 = vpop.f32.mrf.mxu2  ;;  %v3475_v48 = vmul.f32 %v5060_v60, %v3474_v30  ;;  %vm3487_vm12 = vweird.f32 %v5062_v42 }
 0x7bb   : > { %5063 = vrsqrt.f32 %v3429_v53  ;;  %v3366_v59 = vmul.f32 0.125, %v3314_v7  ;;  %vm3488_vm14 = vmor %vm3486_vm13, %vm3487_vm12  ;;  %vm3496_vm0 = vweird.f32 %v3429_v53  ;;  %v3384_v7 = vmul.f32 %v7290_v3, %v7290_v3 }
 0x7bc   : > { %v3482_v10 = vmul.f32 %v5062_v42, %v3481_v49  ;;  %v3479_v56 = vsel %vm3478_vm11, %v5060_v60, %v3475_v48  ;;  %v3718_v49 = vsub.f32 0.0, %v7266_v45 }
 0x7bd   : > { %v3398_v23 = vsub.f32 %v3366_v59, %v3382_v43  ;;  %4662 = vmatmul.msk.f32.gmra.mxu3 %vm1296_vm2, %v3479_v56  ;;  %v3732_v52 = vmul.f32 %v3716_v35, %v3479_v56  ;;  %v4226_v43 = vld [vmem:[#allocation17 + $0x68] sm:$0xff] }
 0x7be   : > { %v3483_v18 = vmul.f32 0.5, %v3482_v10  ;;  %4231 = vmatpush.msra.mxu1 %v4226_v43 }
 0x7bf   : > { %v3414_v25 = vmax.f32 %v3398_v23, 0.0  ;;  %4678 = vmatmul.msk.f32.gmra.mxu0 %vm1296_vm2, %v3732_v52 }
 0x7c0   : > { %v3484_v36 = vsub.f32 1.5, %v3483_v18 }
 0x7c1   : > { %v5064_v16 = vpop.eup %5063  ;;  %v3430_v57 = vadd.f32 1e-05, %v3414_v25 }
 0x7c2   : > { %v3491_v20 = vmul.f32 %v5064_v16, %v3429_v53  ;;  %v3317_v61 = vpop.f32.mrf.mxu2  ;;  %v3485_v60 = vmul.f32 %v5062_v42, %v3484_v36  ;;  %vm3497_vm15 = vweird.f32 %v5064_v16 }
 0x7c3   : > { %5065 = vrsqrt.f32 %v3430_v57  ;;  %v3367_v6 = vmul.f32 0.125, %v3317_v61  ;;  %vm3498_vm1 = vmor %vm3496_vm0, %vm3497_vm15  ;;  %vm3506_vm4 = vweird.f32 %v3430_v57 }
 0x7c4   : > { %v3492_v24 = vmul.f32 %v5064_v16, %v3491_v20  ;;  %v3489_v9 = vsel %vm3488_vm14, %v5062_v42, %v3485_v60  ;;  %v3385_v20 = vmul.f32 %v7298_v27, %v7298_v27 }
 0x7c5   : > { %v3399_v55 = vsub.f32 %v3367_v6, %v3383_v5  ;;  %4663 = vmatmul.msk.f32.gmra.mxu3 %vm1296_vm2, %v3489_v9  ;;  %v3733_v1 = vmul.f32 %v3717_v38, %v3489_v9  ;;  %v4225_v38 = vld [vmem:[#allocation17 + $0x60] sm:$0xff]  ;;  %v7306_v9 = vmul.f32 0.125, %v7227_v40 }
 0x7c6   : > { %v3493_v32 = vmul.f32 0.5, %v3492_v24  ;;  %4232 = vmatpush.msra.mxu1 %v4225_v38 }
 0x7c7   : > { %v3415_v12 = vmax.f32 %v3399_v55, 0.0  ;;  %4679 = vmatmul.msk.f32.gmra.mxu0 %vm1296_vm2, %v3733_v1 }
 0x7c8   : > { %v3494_v46 = vsub.f32 1.5, %v3493_v32 }
 0x7c9   : > { %v5066_v39 = vpop.eup %5065  ;;  %v3431_v26 = vadd.f32 1e-05, %v3415_v12 }
 0x7ca   : > { %v3501_v37 = vmul.f32 %v5066_v39, %v3430_v57  ;;  %v3320_v30 = vpop.f32.mrf.mxu2  ;;  %v3495_v42 = vmul.f32 %v5064_v16, %v3494_v46  ;;  %vm3507_vm3 = vweird.f32 %v5066_v39  ;;  %v3720_v46 = vsub.f32 0.0, %v7282_v14 }
 0x7cb   : > { %5067 = vrsqrt.f32 %v3431_v26  ;;  %v3368_v48 = vmul.f32 0.125, %v3320_v30  ;;  %vm3508_vm5 = vmor %vm3506_vm4, %vm3507_vm3  ;;  %vm3516_vm7 = vweird.f32 %v3431_v26 }
 0x7cc   : > { %v3502_v15 = vmul.f32 %v5066_v39, %v3501_v37  ;;  %v3499_v35 = vsel %vm3498_vm1, %v5064_v16, %v3495_v42  ;;  %v3719_v16 = vsub.f32 0.0, %v7274_v62  ;;  %v4224_v42 = vld [vmem:[#allocation17 + $0x58] sm:$0xff] }
 0x7cd   : > { %v3400_v59 = vsub.f32 %v3368_v48, %v3384_v7  ;;  %4664 = vmatmul.msk.f32.gmra.mxu3 %vm1296_vm2, %v3499_v35  ;;  %v3734_v10 = vmul.f32 %v3718_v49, %v3499_v35  ;;  %4233 = vmatpush.msra.mxu1 %v4224_v42 }
 0x7ce   : > { %v3503_v56 = vmul.f32 0.5, %v3502_v15  ;;  %v7314_v15 = vmul.f32 0.125, %v7231_v4 }
 0x7cf   : > { %v3416_v53 = vmax.f32 %v3400_v59, 0.0  ;;  %4680 = vmatmul.msk.f32.gmra.mxu0 %vm1296_vm2, %v3734_v10 }
 0x7d0   : > { %v3504_v45 = vsub.f32 1.5, %v3503_v56 }
 0x7d1   : > { %v5068_v23 = vpop.eup %5067  ;;  %v3432_v52 = vadd.f32 1e-05, %v3416_v53  ;;  %v3721_v53 = vsub.f32 0.0, %v7290_v3 }
 0x7d2   : > { %v3511_v18 = vmul.f32 %v5068_v23, %v3431_v26  ;;  %v3323_v25 = vpop.f32.mrf.mxu2  ;;  %v3505_v36 = vmul.f32 %v5066_v39, %v3504_v45  ;;  %vm3517_vm6 = vweird.f32 %v5068_v23  ;;  %v3387_v45 = vmul.f32 %v7314_v15, %v7314_v15 }
 0x7d3   : > { %5069 = vrsqrt.f32 %v3432_v52  ;;  %v3369_v61 = vmul.f32 0.125, %v3323_v25  ;;  %vm3518_vm8 = vmor %vm3516_vm7, %vm3517_vm6  ;;  %vm3526_vm10 = vweird.f32 %v3432_v52  ;;  %v4223_v25 = vld [vmem:[#allocation17 + $0x50] sm:$0xff] }
 0x7d4   : > { %v3512_v58 = vmul.f32 %v5068_v23, %v3511_v18  ;;  %v3509_v60 = vsel %vm3508_vm5, %v5066_v39, %v3505_v36  ;;  %v3386_v39 = vmul.f32 %v7306_v9, %v7306_v9  ;;  %4234 = vmatpush.msra.mxu1 %v4223_v25 }
 0x7d5   : > { %v3401_v5 = vsub.f32 %v3369_v61, %v3385_v20  ;;  %4665 = vmatmul.msk.f32.gmra.mxu3 %vm1296_vm2, %v3509_v60  ;;  %v3735_v6 = vmul.f32 %v3719_v16, %v3509_v60  ;;  %v7322_v61 = vmul.f32 0.125, %v7235_v29 }
 0x7d6   : > { %v3513_v24 = vmul.f32 0.5, %v3512_v58 }
 0x7d7   : > { %v3417_v57 = vmax.f32 %v3401_v5, 0.0  ;;  %4681 = vmatmul.msk.f32.gmra.mxu0 %vm1296_vm2, %v3735_v6 }
 0x7d8   : > { %v3514_v62 = vsub.f32 1.5, %v3513_v24  ;;  %v3722_v24 = vsub.f32 0.0, %v7298_v27 }
 0x7d9   : > { %v5070_v63 = vpop.eup %5069  ;;  %v3433_v55 = vadd.f32 1e-05, %v3417_v57  ;;  %v3388_v57 = vmul.f32 %v7322_v61, %v7322_v61 }
 0x7da   : > { %v3521_v1 = vmul.f32 %v5070_v63, %v3432_v52  ;;  %v3326_v32 = vpop.f32.mrf.mxu2  ;;  %v3515_v12 = vmul.f32 %v5068_v23, %v3514_v62  ;;  %vm3527_vm9 = vweird.f32 %v5070_v63 }
 0x7db   : > { %5071 = vrsqrt.f32 %v3433_v55  ;;  %v3370_v37 = vmul.f32 0.125, %v3326_v32  ;;  %vm3528_vm11 = vmor %vm3526_vm10, %vm3527_vm9  ;;  %vm3536_vm13 = vweird.f32 %v3433_v55 }
 0x7dc   : > { %v3522_v40 = vmul.f32 %v5070_v63, %v3521_v1  ;;  %v3519_v30 = vsel %vm3518_vm8, %v5068_v23, %v3515_v12  ;;  %v4222_v1 = vld [vmem:[#allocation17 + $0x48] sm:$0xff] }
 0x7dd   : > { %v3402_v49 = vsub.f32 %v3370_v37, %v3386_v39  ;;  %4666 = vmatmul.msk.f32.gmra.mxu3 %vm1296_vm2, %v3519_v30  ;;  %v3736_v7 = vmul.f32 %v3720_v46, %v3519_v30  ;;  %4235 = vmatpush.msra.mxu1 %v4222_v1  ;;  %v7330_v39 = vmul.f32 0.125, %v7239_v2 }
 0x7de   : > { %v3523_v48 = vmul.f32 0.5, %v3522_v40 }
 0x7df   : > { %v3418_v26 = vmax.f32 %v3402_v49, 0.0  ;;  %4682 = vmatmul.msk.f32.gmra.mxu0 %vm1296_vm2, %v3736_v7  ;;  %v3723_v7 = vsub.f32 0.0, %v7306_v9 }
 0x7e0   : > { %v3524_v14 = vsub.f32 1.5, %v3523_v48  ;;  %v3389_v48 = vmul.f32 %v7330_v39, %v7330_v39 }
 0x7e1   : > { %v5072_v35 = vpop.eup %5071  ;;  %v3434_v43 = vadd.f32 1e-05, %v3418_v26 }
 0x7e2   : > { %v3531_v59 = vmul.f32 %v5072_v35, %v3433_v55  ;;  %v3329_v10 = vpop.f32.mrf.mxu2  ;;  %v3525_v56 = vmul.f32 %v5070_v63, %v3524_v14  ;;  %vm3537_vm12 = vweird.f32 %v5072_v35 }
 0x7e3   : > { %5073 = vrsqrt.f32 %v3434_v43  ;;  %v3371_v23 = vmul.f32 0.125, %v3329_v10  ;;  %vm3538_vm14 = vmor %vm3536_vm13, %vm3537_vm12  ;;  %vm3546_vm0 = vweird.f32 %v3434_v43 }
 0x7e4   : > { %v3532_v4 = vmul.f32 %v5072_v35, %v3531_v59  ;;  %v3529_v18 = vsel %vm3528_vm11, %v5070_v63, %v3525_v56  ;;  %v4221_v56 = vld [vmem:[#allocation17 + $0x40] sm:$0xff] }
 0x7e5   : > { %v3403_v36 = vsub.f32 %v3371_v23, %v3387_v45  ;;  %4667 = vmatmul.msk.f32.gmra.mxu3 %vm1296_vm2, %v3529_v18  ;;  %v3737_v16 = vmul.f32 %v3721_v53, %v3529_v18  ;;  %v4220_v53 = vld [vmem:[#allocation17 + $0x38] sm:$0xff]  ;;  %4236 = vmatpush.msra.mxu1 %v4221_v56  ;;  %v4219_v23 = vld [vmem:[#allocation17 + $0x30] sm:$0xff] }
 0x7e6   : > { %v3533_v20 = vmul.f32 0.5, %v3532_v4 }
 0x7e7   : > { %v3419_v52 = vmax.f32 %v3403_v36, 0.0  ;;  %4683 = vmatmul.msk.f32.gmra.mxu0 %vm1296_vm2, %v3737_v16  ;;  %4237 = vmatpush.msra.mxu1 %v4220_v53 }
 0x7e8   : > { %v3534_v3 = vsub.f32 1.5, %v3533_v20  ;;  %v4218_v20 = vld [vmem:[#allocation17 + $0x28] sm:$0xff] }
 0x7e9   : > { %v5074_v58 = vpop.eup %5073  ;;  %v3435_v60 = vadd.f32 1e-05, %v3419_v52  ;;  %v3724_v52 = vsub.f32 0.0, %v7314_v15  ;;  %4238 = vmatpush.msra.mxu1 %v4219_v23  ;;  %v4217_v15 = vld [vmem:[#allocation17 + $0x20] sm:$0xff] }
 0x7ea   : > { %v3541_v38 = vmul.f32 %v5074_v58, %v3434_v43  ;;  %v3332_v5 = vpop.f32.mrf.mxu2  ;;  %v3535_v6 = vmul.f32 %v5072_v35, %v3534_v3  ;;  %vm3547_vm15 = vweird.f32 %v5074_v58  ;;  %v7341_v43 = vmul.f32 0.125, %v7243_v0 }
 0x7eb   : > { %5075 = vrsqrt.f32 %v3435_v60  ;;  %v3372_v62 = vmul.f32 0.125, %v3332_v5  ;;  %vm3548_vm1 = vmor %vm3546_vm0, %vm3547_vm15  ;;  %vm3556_vm4 = vweird.f32 %v3435_v60  ;;  %4239 = vmatpush.msra.mxu1 %v4218_v20 }
 0x7ec   : > { %v3542_v29 = vmul.f32 %v5074_v58, %v3541_v38  ;;  %v3539_v63 = vsel %vm3538_vm14, %v5072_v35, %v3535_v6  ;;  %v3390_v0 = vmul.f32 %v7341_v43, %v7341_v43 }
 0x7ed   : > { %v3404_v32 = vsub.f32 %v3372_v62, %v3388_v57  ;;  %4668 = vmatmul.msk.f32.gmra.mxu3 %vm1296_vm2, %v3539_v63  ;;  %v3738_v12 = vmul.f32 %v3722_v24, %v3539_v63  ;;  %4240 = vmatpush.msra.mxu1 %v4217_v15 }
 0x7ee   : > { %v3543_v46 = vmul.f32 0.5, %v3542_v29 }
 0x7ef   : > { %v3420_v55 = vmax.f32 %v3404_v32, 0.0  ;;  %4684 = vmatmul.msk.f32.gmra.mxu0 %vm1296_vm2, %v3738_v12 }
 0x7f0   : > { %v3544_v27 = vsub.f32 1.5, %v3543_v46  ;;  %v3725_v46 = vsub.f32 0.0, %v7322_v61 }
 0x7f1   : > { %v5076_v37 = vpop.eup %5075  ;;  %v7333_v40 = vadd.f32 1e-05, %v3420_v55 }
 0x7f2   : > { %v3551_v30 = vmul.f32 %v5076_v37, %v3435_v60  ;;  %v3335_v42 = vpop.f32.mrf.mxu2  ;;  %v3545_v49 = vmul.f32 %v5074_v58, %v3544_v27  ;;  %vm3557_vm3 = vweird.f32 %v5076_v37  ;;  %v7350_v60 = vmul.f32 0.125, %v7247_v17 }
 0x7f3   : > { %5077 = vrsqrt.f32 %v7333_v40  ;;  %v3373_v2 = vmul.f32 0.125, %v3335_v42  ;;  %vm3558_vm5 = vmor %vm3556_vm4, %vm3557_vm3  ;;  %vm3566_vm7 = vweird.f32 %v7333_v40 }
 0x7f4   : > { %v3552_v26 = vmul.f32 %v5076_v37, %v3551_v30  ;;  %v3549_v14 = vsel %vm3548_vm1, %v5074_v58, %v3545_v49  ;;  %v3391_v17 = vmul.f32 %v7350_v60, %v7350_v60 }
 0x7f5   : > { %v3405_v35 = vsub.f32 %v3373_v2, %v3389_v48  ;;  %4669 = vmatmul.msk.f32.gmra.mxu3 %vm1296_vm2, %v3549_v14  ;;  %v3739_v59 = vmul.f32 %v3723_v7, %v3549_v14  ;;  %v3726_v14 = vsub.f32 0.0, %v7330_v39 }
 0x7f6   : > { %v3553_v10 = vmul.f32 0.5, %v3552_v26 }
 0x7f7   : > { %v3421_v9 = vmax.f32 %v3405_v35, 0.0  ;;  %4685 = vmatmul.msk.f32.gmra.mxu0 %vm1296_vm2, %v3739_v59 }
 0x7f8   : > { %v3554_v45 = vsub.f32 1.5, %v3553_v10 }
 0x7f9   : > { %v5078_v4 = vpop.eup %5077  ;;  %v3437_v18 = vadd.f32 1e-05, %v3421_v9 }
 0x7fa   : > { %v3561_v25 = vmul.f32 %v5078_v4, %v7333_v40  ;;  %v3338_v36 = vpop.f32.mrf.mxu2  ;;  %v3555_v16 = vmul.f32 %v5076_v37, %v3554_v45  ;;  %vm3567_vm6 = vweird.f32 %v5078_v4 }
 0x7fb   : > { %5079 = vrsqrt.f32 %v3437_v18  ;;  %v3374_v3 = vmul.f32 0.125, %v3338_v36  ;;  %vm3568_vm8 = vmor %vm3566_vm7, %vm3567_vm6  ;;  %vm3576_vm10 = vweird.f32 %v3437_v18 }
 0x7fc   : > { %v3562_v58 = vmul.f32 %v5078_v4, %v3561_v25  ;;  %v3559_v38 = vsel %vm3558_vm5, %v5076_v37, %v3555_v16 }
 0x7fd   : > { %v3406_v5 = vsub.f32 %v3374_v3, %v3390_v0  ;;  %4670 = vmatmul.msk.f32.gmra.mxu3 %vm1296_vm2, %v3559_v38  ;;  %v3740_v6 = vmul.f32 %v3724_v52, %v3559_v38  ;;  %v3728_v52 = vsub.f32 0.0, %v7350_v60  ;;  %v4216_v38 = vld [vmem:[#allocation17 + $0x18] sm:$0xff] }
 0x7fe   : > { %v3563_v24 = vmul.f32 0.5, %v3562_v58  ;;  %v7371_v58 = vld [vmem:[%s7649_s10] ss:$0 sm:$0xff]  ;;  %4241 = vmatpush.msra.mxu1 %v4216_v38  ;;  %s5501_s10 = scalar_lea.hbm %s7651_s18, 256 }
 0x7ff   : > { %v3422_v57 = vmax.f32 %v3406_v5, 0.0  ;;  %4686 = vmatmul.msk.f32.gmra.mxu0 %vm1296_vm2, %v3740_v6  ;;  %v4215_v5 = vld [vmem:[#allocation17 + $0x10] sm:$0xff]  ;;  %p5503_p9 = scmp.lt.s32.totalorder %s5501_s10, %s5497_s26 }
 0x800   : > { %v3564_v62 = vsub.f32 1.5, %v3563_v24  ;;  %4242 = vmatpush.msra.mxu1 %v4215_v5 }
 0x801   : > { %v5080_v29 = vpop.eup %5079  ;;  %v3438_v63 = vadd.f32 1e-05, %v3422_v57  ;;  %v4214_v57 = vld [vmem:[#allocation17 + $0x8] sm:$0xff]  ;;  %p5504_p8 = por %p5503_p9, %p5502_p7 }
 0x802   : > { %v3571_v1 = vmul.f32 %v5080_v29, %v3437_v18  ;;  %v3341_v32 = vpop.f32.mrf.mxu2  ;;  %v3565_v12 = vmul.f32 %v5078_v4, %v3564_v62  ;;  %vm3577_vm9 = vweird.f32 %v5080_v29  ;;  %4243 = vmatpush.msra.mxu1 %v4214_v57  ;;  %v4213_v62 = vld [vmem:[#allocation17] sm:$0xff] }
 0x803   : > { %5081 = vrsqrt.f32 %v3438_v63  ;;  %v3375_v55 = vmul.f32 0.125, %v3341_v32  ;;  %vm3578_vm11 = vmor %vm3576_vm10, %vm3577_vm9  ;;  %vm3586_vm13 = vweird.f32 %v3438_v63  ;;  %p5505_p4 = pnand %p5504_p8, %p5500_p12 }
 0x804   : > { %v3572_v27 = vmul.f32 %v5080_v29, %v3571_v1  ;;  %v3569_v37 = vsel %vm3568_vm8, %v5078_v4, %v3565_v12  ;;  %v3727_v4 = vsub.f32 0.0, %v7341_v43  ;;  %4244 = vmatpush.msra.mxu1 %v4213_v62 }
 0x805   : > { %v3407_v30 = vsub.f32 %v3375_v55, %v3391_v17  ;;  %4671 = vmatmul.msk.f32.gmra.mxu3 %vm1296_vm2, %v3569_v37  ;;  %v3741_v42 = vmul.f32 %v3725_v46, %v3569_v37 }
 0x806   : > { %v3573_v49 = vmul.f32 0.5, %v3572_v27 }
 0x807   : > { %v3423_v7 = vmax.f32 %v3407_v30, 0.0  ;;  %4687 = vmatmul.msk.f32.gmra.mxu0 %vm1296_vm2, %v3741_v42 }
 0x808   : > { %v3574_v48 = vsub.f32 1.5, %v3573_v49 }
 0x809   : > { %v5082_v40 = vpop.eup %5081  ;;  %v3439_v61 = vadd.f32 1e-05, %v3423_v7 }
 0x80a   : > { %v3581_v2 = vmul.f32 %v5082_v40, %v3438_v63  ;;  %v3575_v26 = vmul.f32 %v5080_v29, %v3574_v48  ;;  %vm3587_vm12 = vweird.f32 %v5082_v40 }
 0x80b   : > { %5083 = vrsqrt.f32 %v3439_v61  ;;  %vm3588_vm14 = vmor %vm3586_vm13, %vm3587_vm12  ;;  %vm3596_vm0 = vweird.f32 %v3439_v61 }
 0x80c   : > { %v3582_v35 = vmul.f32 %v5082_v40, %v3581_v2  ;;  %v3579_v59 = vsel %vm3578_vm11, %v5080_v29, %v3575_v26 }
 0x80d   : > { %4672 = vmatmul.msk.f32.gmra.mxu3 %vm1296_vm2, %v3579_v59  ;;  %v3742_v10 = vmul.f32 %v3726_v14, %v3579_v59 }
 0x80e   : > { %v3583_v56 = vmul.f32 0.5, %v3582_v35 }
 0x80f   : > { %4688 = vmatmul.msk.f32.gmra.mxu0 %vm1296_vm2, %v3742_v10 }
 0x810   : > { %v3584_v53 = vsub.f32 1.5, %v3583_v56 }
 0x811   : > { %v5084_v9 = vpop.eup %5083 }
 0x812   : > { %v3591_v45 = vmul.f32 %v5084_v9, %v3439_v61  ;;  %v3585_v23 = vmul.f32 %v5082_v40, %v3584_v53  ;;  %vm3597_vm15 = vweird.f32 %v5084_v9 }
 0x813   : > { %vm3598_vm1 = vmor %vm3596_vm0, %vm3597_vm15 }
 0x814   : > { %v3592_v39 = vmul.f32 %v5084_v9, %v3591_v45  ;;  %v3589_v18 = vsel %vm3588_vm14, %v5082_v40, %v3585_v23 }
 0x815   : > { %4673 = vmatmul.msk.f32.gmra.mxu3 %vm1296_vm2, %v3589_v18  ;;  %v3743_v25 = vmul.f32 %v3727_v4, %v3589_v18 }
 0x816   : > { %v3593_v36 = vmul.f32 0.5, %v3592_v39 }
 0x817   : > { %4689 = vmatmul.msk.f32.gmra.mxu0 %vm1296_vm2, %v3743_v25 }
 0x818   : > { %v3594_v16 = vsub.f32 1.5, %v3593_v36 }
 0x81a   : > { %v3595_v20 = vmul.f32 %v5084_v9, %v3594_v16 }
 0x81c   : > { %v3599_v0 = vsel %vm3598_vm1, %v5084_v9, %v3595_v20 }
 0x81d   : > { %4674 = vmatmul.msk.f32.gmra.mxu3 %vm1296_vm2, %v3599_v0  ;;  %v3744_v43 = vmul.f32 %v3728_v52, %v3599_v0 }
 0x81f   : > { %4690 = vmatmul.msk.f32.gmra.mxu0 %vm1296_vm2, %v3744_v43 }
 0x824   : > { %v3813_v3 = vpop.f32.mrf.mxu0 }
 0x825   : > { %v3814_v24 = vadd.f32 %v7371_v58, %v3813_v3 }
 0x828   : > { %v3665_v6 = vpop.f32.mrf.mxu3 }
 0x829   : > { %v3861_v60 = vmul.f32 %v3665_v6, %v7142_v8 }
 0x82b   : > { %v3877_v15 = vadd.f32 %v3861_v60, %v3814_v24 }
 0x82c   : > { %v3816_v29 = vpop.f32.mrf.mxu0 }
 0x82d   : > { %v4691_v63 = vmul.f32 -1.442695, %v3877_v15  ;;  %v3817_v32 = vadd.f32 %v7371_v58, %v3816_v29 }
 0x82f   : > { %5085 = vpow2.f32 %v4691_v63 }
 0x830   : > { %v3668_v1 = vpop.f32.mrf.mxu3 }
 0x831   : > { %v3862_v12 = vmul.f32 %v3668_v1, %v7148_v50 }
 0x833   : > { %v7377_v46 = vadd.f32 %v3862_v12, %v3817_v32 }
 0x834   : > { %v3819_v17 = vpop.f32.mrf.mxu0 }
 0x835   : > { %v5086_v55 = vpop.eup %5085  ;;  %v4692_v27 = vmul.f32 -1.442695, %v7377_v46  ;;  %v3820_v30 = vadd.f32 %v7371_v58, %v3819_v17 }
 0x836   : > { %v3941_v8 = vadd.f32 1.0, %v5086_v55 }
 0x837   : > { %5087 = vpow2.f32 %v4692_v27 }
 0x838   : > { %5089 = vrcp.f32 %v3941_v8  ;;  %v3671_v37 = vpop.f32.mrf.mxu3  ;;  %v3968_v10 = vand.u32 2147483648, %v3941_v8  ;;  %vm3962_vm3 = vweird.f32 %v3941_v8 }
 0x839   : > { %v3863_v42 = vmul.f32 %v3671_v37, %v7151_v54  ;;  %v3966_v54 = vand.u32 2147483647, %v3941_v8 }
 0x83a   : > { %v3969_v18 = vor.u32 1.1754944e-38, %v3968_v10 }
 0x83b   : > { %v7382_v49 = vadd.f32 %v3863_v42, %v3820_v30  ;;  %vm3967_vm5 = vcmp.eq.f32.partialorder %v3966_v54, 8.507059e+37 }
 0x83c   : > { %v3822_v7 = vpop.f32.mrf.mxu0 }
 0x83d   : > { %v5088_v48 = vpop.eup %5087  ;;  %v4693_v50 = vmul.f32 -1.442695, %v7382_v49  ;;  %v3823_v35 = vadd.f32 %v7371_v58, %v3822_v7 }
 0x83e   : > { %v5090_v40 = vpop.eup %5089  ;;  %v3942_v61 = vadd.f32 1.0, %v5088_v48 }
 0x83f   : > { %v3958_v2 = vmul.f32 %v5090_v40, %v3941_v8  ;;  %5091 = vpow2.f32 %v4693_v50  ;;  %vm3963_vm2 = vweird.f32 %v5090_v40 }
 0x840   : > { %5093 = vrcp.f32 %v3942_v61  ;;  %v3674_v26 = vpop.f32.mrf.mxu3  ;;  %vm3964_vm4 = vmor %vm3962_vm3, %vm3963_vm2  ;;  %v3983_v38 = vand.u32 2147483648, %v3942_v61  ;;  %v3981_v24 = vand.u32 2147483647, %v3942_v61  ;;  %vm3977_vm7 = vweird.f32 %v3942_v61 }
 0x841   : > { %v3959_v14 = vsub.f32 1.0, %v3958_v2  ;;  %v3864_v59 = vmul.f32 %v3674_v26, %v7154_v41 }
 0x842   : > { %v3984_v1 = vor.u32 1.1754944e-38, %v3983_v38  ;;  %vm3982_vm9 = vcmp.eq.f32.partialorder %v3981_v24, 8.507059e+37 }
 0x843   : > { %v3960_v56 = vmul.f32 %v5090_v40, %v3959_v14  ;;  %v7387_v53 = vadd.f32 %v3864_v59, %v3823_v35 }
 0x844   : > { %v3825_v9 = vpop.f32.mrf.mxu0 }
 0x845   : > { %v5092_v45 = vpop.eup %5091  ;;  %v3961_v23 = vadd.f32 %v5090_v40, %v3960_v56  ;;  %v4694_v4 = vmul.f32 -1.442695, %v7387_v53  ;;  %v3826_v0 = vadd.f32 %v7371_v58, %v3825_v9 }
 0x846   : > { %v5094_v39 = vpop.eup %5093  ;;  %v3943_v25 = vadd.f32 1.0, %v5092_v45 }
 0x847   : > { %v3965_v36 = vsel %vm3964_vm4, %v5090_v40, %v3961_v23  ;;  %5095 = vpow2.f32 %v4694_v4  ;;  %v3973_v41 = vmul.f32 %v5094_v39, %v3942_v61  ;;  %vm3978_vm6 = vweird.f32 %v5094_v39 }
 0x848   : > { %v3970_v16 = vsel %vm3967_vm5, %v3969_v18, %v3965_v36  ;;  %5097 = vrcp.f32 %v3943_v25  ;;  %v3677_v20 = vpop.f32.mrf.mxu3  ;;  %vm3979_vm8 = vmor %vm3977_vm7, %vm3978_vm6  ;;  %v3998_v30 = vand.u32 2147483648, %v3943_v25  ;;  %v3996_v48 = vand.u32 2147483647, %v3943_v25 }
 0x849   : > { %v4197_v52 = vmul.f32 %v3970_v16, %v3877_v15  ;;  %v3865_v43 = vmul.f32 %v3677_v20, %v7157_v44  ;;  %v3974_v3 = vsub.f32 1.0, %v3973_v41  ;;  %vm3992_vm11 = vweird.f32 %v3943_v25 }
 0x84a   : > { %vm3997_vm13 = vcmp.eq.f32.partialorder %v3996_v48, 8.507059e+37 }
 0x84b   : > { %v7392_v5 = vadd.f32 %v3865_v43, %v3826_v0  ;;  %4245 = vmatmul.f32.vlgmr.msra.gmra.mxu1 %v4197_v52  ;;  %v3975_v6 = vmul.f32 %v5094_v39, %v3974_v3 }
 0x84c   : > { %v3828_v60 = vpop.f32.mrf.mxu0 }
 0x84d   : > { %v5096_v57 = vpop.eup %5095  ;;  %v4695_v62 = vmul.f32 -1.442695, %v7392_v5  ;;  %v3976_v29 = vadd.f32 %v5094_v39, %v3975_v6  ;;  %v3829_v55 = vadd.f32 %v7371_v58, %v3828_v60 }
 0x84e   : > { %v5098_v63 = vpop.eup %5097  ;;  %v3944_v15 = vadd.f32 1.0, %v5096_v57 }
 0x84f   : > { %5099 = vpow2.f32 %v4695_v62  ;;  %v3980_v44 = vsel %vm3979_vm8, %v5094_v39, %v3976_v29  ;;  %v3988_v32 = vmul.f32 %v5098_v63, %v3943_v25  ;;  %vm3993_vm10 = vweird.f32 %v5098_v63 }
 0x850   : > { %5101 = vrcp.f32 %v3944_v15  ;;  %v3680_v12 = vpop.f32.mrf.mxu3  ;;  %v3985_v17 = vsel %vm3982_vm9, %v3984_v1, %v3980_v44  ;;  %vm3994_vm12 = vmor %vm3992_vm11, %vm3993_vm10  ;;  %v4013_v23 = vand.u32 2147483648, %v3944_v15  ;;  %v4011_v18 = vand.u32 2147483647, %v3944_v15 }
 0x851   : > { %v3866_v27 = vmul.f32 %v3680_v12, %v7160_v33  ;;  %v4198_v8 = vmul.f32 %v3985_v17, %v7377_v46  ;;  %v3989_v37 = vsub.f32 1.0, %v3988_v32  ;;  %v3999_v33 = vor.u32 1.1754944e-38, %v3998_v30 }
 0x852   : > { %vm4007_vm15 = vweird.f32 %v3944_v15  ;;  %vm4012_vm1 = vcmp.eq.f32.partialorder %v4011_v18, 8.507059e+37 }
 0x853   : > { %v7398_v42 = vadd.f32 %v3866_v27, %v3829_v55  ;;  %4248 = vmatmul.f32.gmra.mxu1 %v4198_v8  ;;  %v3990_v7 = vmul.f32 %v5098_v63, %v3989_v37 }
 0x854   : > { %v3831_v50 = vpop.f32.mrf.mxu0 }
 0x855   : > { %v5100_v40 = vpop.eup %5099  ;;  %v4696_v61 = vmul.f32 -1.442695, %v7398_v42  ;;  %v3991_v2 = vadd.f32 %v5098_v63, %v3990_v7  ;;  %v3832_v56 = vadd.f32 %v7371_v58, %v3831_v50 }
 0x856   : > { %v5102_v26 = vpop.eup %5101  ;;  %v3945_v14 = vadd.f32 1.0, %v5100_v40 }
 0x857   : > { %5103 = vpow2.f32 %v4696_v61  ;;  %v3995_v46 = vsel %vm3994_vm12, %v5098_v63, %v3991_v2  ;;  %v4003_v35 = vmul.f32 %v5102_v26, %v3944_v15  ;;  %vm4008_vm14 = vweird.f32 %v5102_v26 }
 0x858   : > { %5105 = vrcp.f32 %v3945_v14  ;;  %v3683_v59 = vpop.f32.mrf.mxu3  ;;  %v4000_v10 = vsel %vm3997_vm13, %v3999_v33, %v3995_v46  ;;  %vm4009_vm0 = vmor %vm4007_vm15, %vm4008_vm14  ;;  %v4028_v57 = vand.u32 2147483648, %v3945_v14  ;;  %v4026_v63 = vand.u32 2147483647, %v3945_v14 }
 0x859   : > { %v3867_v54 = vmul.f32 %v3683_v59, %v7163_v22  ;;  %v4199_v9 = vmul.f32 %v4000_v10, %v7382_v49  ;;  %v4004_v45 = vsub.f32 1.0, %v4003_v35  ;;  %v4014_v22 = vor.u32 1.1754944e-38, %v4013_v23 }
 0x85a   : > { %vm4022_vm3 = vweird.f32 %v3945_v14  ;;  %vm4027_vm5 = vcmp.eq.f32.partialorder %v4026_v63, 8.507059e+37 }
 0x85b   : > { %v7404_v4 = vadd.f32 %v3867_v54, %v3832_v56  ;;  %4251 = vmatmul.f32.gmra.mxu1 %v4199_v9  ;;  %v4005_v39 = vmul.f32 %v5102_v26, %v4004_v45 }
 0x85c   : > { %v3834_v25 = vpop.f32.mrf.mxu0 }
 0x85d   : > { %v5104_v36 = vpop.eup %5103  ;;  %v4697_v41 = vmul.f32 -1.442695, %v7404_v4  ;;  %v4006_v16 = vadd.f32 %v5102_v26, %v4005_v39  ;;  %v3835_v38 = vadd.f32 %v7371_v58, %v3834_v25 }
 0x85e   : > { %v5106_v20 = vpop.eup %5105  ;;  %v3946_v52 = vadd.f32 1.0, %v5104_v36 }
 0x85f   : > { %5107 = vpow2.f32 %v4697_v41  ;;  %v4010_v49 = vsel %vm4009_vm0, %v5102_v26, %v4006_v16  ;;  %v4018_v0 = vmul.f32 %v5106_v20, %v3945_v14  ;;  %vm4023_vm2 = vweird.f32 %v5106_v20 }
 0x860   : > { %5109 = vrcp.f32 %v3946_v52  ;;  %v3686_v43 = vpop.f32.mrf.mxu3  ;;  %v4015_v3 = vsel %vm4012_vm1, %v4014_v22, %v4010_v49  ;;  %vm4024_vm4 = vmor %vm4022_vm3, %vm4023_vm2  ;;  %v4043_v50 = vand.u32 2147483648, %v3946_v52  ;;  %v4041_v2 = vand.u32 2147483647, %v3946_v52 }
 0x861   : > { %v3868_v6 = vmul.f32 %v3686_v43, %v7166_v28  ;;  %v4200_v24 = vmul.f32 %v4015_v3, %v7387_v53  ;;  %v4019_v60 = vsub.f32 1.0, %v4018_v0  ;;  %v4029_v28 = vor.u32 1.1754944e-38, %v4028_v57 }
 0x862   : > { %vm4037_vm7 = vweird.f32 %v3946_v52  ;;  %vm4042_vm9 = vcmp.eq.f32.partialorder %v4041_v2, 8.507059e+37 }
 0x863   : > { %v7410_v62 = vadd.f32 %v3868_v6, %v3835_v38  ;;  %4254 = vmatmul.f32.gmra.mxu1 %v4200_v24  ;;  %v4020_v29 = vmul.f32 %v5106_v20, %v4019_v60 }
 0x864   : > { %v3837_v15 = vpop.f32.mrf.mxu0 }
 0x865   : > { %v5108_v1 = vpop.eup %5107  ;;  %v4698_v44 = vmul.f32 -1.442695, %v7410_v62  ;;  %v4021_v32 = vadd.f32 %v5106_v20, %v4020_v29  ;;  %v3838_v37 = vadd.f32 %v7371_v58, %v3837_v15 }
 0x866   : > { %v5110_v12 = vpop.eup %5109  ;;  %v3947_v17 = vadd.f32 1.0, %v5108_v1 }
 0x867   : > { %5111 = vpow2.f32 %v4698_v44  ;;  %v4025_v53 = vsel %vm4024_vm4, %v5106_v20, %v4021_v32  ;;  %v4033_v55 = vmul.f32 %v5110_v12, %v3946_v52  ;;  %vm4038_vm6 = vweird.f32 %v5110_v12 }
 0x868   : > { %5113 = vrcp.f32 %v3947_v17  ;;  %v3689_v27 = vpop.f32.mrf.mxu3  ;;  %v4030_v8 = vsel %vm4027_vm5, %v4029_v28, %v4025_v53  ;;  %vm4039_vm8 = vmor %vm4037_vm7, %vm4038_vm6  ;;  %v4058_v18 = vand.u32 2147483648, %v3947_v17  ;;  %v4056_v41 = vand.u32 2147483647, %v3947_v17 }
 0x869   : > { %v3869_v30 = vmul.f32 %v3689_v27, %v7169_v51  ;;  %v4201_v7 = vmul.f32 %v4030_v8, %v7392_v5  ;;  %v4034_v48 = vsub.f32 1.0, %v4033_v55  ;;  %v4044_v51 = vor.u32 1.1754944e-38, %v4043_v50 }
 0x86a   : > { %vm4052_vm11 = vweird.f32 %v3947_v17  ;;  %vm4057_vm13 = vcmp.eq.f32.partialorder %v4056_v41, 8.507059e+37 }
 0x86b   : > { %v7416_v40 = vadd.f32 %v3869_v30, %v3838_v37  ;;  %4257 = vmatmul.f32.gmra.mxu1 %v4201_v7  ;;  %v4035_v61 = vmul.f32 %v5110_v12, %v4034_v48 }
 0x86c   : > { %v3840_v26 = vpop.f32.mrf.mxu0 }
 0x86d   : > { %v5112_v14 = vpop.eup %5111  ;;  %v4699_v33 = vmul.f32 -1.442695, %v7416_v40  ;;  %v4036_v46 = vadd.f32 %v5110_v12, %v4035_v61  ;;  %v3841_v9 = vadd.f32 %v7371_v58, %v3840_v26 }
 0x86e   : > { %v5114_v35 = vpop.eup %5113  ;;  %v3948_v59 = vadd.f32 1.0, %v5112_v14 }
 0x86f   : > { %5115 = vpow2.f32 %v4699_v33  ;;  %v4040_v5 = vsel %vm4039_vm8, %v5110_v12, %v4036_v46  ;;  %v4048_v10 = vmul.f32 %v5114_v35, %v3947_v17  ;;  %vm4053_vm10 = vweird.f32 %v5114_v35 }
 0x870   : > { %5117 = vrcp.f32 %v3948_v59  ;;  %v3692_v56 = vpop.f32.mrf.mxu3  ;;  %v4045_v54 = vsel %vm4042_vm9, %v4044_v51, %v4040_v5  ;;  %vm4054_vm12 = vmor %vm4052_vm11, %vm4053_vm10  ;;  %v4073_v29 = vand.u32 2147483648, %v3948_v59  ;;  %v4071_v1 = vand.u32 2147483647, %v3948_v59 }
 0x871   : > { %v3870_v45 = vmul.f32 %v3692_v56, %v7172_v19  ;;  %v4202_v23 = vmul.f32 %v4045_v54, %v7398_v42  ;;  %v4049_v39 = vsub.f32 1.0, %v4048_v10  ;;  %v4059_v19 = vor.u32 1.1754944e-38, %v4058_v18 }
 0x872   : > { %vm4067_vm15 = vweird.f32 %v3948_v59  ;;  %vm4072_vm1 = vcmp.eq.f32.partialorder %v4071_v1, 8.507059e+37 }
 0x873   : > { %v7422_v25 = vadd.f32 %v3870_v45, %v3841_v9  ;;  %4260 = vmatmul.f32.gmra.mxu1 %v4202_v23  ;;  %v4050_v36 = vmul.f32 %v5114_v35, %v4049_v39 }
 0x874   : > { %v3843_v16 = vpop.f32.mrf.mxu0 }
 0x875   : > { %v5116_v20 = vpop.eup %5115  ;;  %v4700_v52 = vmul.f32 -1.442695, %v7422_v25  ;;  %v4051_v22 = vadd.f32 %v5114_v35, %v4050_v36  ;;  %v3844_v6 = vadd.f32 %v7371_v58, %v3843_v16 }
 0x876   : > { %v5118_v49 = vpop.eup %5117  ;;  %v3949_v0 = vadd.f32 1.0, %v5116_v20 }
 0x877   : > { %5119 = vpow2.f32 %v4700_v52  ;;  %v4055_v42 = vsel %vm4054_vm12, %v5114_v35, %v4051_v22  ;;  %v4063_v43 = vmul.f32 %v5118_v49, %v3948_v59  ;;  %vm4068_vm14 = vweird.f32 %v5118_v49 }
 0x878   : > { %5121 = vrcp.f32 %v3949_v0  ;;  %v3695_v3 = vpop.f32.mrf.mxu3  ;;  %v4060_v38 = vsel %vm4057_vm13, %v4059_v19, %v4055_v42  ;;  %vm4069_vm0 = vmor %vm4067_vm15, %vm4068_vm14  ;;  %v4088_v50 = vand.u32 2147483648, %v3949_v0  ;;  %v4086_v26 = vand.u32 2147483647, %v3949_v0 }
 0x879   : > { %v3871_v24 = vmul.f32 %v3695_v3, %v7175_v13  ;;  %v4203_v60 = vmul.f32 %v4060_v38, %v7404_v4  ;;  %v4064_v57 = vsub.f32 1.0, %v4063_v43  ;;  %v4074_v13 = vor.u32 1.1754944e-38, %v4073_v29 }
 0x87a   : > { %vm4082_vm3 = vweird.f32 %v3949_v0  ;;  %vm4087_vm5 = vcmp.eq.f32.partialorder %v4086_v26, 8.507059e+37 }
 0x87b   : > { %v7428_v63 = vadd.f32 %v3871_v24, %v3844_v6  ;;  %4263 = vmatmul.f32.gmra.mxu1 %v4203_v60  ;;  %v4065_v15 = vmul.f32 %v5118_v49, %v4064_v57 }
 0x87c   : > { %v3846_v44 = vpop.f32.mrf.mxu0 }
 0x87d   : > { %v5120_v32 = vpop.eup %5119  ;;  %v4701_v12 = vmul.f32 -1.442695, %v7428_v63  ;;  %v4066_v17 = vadd.f32 %v5118_v49, %v4065_v15  ;;  %v3847_v37 = vadd.f32 %v7371_v58, %v3846_v44 }
 0x87e   : > { %v5122_v28 = vpop.eup %5121  ;;  %v3950_v53 = vadd.f32 1.0, %v5120_v32 }
 0x87f   : > { %5123 = vpow2.f32 %v4701_v12  ;;  %v4070_v4 = vsel %vm4069_vm0, %v5118_v49, %v4066_v17  ;;  %v4078_v55 = vmul.f32 %v5122_v28, %v3949_v0  ;;  %vm4083_vm2 = vweird.f32 %v5122_v28 }
 0x880   : > { %5125 = vrcp.f32 %v3950_v53  ;;  %v3698_v27 = vpop.f32.mrf.mxu3  ;;  %v4075_v8 = vsel %vm4072_vm1, %v4074_v13, %v4070_v4  ;;  %vm4084_vm4 = vmor %vm4082_vm3, %vm4083_vm2  ;;  %v4103_v39 = vand.u32 2147483648, %v3950_v53  ;;  %v4101_v41 = vand.u32 2147483647, %v3950_v53 }
 0x881   : > { %v3872_v30 = vmul.f32 %v3698_v27, %v7178_v31  ;;  %v4204_v7 = vmul.f32 %v4075_v8, %v7410_v62  ;;  %v4079_v48 = vsub.f32 1.0, %v4078_v55  ;;  %v4089_v31 = vor.u32 1.1754944e-38, %v4088_v50 }
 0x882   : > { %vm4097_vm7 = vweird.f32 %v3950_v53  ;;  %vm4102_vm9 = vcmp.eq.f32.partialorder %v4101_v41, 8.507059e+37 }
 0x883   : > { %v7434_v61 = vadd.f32 %v3872_v30, %v3847_v37  ;;  %4266 = vmatmul.f32.gmra.mxu1 %v4204_v7  ;;  %v4080_v2 = vmul.f32 %v5122_v28, %v4079_v48 }
 0x884   : > { %v3849_v14 = vpop.f32.mrf.mxu0 }
 0x885   : > { %v5124_v33 = vpop.eup %5123  ;;  %v4702_v46 = vmul.f32 -1.442695, %v7434_v61  ;;  %v4081_v35 = vadd.f32 %v5122_v28, %v4080_v2  ;;  %v3850_v54 = vadd.f32 %v7371_v58, %v3849_v14 }
 0x886   : > { %v5126_v59 = vpop.eup %5125  ;;  %v3951_v51 = vadd.f32 1.0, %v5124_v33 }
 0x887   : > { %5127 = vpow2.f32 %v4702_v46  ;;  %v4085_v62 = vsel %vm4084_vm4, %v5122_v28, %v4081_v35  ;;  %v4093_v5 = vmul.f32 %v5126_v59, %v3950_v53  ;;  %vm4098_vm6 = vweird.f32 %v5126_v59 }
 0x888   : > { %5129 = vrcp.f32 %v3951_v51  ;;  %v3701_v10 = vpop.f32.mrf.mxu3  ;;  %v4090_v56 = vsel %vm4087_vm5, %v4089_v31, %v4085_v62  ;;  %vm4099_vm8 = vmor %vm4097_vm7, %vm4098_vm6  ;;  %v4118_v60 = vand.u32 2147483648, %v3951_v51  ;;  %v4116_v15 = vand.u32 2147483647, %v3951_v51 }
 0x889   : > { %v3873_v9 = vmul.f32 %v3701_v10, %v7181_v47  ;;  %v4205_v45 = vmul.f32 %v4090_v56, %v7416_v40  ;;  %v4094_v23 = vsub.f32 1.0, %v4093_v5  ;;  %v4104_v47 = vor.u32 1.1754944e-38, %v4103_v39 }
 0x88a   : > { %vm4112_vm11 = vweird.f32 %v3951_v51  ;;  %vm4117_vm13 = vcmp.eq.f32.partialorder %v4116_v15, 8.507059e+37 }
 0x88b   : > { %v7440_v18 = vadd.f32 %v3873_v9, %v3850_v54  ;;  %4269 = vmatmul.f32.gmra.mxu1 %v4205_v45  ;;  %v4095_v36 = vmul.f32 %v5126_v59, %v4094_v23 }
 0x88c   : > { %v3852_v16 = vpop.f32.mrf.mxu0 }
 0x88d   : > { %v5128_v20 = vpop.eup %5127  ;;  %v4703_v52 = vmul.f32 -1.442695, %v7440_v18  ;;  %v4096_v22 = vadd.f32 %v5126_v59, %v4095_v36  ;;  %v3853_v3 = vadd.f32 %v7371_v58, %v3852_v16 }
 0x88e   : > { %v5130_v49 = vpop.eup %5129  ;;  %v3952_v0 = vadd.f32 1.0, %v5128_v20 }
 0x88f   : > { %5131 = vpow2.f32 %v4703_v52  ;;  %v4100_v40 = vsel %vm4099_vm8, %v5126_v59, %v4096_v22  ;;  %v4108_v19 = vmul.f32 %v5130_v49, %v3951_v51  ;;  %vm4113_vm10 = vweird.f32 %v5130_v49 }
 0x890   : > { %5133 = vrcp.f32 %v3952_v0  ;;  %v3704_v42 = vpop.f32.mrf.mxu3  ;;  %v4105_v43 = vsel %vm4102_vm9, %v4104_v47, %v4100_v40  ;;  %vm4114_vm12 = vmor %vm4112_vm11, %vm4113_vm10  ;;  %v4133_v30 = vand.u32 2147483648, %v3952_v0  ;;  %v4131_v50 = vand.u32 2147483647, %v3952_v0 }
 0x891   : > { %v3874_v38 = vmul.f32 %v3704_v42, %v7184_v11  ;;  %v4206_v6 = vmul.f32 %v4105_v43, %v7422_v25  ;;  %v4109_v24 = vsub.f32 1.0, %v4108_v19  ;;  %v4119_v11 = vor.u32 1.1754944e-38, %v4118_v60 }
 0x892   : > { %vm4127_vm15 = vweird.f32 %v3952_v0  ;;  %vm4132_vm1 = vcmp.eq.f32.partialorder %v4131_v50, 8.507059e+37 }
 0x893   : > { %v7446_v57 = vadd.f32 %v3874_v38, %v3853_v3  ;;  %4272 = vmatmul.f32.gmra.mxu1 %v4206_v6  ;;  %v4110_v29 = vmul.f32 %v5130_v49, %v4109_v24 }
 0x894   : > { %v3855_v1 = vpop.f32.mrf.mxu0 }
 0x895   : > { %v5132_v44 = vpop.eup %5131  ;;  %v4704_v32 = vmul.f32 -1.442695, %v7446_v57  ;;  %v4111_v12 = vadd.f32 %v5130_v49, %v4110_v29  ;;  %v3856_v55 = vadd.f32 %v7371_v58, %v3855_v1 }
 0x896   : > { %v5134_v17 = vpop.eup %5133  ;;  %v3953_v28 = vadd.f32 1.0, %v5132_v44 }
 0x897   : > { %5135 = vpow2.f32 %v4704_v32  ;;  %v4115_v25 = vsel %vm4114_vm12, %v5130_v49, %v4111_v12  ;;  %v4123_v53 = vmul.f32 %v5134_v17, %v3952_v0  ;;  %vm4128_vm14 = vweird.f32 %v5134_v17 }
 0x898   : > { %5137 = vrcp.f32 %v3953_v28  ;;  %v3707_v13 = vpop.f32.mrf.mxu3  ;;  %v4120_v4 = vsel %vm4117_vm13, %v4119_v11, %v4115_v25  ;;  %vm4129_vm0 = vmor %vm4127_vm15, %vm4128_vm14  ;;  %v4148_v54 = vand.u32 2147483648, %v3953_v28  ;;  %v4146_v23 = vand.u32 2147483647, %v3953_v28 }
 0x899   : > { %v3875_v27 = vmul.f32 %v3707_v13, %v7187_v21  ;;  %v4207_v8 = vmul.f32 %v4120_v4, %v7428_v63  ;;  %v4124_v37 = vsub.f32 1.0, %v4123_v53  ;;  %v4134_v21 = vor.u32 1.1754944e-38, %v4133_v30 }
 0x89a   : > { %vm4142_vm3 = vweird.f32 %v3953_v28  ;;  %vm4147_vm5 = vcmp.eq.f32.partialorder %v4146_v23, 8.507059e+37 }
 0x89b   : > { %v7452_v7 = vadd.f32 %v3875_v27, %v3856_v55  ;;  %4275 = vmatmul.f32.gmra.mxu1 %v4207_v8  ;;  %v4125_v48 = vmul.f32 %v5134_v17, %v4124_v37 }
 0x89c   : > { %v3858_v35 = vpop.f32.mrf.mxu0 }
 0x89d   : > { %v5136_v2 = vpop.eup %5135  ;;  %v4705_v26 = vmul.f32 -1.442695, %v7452_v7  ;;  %v4126_v14 = vadd.f32 %v5134_v17, %v4125_v48  ;;  %v3859_v62 = vadd.f32 %v7371_v58, %v3858_v35  ;;  %v4149_v58 = vor.u32 1.1754944e-38, %v4148_v54 }
 0x89e   : > { %v5138_v33 = vpop.eup %5137  ;;  %v3954_v46 = vadd.f32 1.0, %v5136_v2  ;;  %v5165_v2 = vld [vmem:[%s5870_s27] sm:$0xff] }
 0x89f   : > { %5139 = vpow2.f32 %v4705_v26  ;;  %v4130_v63 = vsel %vm4129_vm0, %v5134_v17, %v4126_v14  ;;  %v4138_v59 = vmul.f32 %v5138_v33, %v3953_v28  ;;  %vm4143_vm2 = vweird.f32 %v5138_v33 }
 0x8a0   : > { %5141 = vrcp.f32 %v3954_v46  ;;  %v3710_v51 = vpop.f32.mrf.mxu3  ;;  %v4135_v31 = vsel %vm4132_vm1, %v4134_v21, %v4130_v63  ;;  %vm4144_vm4 = vmor %vm4142_vm3, %vm4143_vm2  ;;  %v4163_v0 = vand.u32 2147483648, %v3954_v46  ;;  %v4161_v40 = vand.u32 2147483647, %v3954_v46 }
 0x8a1   : > { %v3876_v5 = vmul.f32 %v3710_v51, %v7190_v34  ;;  %v4208_v10 = vmul.f32 %v4135_v31, %v7434_v61  ;;  %v4139_v56 = vsub.f32 1.0, %v4138_v59  ;;  %vm4157_vm7 = vweird.f32 %v3954_v46  ;;  %v5167_v59 = vld [vmem:[%s5870_s27 + $0x10] sm:$0xff] }
 0x8a2   : > { %v4164_v38 = vor.u32 1.1754944e-38, %v4163_v0  ;;  %vm4162_vm9 = vcmp.eq.f32.partialorder %v4161_v40, 8.507059e+37  ;;  %v5173_v40 = vld [vmem:[%s5870_s27 + $0x40] sm:$0xff] }
 0x8a3   : > { %v7458_v9 = vadd.f32 %v3876_v5, %v3859_v62  ;;  %4278 = vmatmul.f32.gmra.mxu1 %v4208_v10  ;;  %v4140_v45 = vmul.f32 %v5138_v33, %v4139_v56  ;;  %v5168_v5 = vld [vmem:[%s5870_s27 + $0x18] sm:$0xff] }
 0x8a5   : > { %v5140_v39 = vpop.eup %5139  ;;  %v4706_v36 = vmul.f32 -1.442695, %v7458_v9  ;;  %v4141_v41 = vadd.f32 %v5138_v33, %v4140_v45 }
 0x8a6   : > { %v5142_v16 = vpop.eup %5141  ;;  %v3955_v20 = vadd.f32 1.0, %v5140_v39 }
 0x8a7   : > { %5143 = vpow2.f32 %v4706_v36  ;;  %v4145_v34 = vsel %vm4144_vm4, %v5138_v33, %v4141_v41  ;;  %v4153_v61 = vmul.f32 %v5142_v16, %v3954_v46  ;;  %vm4158_vm6 = vweird.f32 %v5142_v16  ;;  %v5166_v46 = vld [vmem:[%s5870_s27 + $0x8] sm:$0xff] }
 0x8a8   : > { %5145 = vrcp.f32 %v3955_v20  ;;  %v4150_v52 = vsel %vm4147_vm5, %v4149_v58, %v4145_v34  ;;  %vm4159_vm8 = vmor %vm4157_vm7, %vm4158_vm6  ;;  %v4178_v15 = vand.u32 2147483648, %v3955_v20  ;;  %v4176_v44 = vand.u32 2147483647, %v3955_v20  ;;  %v5170_v36 = vld [vmem:[%s5870_s27 + $0x28] sm:$0xff]  ;;  %v5171_v58 = vld [vmem:[%s5870_s27 + $0x30] sm:$0xff] }
 0x8a9   : > { %v4209_v22 = vmul.f32 %v4150_v52, %v7440_v18  ;;  %v4154_v49 = vsub.f32 1.0, %v4153_v61  ;;  %vm4172_vm11 = vweird.f32 %v3955_v20 }
 0x8aa   : > { %v4179_v17 = vor.u32 1.1754944e-38, %v4178_v15  ;;  %vm4177_vm13 = vcmp.eq.f32.partialorder %v4176_v44, 8.507059e+37 }
 0x8ab   : > { %4281 = vmatmul.f32.gmra.mxu1 %v4209_v22  ;;  %v4155_v47 = vmul.f32 %v5142_v16, %v4154_v49  ;;  %v5172_v22 = vld [vmem:[%s5870_s27 + $0x38] sm:$0xff] }
 0x8ad   : > { %v5144_v19 = vpop.eup %5143  ;;  %v4156_v42 = vadd.f32 %v5142_v16, %v4155_v47 }
 0x8ae   : > { %v5146_v43 = vpop.eup %5145  ;;  %v3956_v3 = vadd.f32 1.0, %v5144_v19 }
 0x8af   : > { %v4160_v6 = vsel %vm4159_vm8, %v5142_v16, %v4156_v42  ;;  %v4168_v24 = vmul.f32 %v5146_v43, %v3955_v20  ;;  %vm4173_vm10 = vweird.f32 %v5146_v43 }
 0x8b0   : > { %5147 = vrcp.f32 %v3956_v3  ;;  %v4165_v60 = vsel %vm4162_vm9, %v4164_v38, %v4160_v6  ;;  %vm4174_vm12 = vmor %vm4172_vm11, %vm4173_vm10  ;;  %v4193_v4 = vand.u32 2147483648, %v3956_v3  ;;  %v4191_v55 = vand.u32 2147483647, %v3956_v3 }
 0x8b1   : > { %v4210_v18 = vmul.f32 %v4165_v60, %v7446_v57  ;;  %v4169_v29 = vsub.f32 1.0, %v4168_v24  ;;  %vm4187_vm15 = vweird.f32 %v3956_v3  ;;  %v5175_v60 = vld [vmem:[%s5870_s27 + $0x50] sm:$0xff] }
 0x8b2   : > { %v4194_v8 = vor.u32 1.1754944e-38, %v4193_v4  ;;  %vm4192_vm1 = vcmp.eq.f32.partialorder %v4191_v55, 8.507059e+37  ;;  %v5179_v55 = vld [vmem:[%s5870_s27 + $0x70] sm:$0xff] }
 0x8b3   : > { %4284 = vmatmul.f32.gmra.mxu1 %v4210_v18  ;;  %v4170_v1 = vmul.f32 %v5146_v43, %v4169_v29 }
 0x8b5   : > { %v4171_v32 = vadd.f32 %v5146_v43, %v4170_v1  ;;  %v5176_v1 = vld [vmem:[%s5870_s27 + $0x58] sm:$0xff] }
 0x8b6   : > { %v5148_v12 = vpop.eup %5147 }
 0x8b7   : > { %v4175_v28 = vsel %vm4174_vm12, %v5146_v43, %v4171_v32  ;;  %v4183_v11 = vmul.f32 %v5148_v12, %v3956_v3  ;;  %vm4188_vm14 = vweird.f32 %v5148_v12  ;;  %v5174_v3 = vld [vmem:[%s5870_s27 + $0x48] sm:$0xff] }
 0x8b8   : > { %v4180_v25 = vsel %vm4177_vm13, %v4179_v17, %v4175_v28  ;;  %vm4189_vm0 = vmor %vm4187_vm15, %vm4188_vm14  ;;  %v5177_v17 = vld [vmem:[%s5870_s27 + $0x60] sm:$0xff] }
 0x8b9   : > { %v4211_v53 = vmul.f32 %v4180_v25, %v7452_v7  ;;  %v4184_v13 = vsub.f32 1.0, %v4183_v11  ;;  %v7468_v7 = vld [vmem:[%s7650_s8] ss:$0 sm:$0xff] }
 0x8bb   : > { %4287 = vmatmul.f32.gmra.mxu1 %v4211_v53  ;;  %v4185_v57 = vmul.f32 %v5148_v12, %v4184_v13  ;;  %v5178_v53 = vld [vmem:[%s5870_s27 + $0x68] sm:$0xff] }
 0x8bd   : > { %v4186_v27 = vadd.f32 %v5148_v12, %v4185_v57 }
 0x8bf   : > { %v4190_v37 = vsel %vm4189_vm0, %v5148_v12, %v4186_v27 }
 0x8c0   : > { %v4195_v30 = vsel %vm4192_vm1, %v4194_v8, %v4190_v37 }
 0x8c1   : > { %v4212_v48 = vmul.f32 %v4195_v30, %v7458_v9  ;;  %v5169_v9 = vld [vmem:[%s5870_s27 + $0x20] sm:$0xff]  ;;  %v5180_v30 = vld [vmem:[%s5870_s27 + $0x78] sm:$0xff] }
 0x8c3   : > { %4290 = vmatmul.f32.gmra.mxu1 %v4212_v48 }
 0x8c8   : > { %v4246_v50 = vpop.f32.mrf.mxu1 }
 0x8c9   : > { %v4294_v26 = vadd.f32 %v5165_v2, %v4246_v50 }
 0x8cb   : > { %v4314_v14 = vadd.f32 %v7468_v7, %v4294_v26 }
 0x8cd   : > { %4330 = vst [vmem:[%s7473_s17] sm:$0xff] %v4314_v14 }
 0x8d0   : > { %v4249_v33 = vpop.f32.mrf.mxu1 }
 0x8d1   : > { %v4295_v35 = vadd.f32 %v5166_v46, %v4249_v33 }
 0x8d3   : > { %v4315_v21 = vadd.f32 %v7468_v7, %v4295_v35 }
 0x8d5   : > { %4331 = vst [vmem:[%s7473_s17 + $0x8] sm:$0xff] %v4315_v21 }
 0x8d8   : > { %v4252_v63 = vpop.f32.mrf.mxu1 }
 0x8d9   : > { %v4296_v51 = vadd.f32 %v5167_v59, %v4252_v63 }
 0x8db   : > { %v4316_v31 = vadd.f32 %v7468_v7, %v4296_v51 }
 0x8dd   : > { %4332 = vst [vmem:[%s7473_s17 + $0x10] sm:$0xff] %v4316_v31 }
 0x8e0   : > { %v4255_v62 = vpop.f32.mrf.mxu1 }
 0x8e1   : > { %v4297_v10 = vadd.f32 %v5168_v5, %v4255_v62 }
 0x8e3   : > { %v4317_v56 = vadd.f32 %v7468_v7, %v4297_v10 }
 0x8e5   : > { %4333 = vst [vmem:[%s7473_s17 + $0x18] sm:$0xff] %v4317_v56 }
 0x8e8   : > { %v4258_v54 = vpop.f32.mrf.mxu1 }
 0x8e9   : > { %v4298_v45 = vadd.f32 %v5169_v9, %v4258_v54 }
 0x8eb   : > { %v4318_v23 = vadd.f32 %v7468_v7, %v4298_v45 }
 0x8ed   : > { %4334 = vst [vmem:[%s7473_s17 + $0x20] sm:$0xff] %v4318_v23 }
 0x8f0   : > { %v4261_v39 = vpop.f32.mrf.mxu1 }
 0x8f1   : > { %v4299_v41 = vadd.f32 %v5170_v36, %v4261_v39 }
 0x8f3   : > { %v4319_v16 = vadd.f32 %v7468_v7, %v4299_v41 }
 0x8f5   : > { %4335 = vst [vmem:[%s7473_s17 + $0x28] sm:$0xff] %v4319_v16 }
 0x8f8   : > { %v4264_v20 = vpop.f32.mrf.mxu1 }
 0x8f9   : > { %v4300_v34 = vadd.f32 %v5171_v58, %v4264_v20 }
 0x8fb   : > { %v4320_v61 = vadd.f32 %v7468_v7, %v4300_v34 }
 0x8fd   : > { %4336 = vst [vmem:[%s7473_s17 + $0x30] sm:$0xff] %v4320_v61 }
 0x900   : > { %v4267_v52 = vpop.f32.mrf.mxu1 }
 0x901   : > { %v4301_v49 = vadd.f32 %v5172_v22, %v4267_v52 }
 0x903   : > { %v4321_v0 = vadd.f32 %v7468_v7, %v4301_v49 }
 0x905   : > { %4337 = vst [vmem:[%s7473_s17 + $0x38] sm:$0xff] %v4321_v0 }
 0x908   : > { %v4270_v47 = vpop.f32.mrf.mxu1 }
 0x909   : > { %v4302_v19 = vadd.f32 %v5173_v40, %v4270_v47 }
 0x90b   : > { %v4322_v42 = vadd.f32 %v7468_v7, %v4302_v19 }
 0x90d   : > { %4338 = vst [vmem:[%s7473_s17 + $0x40] sm:$0xff] %v4322_v42 }
 0x910   : > { %v4273_v43 = vpop.f32.mrf.mxu1 }
 0x911   : > { %v4303_v38 = vadd.f32 %v5174_v3, %v4273_v43 }
 0x913   : > { %v4323_v6 = vadd.f32 %v7468_v7, %v4303_v38 }
 0x915   : > { %4339 = vst [vmem:[%s7473_s17 + $0x48] sm:$0xff] %v4323_v6 }
 0x918   : > { %v4276_v24 = vpop.f32.mrf.mxu1 }
 0x919   : > { %v4304_v18 = vadd.f32 %v5175_v60, %v4276_v24 }
 0x91b   : > { %v4324_v29 = vadd.f32 %v7468_v7, %v4304_v18 }
 0x91d   : > { %4340 = vst [vmem:[%s7473_s17 + $0x50] sm:$0xff] %v4324_v29 }
 0x920   : > { %v4279_v15 = vpop.f32.mrf.mxu1 }
 0x921   : > { %v4305_v44 = vadd.f32 %v5176_v1, %v4279_v15 }
 0x923   : > { %v4325_v32 = vadd.f32 %v7468_v7, %v4305_v44 }
 0x925   : > { %4341 = vst [vmem:[%s7473_s17 + $0x58] sm:$0xff] %v4325_v32 }
 0x928   : > { %v4282_v12 = vpop.f32.mrf.mxu1 }
 0x929   : > { %v4306_v28 = vadd.f32 %v5177_v17, %v4282_v12 }
 0x92b   : > { %v4326_v11 = vadd.f32 %v7468_v7, %v4306_v28 }
 0x92d   : > { %4342 = vst [vmem:[%s7473_s17 + $0x60] sm:$0xff] %v4326_v11 }
 0x930   : > { %v4285_v25 = vpop.f32.mrf.mxu1 }
 0x931   : > { %v4307_v13 = vadd.f32 %v5178_v53, %v4285_v25 }
 0x933   : > { %v4327_v4 = vadd.f32 %v7468_v7, %v4307_v13 }
 0x935   : > { %4343 = vst [vmem:[%s7473_s17 + $0x68] sm:$0xff] %v4327_v4 }
 0x938   : > { %v4288_v57 = vpop.f32.mrf.mxu1 }
 0x939   : > { %v4308_v27 = vadd.f32 %v5179_v55, %v4288_v57 }
 0x93b   : > { %v4328_v8 = vadd.f32 %v7468_v7, %v4308_v27 }
 0x93d   : > { %4344 = vst [vmem:[%s7473_s17 + $0x70] sm:$0xff] %v4328_v8 }
 0x940   : > { %v4291_v37 = vpop.f32.mrf.mxu1 }
 0x941   : > { %v4309_v48 = vadd.f32 %v5180_v30, %v4291_v37 }
 0x943   : > { %v4329_v50 = vadd.f32 %v7468_v7, %v4309_v48 }
 0x945   : > { %4345 = vst [vmem:[%s7473_s17 + $0x78] sm:$0xff] %v4329_v50 }
 0x946   : > { %5508 = shalt.err (!%p5505_p4)
}
 0x947   : > { %s5583_s3 = smov 128   ;;  %s5584_s19 = smov 8  }
 0x948   : > { %4753 = dma.vmem_to_hbm [thread:$0]  (%p5804_p5), %s4360_s14, 2048, %s4362_s29, %s4347_s9, %s5583_s3, %s5583_s3, %s5584_s19  }
 0x949 PF: > { %s4376_s8 = sand.u32 1, %s5559_s0   ;;  %p7652_p10 = scmp.ge.s32.totalorder %s5571_s21, 2 }
 0x94a   : > { %s4377_s17 = scalar_lea.sflag [#allocation4], %s4376_s8 }
 0x94b   : > { %p4788_p11 = pnand %p7652_p10, %p5808_p6 }
 0x94d   : > { %p4789_p13 = pneg %p4788_p11 }
 0x94f   : > { %5554 = dma.done.wait (%p4789_p13), %s4377_s17, 2048  }
 0x950   : > { %5556 = vsyncadd (%p4789_p13), %s4377_s17, 4294965248  ;;  %s7653_s20 = sld [smem:[#allocation28_spill]]  ;;  %p39_p0 = scmp.ge.s32.totalorder %s5778_s12, 4  }
 0x951   : > { %s7654_s24 = sld [smem:[#allocation29_spill]]  ;;  %s7655_s0 = smov %s5563_s30 }
 0x952   : > { %s7658_s21 = smov %s5778_s12 }
 0x953   :  { %41 = sbr.rel (!%p39_p0) target bundleno = 29 (0x1d), region = 186 }
 0x956   : > { %s7656_s30 = smov %s7653_s20 }
 0x957   : > { %s7657_s20 = smov %s7654_s24 }
 0x958   :  { %4383 = vsyncpa [#allocation3], 1 }
 0x959   :  { %4385 = vsyncpa [#allocation3 + $0x1], 1 }
 0x95a   :  { %4386 = vsyncpa [#allocation6], 1 }
 0x95b   :  { %4388 = vsyncpa [#allocation6 + $0x1], 1 }
 0x95c   :  { %4389 = vsyncpa [#allocation9], 1 }
 0x95d   :  { %4390 = vsyncpa [#allocation12], 1 }
 0x95e   :  { %4391 = vsyncpa [#allocation15], 1 }
 0x95f   :  { %4392 = vsyncpa [#allocation18], 1 }
 0x960   :  { %4393 = vsyncpa [#allocation4], 1 }
 0x961   :  { %4395 = vsyncpa [#allocation4 + $0x1], 1 }

</bundles_post_ra>
